<compile_context>
chip_gen: v7x
topology: tpu7x:2x2x1
jax: 0.10.0
libtpu: 0.0.40
codegen_flags: <defaults>
</compile_context>

<pallas_src>
import math
import jax
import jax.numpy as jnp
from jax.experimental import pallas as pl
from jax.experimental.pallas import tpu as pltpu

# ---- small, TPU-friendly model dimensions (stand-in for 768-dim BERT) ----
B, S, H = 2, 8, 128        # batch, seq, hidden
NH, HD = 4, 32             # heads, head dim (NH * HD == H)
I = 256                    # FFN intermediate size
L = 2                      # number of encoder layers
V = 100                    # vocab size
C = 10                     # number of classes (matches nn.Linear(768, 10))
CPAD = 128                 # classifier output padded to a full 128-lane vreg
TOK = B * S                # flattened token axis
LN_EPS = 1e-12             # BERT layernorm eps
N_LAYER_W = 16             # weight tensors per encoder layer fed to the kernel


def _gelu(x):
    # tanh-approximate GELU (BERT activation); tanh lowers to the EUP.
    return 0.5 * x * (1.0 + jnp.tanh(0.7978845608028654 * (x + 0.044715 * x * x * x)))


def _layernorm(x, gamma, beta):
    mu = jnp.mean(x, axis=-1, keepdims=True)
    var = jnp.mean((x - mu) ** 2, axis=-1, keepdims=True)
    return (x - mu) * jax.lax.rsqrt(var + LN_EPS) * gamma + beta


# ---------------- fused Pallas kernel ----------------

def fused_forward_kernel(x_ref, amask_ref, *refs):
    """Whole forward pass in one kernel invocation (no grid).

    refs layout: [L * 16 per-layer weight refs] + [cls_w, cls_b] + [out_ref]
    Per layer: wq(NH,H,HD) bq(NH,1,HD) wk bk wv bv wo(NH,HD,H) bo(1,H)
               ln1g ln1b wi(H,I) bi(1,I) wo2(I,H) bo2(1,H) ln2g ln2b
    """
    out_ref = refs[-1]
    cls_w_ref = refs[L * N_LAYER_W]
    cls_b_ref = refs[L * N_LAYER_W + 1]

    x = x_ref[...]                      # (TOK, H) fp32 token activations
    amask = amask_ref[...]              # (TOK, TOK) fp32 additive attention mask
    inv_sqrt_d = 1.0 / math.sqrt(HD)

    for layer in range(L):              # static unroll over layers (L = 2)
        (wq, bq, wk, bk, wv, bv, wo, bo, ln1g, ln1b,
         wi, bi, wo2, bo2, ln2g, ln2b) = refs[layer * N_LAYER_W:(layer + 1) * N_LAYER_W]

        x_bf = x.astype(jnp.bfloat16)   # bf16 only at MXU inputs; fp32 accumulation

        # --- multi-head self-attention (per-head weight slabs; 2-D matmuls only) ---
        attn = jnp.zeros((TOK, H), jnp.float32)
        for n in range(NH):             # static unroll over heads
            qn = jnp.dot(x_bf, wq[n], preferred_element_type=jnp.float32) + bq[n]
            kn = jnp.dot(x_bf, wk[n], preferred_element_type=jnp.float32) + bk[n]
            vn = jnp.dot(x_bf, wv[n], preferred_element_type=jnp.float32) + bv[n]
            # scores = q @ k^T over the head dim, fp32 accumulate
            sc = jax.lax.dot_general(
                qn.astype(jnp.bfloat16), kn.astype(jnp.bfloat16),
                (((1,), (1,)), ((), ())),
                preferred_element_type=jnp.float32) * inv_sqrt_d + amask
            m = jnp.max(sc, axis=-1, keepdims=True)
            p = jnp.exp(sc - m)
            # softmax normalize via EUP approx reciprocal (fp32 math)
            p = p * pl.reciprocal(jnp.sum(p, axis=-1, keepdims=True), approx=True)
            ctx = jnp.dot(p.astype(jnp.bfloat16), vn.astype(jnp.bfloat16),
                          preferred_element_type=jnp.float32)
            attn = attn + jnp.dot(ctx.astype(jnp.bfloat16), wo[n],
                                  preferred_element_type=jnp.float32)
        attn = attn + bo[...]
        h1 = _layernorm(x + attn, ln1g[...], ln1b[...])

        # --- feed-forward ---
        f = jnp.dot(h1.astype(jnp.bfloat16), wi[...],
                    preferred_element_type=jnp.float32) + bi[...]
        f = _gelu(f)
        f = jnp.dot(f.astype(jnp.bfloat16), wo2[...],
                    preferred_element_type=jnp.float32) + bo2[...]
        x = _layernorm(h1 + f, ln2g[...], ln2b[...])

    # --- classifier fused: run over ALL tokens so the store is a full (16,128)
    #     aligned vreg slab (no masked stores, no in-kernel CLS row gather).
    #     CLS rows are selected outside the kernel with a strided slice.
    out_ref[...] = (jnp.dot(x.astype(jnp.bfloat16), cls_w_ref[...],
                            preferred_element_type=jnp.float32) + cls_b_ref[...])


# ---------------- host-side weight layout prep (plain JAX, one-time) ----------------

def _split_qkv_w(w):   # (H, NH*HD) -> (NH, H, HD), bf16
    return w.reshape(H, NH, HD).transpose(1, 0, 2).astype(jnp.bfloat16)


def _split_qkv_b(b):   # (1, NH*HD) -> (NH, 1, HD), fp32
    return b.reshape(NH, 1, HD)


def _split_out_w(w):   # (NH*HD, H) -> (NH, HD, H), bf16
    return w.reshape(NH, HD, H).astype(jnp.bfloat16)


def _flatten_layer(lp):
    return [
        _split_qkv_w(lp['wq']), _split_qkv_b(lp['bq']),
        _split_qkv_w(lp['wk']), _split_qkv_b(lp['bk']),
        _split_qkv_w(lp['wv']), _split_qkv_b(lp['bv']),
        _split_out_w(lp['wo']), lp['bo'],
        lp['ln1g'], lp['ln1b'],
        lp['wi'].astype(jnp.bfloat16), lp['bi'],
        lp['wo2'].astype(jnp.bfloat16), lp['bo2'],
        lp['ln2g'], lp['ln2b'],
    ]


# ---------------- wrapper ----------------

def neural_network_forward(params, input_ids, attention_mask):
    # Embedding lookup + embedding layernorm: tiny glue, plain JAX.
    x = (params['word_emb'][input_ids]
         + params['pos_emb'][None, :, :]
         + params['type_emb'][0][None, None, :])
    x = _layernorm(x, params['emb_ln_g'], params['emb_ln_b'])
    x_tok = x.reshape(TOK, H).astype(jnp.float32)          # flatten (B, S) -> tokens

    # Additive attention mask computed ONCE (not per layer): blocks padded keys
    # and cross-batch pairs (batch is folded into the flattened token axis).
    tok_batch = jnp.arange(TOK) // S
    same_batch = tok_batch[:, None] == tok_batch[None, :]
    key_valid = attention_mask.reshape(TOK) > 0
    amask = jnp.where(same_batch & key_valid[None, :], 0.0, -1e9).astype(jnp.float32)

    flat_weights = []
    for lp in params['layers']:
        flat_weights += _flatten_layer(lp)

    # classifier weights, lane-padded to 128 outputs (no masked lane stores)
    cls_w = jnp.zeros((H, CPAD), jnp.float32).at[:, :C].set(params['cls_w'])
    cls_w = cls_w.astype(jnp.bfloat16)
    cls_b = jnp.zeros((1, CPAD), jnp.float32).at[:, :C].set(params['cls_b'])

    out_tok = pl.pallas_call(
        fused_forward_kernel,
        out_shape=jax.ShapeDtypeStruct((TOK, CPAD), jnp.float32),
        compiler_params=pltpu.CompilerParams(vmem_limit_bytes=32 * 1024 * 1024),
    )(x_tok, amask, *flat_weights, cls_w, cls_b)

    # CLS token = row 0 of each batch element in the flattened token axis.
    return out_tok[::S, :C]                                 # (B, 10) logits


# ---------------- deterministic parameter init ----------------

def init_params(key):
    keys = list(jax.random.split(key, 64))
    it = iter(keys)

    def nrm(shape):
        return 0.02 * jax.random.normal(next(it), shape, jnp.float32)

    params = {
        'word_emb': nrm((V, H)),
        'pos_emb': nrm((S, H)),
        'type_emb': nrm((2, H)),
        'emb_ln_g': jnp.ones((1, H), jnp.float32),
        'emb_ln_b': jnp.zeros((1, H), jnp.float32),
        'layers': [],
        'cls_w': nrm((H, C)),                    # stored (H_in, C_out)
        'cls_b': jnp.zeros((1, C), jnp.float32),
    }
    for _ in range(L):
        params['layers'].append(dict(
            wq=nrm((H, H)),  bq=jnp.zeros((1, H), jnp.float32),
            wk=nrm((H, H)),  bk=jnp.zeros((1, H), jnp.float32),
            wv=nrm((H, H)),  bv=jnp.zeros((1, H), jnp.float32),
            wo=nrm((H, H)),  bo=jnp.zeros((1, H), jnp.float32),
            ln1g=jnp.ones((1, H), jnp.float32), ln1b=jnp.zeros((1, H), jnp.float32),
            wi=nrm((H, I)),  bi=jnp.zeros((1, I), jnp.float32),
            wo2=nrm((I, H)), bo2=jnp.zeros((1, H), jnp.float32),
            ln2g=jnp.ones((1, H), jnp.float32), ln2b=jnp.zeros((1, H), jnp.float32),
        ))
    return params


if __name__ == "__main__":
    root = jax.random.PRNGKey(0)
    k_param, k_ids = jax.random.split(root)

    params = init_params(k_param)
    input_ids = jax.random.randint(k_ids, (B, S), 0, V, dtype=jnp.int32)
    attention_mask = jnp.ones((B, S), jnp.int32).at[1, 6:].set(0)  # pad tail of item 1

    logits = neural_network_forward(params, input_ids, attention_mask)
    logits = jax.block_until_ready(logits)
    assert logits.shape == (B, C) and logits.dtype == jnp.float32
    print("KERNEL_OK")
</pallas_src>

<mosaic_0001>
module attributes {stable_mosaic.version = 11 : i64} {
  func.func @fused_forward_kernel(%arg0: memref<16x128xf32, #tpu.memory_space<vmem>>, %arg1: memref<16x16xf32, #tpu.memory_space<vmem>>, %arg2: memref<4x128x32xbf16, #tpu.memory_space<vmem>>, %arg3: memref<4x1x32xf32, #tpu.memory_space<vmem>>, %arg4: memref<4x128x32xbf16, #tpu.memory_space<vmem>>, %arg5: memref<4x1x32xf32, #tpu.memory_space<vmem>>, %arg6: memref<4x128x32xbf16, #tpu.memory_space<vmem>>, %arg7: memref<4x1x32xf32, #tpu.memory_space<vmem>>, %arg8: memref<4x32x128xbf16, #tpu.memory_space<vmem>>, %arg9: memref<1x128xf32, #tpu.memory_space<vmem>>, %arg10: memref<1x128xf32, #tpu.memory_space<vmem>>, %arg11: memref<1x128xf32, #tpu.memory_space<vmem>>, %arg12: memref<128x256xbf16, #tpu.memory_space<vmem>>, %arg13: memref<1x256xf32, #tpu.memory_space<vmem>>, %arg14: memref<256x128xbf16, #tpu.memory_space<vmem>>, %arg15: memref<1x128xf32, #tpu.memory_space<vmem>>, %arg16: memref<1x128xf32, #tpu.memory_space<vmem>>, %arg17: memref<1x128xf32, #tpu.memory_space<vmem>>, %arg18: memref<4x128x32xbf16, #tpu.memory_space<vmem>>, %arg19: memref<4x1x32xf32, #tpu.memory_space<vmem>>, %arg20: memref<4x128x32xbf16, #tpu.memory_space<vmem>>, %arg21: memref<4x1x32xf32, #tpu.memory_space<vmem>>, %arg22: memref<4x128x32xbf16, #tpu.memory_space<vmem>>, %arg23: memref<4x1x32xf32, #tpu.memory_space<vmem>>, %arg24: memref<4x32x128xbf16, #tpu.memory_space<vmem>>, %arg25: memref<1x128xf32, #tpu.memory_space<vmem>>, %arg26: memref<1x128xf32, #tpu.memory_space<vmem>>, %arg27: memref<1x128xf32, #tpu.memory_space<vmem>>, %arg28: memref<128x256xbf16, #tpu.memory_space<vmem>>, %arg29: memref<1x256xf32, #tpu.memory_space<vmem>>, %arg30: memref<256x128xbf16, #tpu.memory_space<vmem>>, %arg31: memref<1x128xf32, #tpu.memory_space<vmem>>, %arg32: memref<1x128xf32, #tpu.memory_space<vmem>>, %arg33: memref<1x128xf32, #tpu.memory_space<vmem>>, %arg34: memref<128x128xbf16, #tpu.memory_space<vmem>>, %arg35: memref<1x128xf32, #tpu.memory_space<vmem>>, %arg36: memref<16x128xf32, #tpu.memory_space<vmem>>) attributes {dimension_semantics = [], scalar_prefetch = 0 : i64, scratch_operands = 0 : i64, tpu.core_type = #tpu.core_type<tc>} {
    %c0 = arith.constant 0 : index
    %c0_0 = arith.constant 0 : index
    %0 = vector.load %arg0[%c0, %c0_0] : memref<16x128xf32, #tpu.memory_space<vmem>>, vector<16x128xf32>
    %c0_1 = arith.constant 0 : index
    %c0_2 = arith.constant 0 : index
    %1 = vector.load %arg1[%c0_1, %c0_2] : memref<16x16xf32, #tpu.memory_space<vmem>>, vector<16x16xf32>
    %2 = arith.truncf %0 : vector<16x128xf32> to vector<16x128xbf16>
    %cst = arith.constant 0.000000e+00 : f32
    %3 = vector.broadcast %cst : f32 to vector<16x128xf32>
    %c0_3 = arith.constant 0 : index
    %c0_4 = arith.constant 0 : index
    %c0_5 = arith.constant 0 : index
    %4 = vector.load %arg2[%c0_3, %c0_4, %c0_5] : memref<4x128x32xbf16, #tpu.memory_space<vmem>>, vector<1x128x32xbf16>
    %5 = vector.shape_cast %4 : vector<1x128x32xbf16> to vector<128x32xbf16>
    %cst_6 = arith.constant dense<0.000000e+00> : vector<16x32xf32>
    %6 = tpu.matmul %2, %5, %cst_6 {dimension_numbers = #tpu.dot_dimension_numbers<[1], [0], [0], [1], [0, 0, 1, 1], [], []>} : vector<16x128xbf16>, vector<128x32xbf16>, vector<16x32xf32> -> vector<16x32xf32>
    %c0_7 = arith.constant 0 : index
    %c0_8 = arith.constant 0 : index
    %c0_9 = arith.constant 0 : index
    %7 = vector.load %arg3[%c0_7, %c0_8, %c0_9] : memref<4x1x32xf32, #tpu.memory_space<vmem>>, vector<1x1x32xf32>
    %8 = vector.shape_cast %7 : vector<1x1x32xf32> to vector<1x32xf32>
    %9 = vector.broadcast %8 : vector<1x32xf32> to vector<16x32xf32>
    %10 = arith.addf %6, %9 : vector<16x32xf32>
    %c0_10 = arith.constant 0 : index
    %c0_11 = arith.constant 0 : index
    %c0_12 = arith.constant 0 : index
    %11 = vector.load %arg4[%c0_10, %c0_11, %c0_12] : memref<4x128x32xbf16, #tpu.memory_space<vmem>>, vector<1x128x32xbf16>
    %12 = vector.shape_cast %11 : vector<1x128x32xbf16> to vector<128x32xbf16>
    %cst_13 = arith.constant dense<0.000000e+00> : vector<16x32xf32>
    %13 = tpu.matmul %2, %12, %cst_13 {dimension_numbers = #tpu.dot_dimension_numbers<[1], [0], [0], [1], [0, 0, 1, 1], [], []>} : vector<16x128xbf16>, vector<128x32xbf16>, vector<16x32xf32> -> vector<16x32xf32>
    %c0_14 = arith.constant 0 : index
    %c0_15 = arith.constant 0 : index
    %c0_16 = arith.constant 0 : index
    %14 = vector.load %arg5[%c0_14, %c0_15, %c0_16] : memref<4x1x32xf32, #tpu.memory_space<vmem>>, vector<1x1x32xf32>
    %15 = vector.shape_cast %14 : vector<1x1x32xf32> to vector<1x32xf32>
    %16 = vector.broadcast %15 : vector<1x32xf32> to vector<16x32xf32>
    %17 = arith.addf %13, %16 : vector<16x32xf32>
    %c0_17 = arith.constant 0 : index
    %c0_18 = arith.constant 0 : index
    %c0_19 = arith.constant 0 : index
    %18 = vector.load %arg6[%c0_17, %c0_18, %c0_19] : memref<4x128x32xbf16, #tpu.memory_space<vmem>>, vector<1x128x32xbf16>
    %19 = vector.shape_cast %18 : vector<1x128x32xbf16> to vector<128x32xbf16>
    %cst_20 = arith.constant dense<0.000000e+00> : vector<16x32xf32>
    %20 = tpu.matmul %2, %19, %cst_20 {dimension_numbers = #tpu.dot_dimension_numbers<[1], [0], [0], [1], [0, 0, 1, 1], [], []>} : vector<16x128xbf16>, vector<128x32xbf16>, vector<16x32xf32> -> vector<16x32xf32>
    %c0_21 = arith.constant 0 : index
    %c0_22 = arith.constant 0 : index
    %c0_23 = arith.constant 0 : index
    %21 = vector.load %arg7[%c0_21, %c0_22, %c0_23] : memref<4x1x32xf32, #tpu.memory_space<vmem>>, vector<1x1x32xf32>
    %22 = vector.shape_cast %21 : vector<1x1x32xf32> to vector<1x32xf32>
    %23 = vector.broadcast %22 : vector<1x32xf32> to vector<16x32xf32>
    %24 = arith.addf %20, %23 : vector<16x32xf32>
    %25 = arith.truncf %10 : vector<16x32xf32> to vector<16x32xbf16>
    %26 = arith.truncf %17 : vector<16x32xf32> to vector<16x32xbf16>
    %cst_24 = arith.constant dense<0.000000e+00> : vector<16x16xf32>
    %27 = tpu.matmul %25, %26, %cst_24 {dimension_numbers = #tpu.dot_dimension_numbers<[1], [1], [0], [0], [0, 0, 1, 0], [], []>} : vector<16x32xbf16>, vector<16x32xbf16>, vector<16x16xf32> -> vector<16x16xf32>
    %cst_25 = arith.constant 0.176776692 : f32
    %28 = vector.broadcast %cst_25 : f32 to vector<16x16xf32>
    %29 = arith.mulf %27, %28 : vector<16x16xf32>
    %30 = arith.addf %29, %1 : vector<16x16xf32>
    %cst_26 = arith.constant dense<0xFF800000> : vector<16xf32>
    %31 = vector.multi_reduction <maximumf>, %30, %cst_26 [1] : vector<16x16xf32> to vector<16xf32>
    %32 = vector.shape_cast %31 : vector<16xf32> to vector<16x1xf32>
    %33 = vector.broadcast %32 : vector<16x1xf32> to vector<16x16xf32>
    %34 = arith.subf %30, %33 : vector<16x16xf32>
    %35 = math.exp %34 : vector<16x16xf32>
    %cst_27 = arith.constant dense<0.000000e+00> : vector<16xf32>
    %36 = vector.multi_reduction <add>, %35, %cst_27 [1] : vector<16x16xf32> to vector<16xf32>
    %37 = vector.shape_cast %36 : vector<16xf32> to vector<16x1xf32>
    %38 = tpu.reciprocal %37 {approx = true} : vector<16x1xf32> -> vector<16x1xf32>
    %39 = vector.broadcast %38 : vector<16x1xf32> to vector<16x16xf32>
    %40 = arith.mulf %35, %39 : vector<16x16xf32>
    %41 = arith.truncf %40 : vector<16x16xf32> to vector<16x16xbf16>
    %42 = arith.truncf %24 : vector<16x32xf32> to vector<16x32xbf16>
    %cst_28 = arith.constant dense<0.000000e+00> : vector<16x32xf32>
    %43 = tpu.matmul %41, %42, %cst_28 {dimension_numbers = #tpu.dot_dimension_numbers<[1], [0], [0], [1], [0, 0, 1, 1], [], []>} : vector<16x16xbf16>, vector<16x32xbf16>, vector<16x32xf32> -> vector<16x32xf32>
    %44 = arith.truncf %43 : vector<16x32xf32> to vector<16x32xbf16>
    %c0_29 = arith.constant 0 : index
    %c0_30 = arith.constant 0 : index
    %c0_31 = arith.constant 0 : index
    %45 = vector.load %arg8[%c0_29, %c0_30, %c0_31] : memref<4x32x128xbf16, #tpu.memory_space<vmem>>, vector<1x32x128xbf16>
    %46 = vector.shape_cast %45 : vector<1x32x128xbf16> to vector<32x128xbf16>
    %cst_32 = arith.constant dense<0.000000e+00> : vector<16x128xf32>
    %47 = tpu.matmul %44, %46, %cst_32 {dimension_numbers = #tpu.dot_dimension_numbers<[1], [0], [0], [1], [0, 0, 1, 1], [], []>} : vector<16x32xbf16>, vector<32x128xbf16>, vector<16x128xf32> -> vector<16x128xf32>
    %48 = arith.addf %3, %47 : vector<16x128xf32>
    %c1 = arith.constant 1 : index
    %c0_33 = arith.constant 0 : index
    %c0_34 = arith.constant 0 : index
    %49 = vector.load %arg2[%c1, %c0_33, %c0_34] : memref<4x128x32xbf16, #tpu.memory_space<vmem>>, vector<1x128x32xbf16>
    %50 = vector.shape_cast %49 : vector<1x128x32xbf16> to vector<128x32xbf16>
    %cst_35 = arith.constant dense<0.000000e+00> : vector<16x32xf32>
    %51 = tpu.matmul %2, %50, %cst_35 {dimension_numbers = #tpu.dot_dimension_numbers<[1], [0], [0], [1], [0, 0, 1, 1], [], []>} : vector<16x128xbf16>, vector<128x32xbf16>, vector<16x32xf32> -> vector<16x32xf32>
    %c1_36 = arith.constant 1 : index
    %c0_37 = arith.constant 0 : index
    %c0_38 = arith.constant 0 : index
    %52 = vector.load %arg3[%c1_36, %c0_37, %c0_38] : memref<4x1x32xf32, #tpu.memory_space<vmem>>, vector<1x1x32xf32>
    %53 = vector.shape_cast %52 : vector<1x1x32xf32> to vector<1x32xf32>
    %54 = vector.broadcast %53 : vector<1x32xf32> to vector<16x32xf32>
    %55 = arith.addf %51, %54 : vector<16x32xf32>
    %c1_39 = arith.constant 1 : index
    %c0_40 = arith.constant 0 : index
    %c0_41 = arith.constant 0 : index
    %56 = vector.load %arg4[%c1_39, %c0_40, %c0_41] : memref<4x128x32xbf16, #tpu.memory_space<vmem>>, vector<1x128x32xbf16>
    %57 = vector.shape_cast %56 : vector<1x128x32xbf16> to vector<128x32xbf16>
    %cst_42 = arith.constant dense<0.000000e+00> : vector<16x32xf32>
    %58 = tpu.matmul %2, %57, %cst_42 {dimension_numbers = #tpu.dot_dimension_numbers<[1], [0], [0], [1], [0, 0, 1, 1], [], []>} : vector<16x128xbf16>, vector<128x32xbf16>, vector<16x32xf32> -> vector<16x32xf32>
    %c1_43 = arith.constant 1 : index
    %c0_44 = arith.constant 0 : index
    %c0_45 = arith.constant 0 : index
    %59 = vector.load %arg5[%c1_43, %c0_44, %c0_45] : memref<4x1x32xf32, #tpu.memory_space<vmem>>, vector<1x1x32xf32>
    %60 = vector.shape_cast %59 : vector<1x1x32xf32> to vector<1x32xf32>
    %61 = vector.broadcast %60 : vector<1x32xf32> to vector<16x32xf32>
    %62 = arith.addf %58, %61 : vector<16x32xf32>
    %c1_46 = arith.constant 1 : index
    %c0_47 = arith.constant 0 : index
    %c0_48 = arith.constant 0 : index
    %63 = vector.load %arg6[%c1_46, %c0_47, %c0_48] : memref<4x128x32xbf16, #tpu.memory_space<vmem>>, vector<1x128x32xbf16>
    %64 = vector.shape_cast %63 : vector<1x128x32xbf16> to vector<128x32xbf16>
    %cst_49 = arith.constant dense<0.000000e+00> : vector<16x32xf32>
    %65 = tpu.matmul %2, %64, %cst_49 {dimension_numbers = #tpu.dot_dimension_numbers<[1], [0], [0], [1], [0, 0, 1, 1], [], []>} : vector<16x128xbf16>, vector<128x32xbf16>, vector<16x32xf32> -> vector<16x32xf32>
    %c1_50 = arith.constant 1 : index
    %c0_51 = arith.constant 0 : index
    %c0_52 = arith.constant 0 : index
    %66 = vector.load %arg7[%c1_50, %c0_51, %c0_52] : memref<4x1x32xf32, #tpu.memory_space<vmem>>, vector<1x1x32xf32>
    %67 = vector.shape_cast %66 : vector<1x1x32xf32> to vector<1x32xf32>
    %68 = vector.broadcast %67 : vector<1x32xf32> to vector<16x32xf32>
    %69 = arith.addf %65, %68 : vector<16x32xf32>
    %70 = arith.truncf %55 : vector<16x32xf32> to vector<16x32xbf16>
    %71 = arith.truncf %62 : vector<16x32xf32> to vector<16x32xbf16>
    %cst_53 = arith.constant dense<0.000000e+00> : vector<16x16xf32>
    %72 = tpu.matmul %70, %71, %cst_53 {dimension_numbers = #tpu.dot_dimension_numbers<[1], [1], [0], [0], [0, 0, 1, 0], [], []>} : vector<16x32xbf16>, vector<16x32xbf16>, vector<16x16xf32> -> vector<16x16xf32>
    %cst_54 = arith.constant 0.176776692 : f32
    %73 = vector.broadcast %cst_54 : f32 to vector<16x16xf32>
    %74 = arith.mulf %72, %73 : vector<16x16xf32>
    %75 = arith.addf %74, %1 : vector<16x16xf32>
    %cst_55 = arith.constant dense<0xFF800000> : vector<16xf32>
    %76 = vector.multi_reduction <maximumf>, %75, %cst_55 [1] : vector<16x16xf32> to vector<16xf32>
    %77 = vector.shape_cast %76 : vector<16xf32> to vector<16x1xf32>
    %78 = vector.broadcast %77 : vector<16x1xf32> to vector<16x16xf32>
    %79 = arith.subf %75, %78 : vector<16x16xf32>
    %80 = math.exp %79 : vector<16x16xf32>
    %cst_56 = arith.constant dense<0.000000e+00> : vector<16xf32>
    %81 = vector.multi_reduction <add>, %80, %cst_56 [1] : vector<16x16xf32> to vector<16xf32>
    %82 = vector.shape_cast %81 : vector<16xf32> to vector<16x1xf32>
    %83 = tpu.reciprocal %82 {approx = true} : vector<16x1xf32> -> vector<16x1xf32>
    %84 = vector.broadcast %83 : vector<16x1xf32> to vector<16x16xf32>
    %85 = arith.mulf %80, %84 : vector<16x16xf32>
    %86 = arith.truncf %85 : vector<16x16xf32> to vector<16x16xbf16>
    %87 = arith.truncf %69 : vector<16x32xf32> to vector<16x32xbf16>
    %cst_57 = arith.constant dense<0.000000e+00> : vector<16x32xf32>
    %88 = tpu.matmul %86, %87, %cst_57 {dimension_numbers = #tpu.dot_dimension_numbers<[1], [0], [0], [1], [0, 0, 1, 1], [], []>} : vector<16x16xbf16>, vector<16x32xbf16>, vector<16x32xf32> -> vector<16x32xf32>
    %89 = arith.truncf %88 : vector<16x32xf32> to vector<16x32xbf16>
    %c1_58 = arith.constant 1 : index
    %c0_59 = arith.constant 0 : index
    %c0_60 = arith.constant 0 : index
    %90 = vector.load %arg8[%c1_58, %c0_59, %c0_60] : memref<4x32x128xbf16, #tpu.memory_space<vmem>>, vector<1x32x128xbf16>
    %91 = vector.shape_cast %90 : vector<1x32x128xbf16> to vector<32x128xbf16>
    %cst_61 = arith.constant dense<0.000000e+00> : vector<16x128xf32>
    %92 = tpu.matmul %89, %91, %cst_61 {dimension_numbers = #tpu.dot_dimension_numbers<[1], [0], [0], [1], [0, 0, 1, 1], [], []>} : vector<16x32xbf16>, vector<32x128xbf16>, vector<16x128xf32> -> vector<16x128xf32>
    %93 = arith.addf %48, %92 : vector<16x128xf32>
    %c2 = arith.constant 2 : index
    %c0_62 = arith.constant 0 : index
    %c0_63 = arith.constant 0 : index
    %94 = vector.load %arg2[%c2, %c0_62, %c0_63] : memref<4x128x32xbf16, #tpu.memory_space<vmem>>, vector<1x128x32xbf16>
    %95 = vector.shape_cast %94 : vector<1x128x32xbf16> to vector<128x32xbf16>
    %cst_64 = arith.constant dense<0.000000e+00> : vector<16x32xf32>
    %96 = tpu.matmul %2, %95, %cst_64 {dimension_numbers = #tpu.dot_dimension_numbers<[1], [0], [0], [1], [0, 0, 1, 1], [], []>} : vector<16x128xbf16>, vector<128x32xbf16>, vector<16x32xf32> -> vector<16x32xf32>
    %c2_65 = arith.constant 2 : index
    %c0_66 = arith.constant 0 : index
    %c0_67 = arith.constant 0 : index
    %97 = vector.load %arg3[%c2_65, %c0_66, %c0_67] : memref<4x1x32xf32, #tpu.memory_space<vmem>>, vector<1x1x32xf32>
    %98 = vector.shape_cast %97 : vector<1x1x32xf32> to vector<1x32xf32>
    %99 = vector.broadcast %98 : vector<1x32xf32> to vector<16x32xf32>
    %100 = arith.addf %96, %99 : vector<16x32xf32>
    %c2_68 = arith.constant 2 : index
    %c0_69 = arith.constant 0 : index
    %c0_70 = arith.constant 0 : index
    %101 = vector.load %arg4[%c2_68, %c0_69, %c0_70] : memref<4x128x32xbf16, #tpu.memory_space<vmem>>, vector<1x128x32xbf16>
    %102 = vector.shape_cast %101 : vector<1x128x32xbf16> to vector<128x32xbf16>
    %cst_71 = arith.constant dense<0.000000e+00> : vector<16x32xf32>
    %103 = tpu.matmul %2, %102, %cst_71 {dimension_numbers = #tpu.dot_dimension_numbers<[1], [0], [0], [1], [0, 0, 1, 1], [], []>} : vector<16x128xbf16>, vector<128x32xbf16>, vector<16x32xf32> -> vector<16x32xf32>
    %c2_72 = arith.constant 2 : index
    %c0_73 = arith.constant 0 : index
    %c0_74 = arith.constant 0 : index
    %104 = vector.load %arg5[%c2_72, %c0_73, %c0_74] : memref<4x1x32xf32, #tpu.memory_space<vmem>>, vector<1x1x32xf32>
    %105 = vector.shape_cast %104 : vector<1x1x32xf32> to vector<1x32xf32>
    %106 = vector.broadcast %105 : vector<1x32xf32> to vector<16x32xf32>
    %107 = arith.addf %103, %106 : vector<16x32xf32>
    %c2_75 = arith.constant 2 : index
    %c0_76 = arith.constant 0 : index
    %c0_77 = arith.constant 0 : index
    %108 = vector.load %arg6[%c2_75, %c0_76, %c0_77] : memref<4x128x32xbf16, #tpu.memory_space<vmem>>, vector<1x128x32xbf16>
    %109 = vector.shape_cast %108 : vector<1x128x32xbf16> to vector<128x32xbf16>
    %cst_78 = arith.constant dense<0.000000e+00> : vector<16x32xf32>
    %110 = tpu.matmul %2, %109, %cst_78 {dimension_numbers = #tpu.dot_dimension_numbers<[1], [0], [0], [1], [0, 0, 1, 1], [], []>} : vector<16x128xbf16>, vector<128x32xbf16>, vector<16x32xf32> -> vector<16x32xf32>
    %c2_79 = arith.constant 2 : index
    %c0_80 = arith.constant 0 : index
    %c0_81 = arith.constant 0 : index
    %111 = vector.load %arg7[%c2_79, %c0_80, %c0_81] : memref<4x1x32xf32, #tpu.memory_space<vmem>>, vector<1x1x32xf32>
    %112 = vector.shape_cast %111 : vector<1x1x32xf32> to vector<1x32xf32>
    %113 = vector.broadcast %112 : vector<1x32xf32> to vector<16x32xf32>
    %114 = arith.addf %110, %113 : vector<16x32xf32>
    %115 = arith.truncf %100 : vector<16x32xf32> to vector<16x32xbf16>
    %116 = arith.truncf %107 : vector<16x32xf32> to vector<16x32xbf16>
    %cst_82 = arith.constant dense<0.000000e+00> : vector<16x16xf32>
    %117 = tpu.matmul %115, %116, %cst_82 {dimension_numbers = #tpu.dot_dimension_numbers<[1], [1], [0], [0], [0, 0, 1, 0], [], []>} : vector<16x32xbf16>, vector<16x32xbf16>, vector<16x16xf32> -> vector<16x16xf32>
    %cst_83 = arith.constant 0.176776692 : f32
    %118 = vector.broadcast %cst_83 : f32 to vector<16x16xf32>
    %119 = arith.mulf %117, %118 : vector<16x16xf32>
    %120 = arith.addf %119, %1 : vector<16x16xf32>
    %cst_84 = arith.constant dense<0xFF800000> : vector<16xf32>
    %121 = vector.multi_reduction <maximumf>, %120, %cst_84 [1] : vector<16x16xf32> to vector<16xf32>
    %122 = vector.shape_cast %121 : vector<16xf32> to vector<16x1xf32>
    %123 = vector.broadcast %122 : vector<16x1xf32> to vector<16x16xf32>
    %124 = arith.subf %120, %123 : vector<16x16xf32>
    %125 = math.exp %124 : vector<16x16xf32>
    %cst_85 = arith.constant dense<0.000000e+00> : vector<16xf32>
    %126 = vector.multi_reduction <add>, %125, %cst_85 [1] : vector<16x16xf32> to vector<16xf32>
    %127 = vector.shape_cast %126 : vector<16xf32> to vector<16x1xf32>
    %128 = tpu.reciprocal %127 {approx = true} : vector<16x1xf32> -> vector<16x1xf32>
    %129 = vector.broadcast %128 : vector<16x1xf32> to vector<16x16xf32>
    %130 = arith.mulf %125, %129 : vector<16x16xf32>
    %131 = arith.truncf %130 : vector<16x16xf32> to vector<16x16xbf16>
    %132 = arith.truncf %114 : vector<16x32xf32> to vector<16x32xbf16>
    %cst_86 = arith.constant dense<0.000000e+00> : vector<16x32xf32>
    %133 = tpu.matmul %131, %132, %cst_86 {dimension_numbers = #tpu.dot_dimension_numbers<[1], [0], [0], [1], [0, 0, 1, 1], [], []>} : vector<16x16xbf16>, vector<16x32xbf16>, vector<16x32xf32> -> vector<16x32xf32>
    %134 = arith.truncf %133 : vector<16x32xf32> to vector<16x32xbf16>
    %c2_87 = arith.constant 2 : index
    %c0_88 = arith.constant 0 : index
    %c0_89 = arith.constant 0 : index
    %135 = vector.load %arg8[%c2_87, %c0_88, %c0_89] : memref<4x32x128xbf16, #tpu.memory_space<vmem>>, vector<1x32x128xbf16>
    %136 = vector.shape_cast %135 : vector<1x32x128xbf16> to vector<32x128xbf16>
    %cst_90 = arith.constant dense<0.000000e+00> : vector<16x128xf32>
    %137 = tpu.matmul %134, %136, %cst_90 {dimension_numbers = #tpu.dot_dimension_numbers<[1], [0], [0], [1], [0, 0, 1, 1], [], []>} : vector<16x32xbf16>, vector<32x128xbf16>, vector<16x128xf32> -> vector<16x128xf32>
    %138 = arith.addf %93, %137 : vector<16x128xf32>
    %c3 = arith.constant 3 : index
    %c0_91 = arith.constant 0 : index
    %c0_92 = arith.constant 0 : index
    %139 = vector.load %arg2[%c3, %c0_91, %c0_92] : memref<4x128x32xbf16, #tpu.memory_space<vmem>>, vector<1x128x32xbf16>
    %140 = vector.shape_cast %139 : vector<1x128x32xbf16> to vector<128x32xbf16>
    %cst_93 = arith.constant dense<0.000000e+00> : vector<16x32xf32>
    %141 = tpu.matmul %2, %140, %cst_93 {dimension_numbers = #tpu.dot_dimension_numbers<[1], [0], [0], [1], [0, 0, 1, 1], [], []>} : vector<16x128xbf16>, vector<128x32xbf16>, vector<16x32xf32> -> vector<16x32xf32>
    %c3_94 = arith.constant 3 : index
    %c0_95 = arith.constant 0 : index
    %c0_96 = arith.constant 0 : index
    %142 = vector.load %arg3[%c3_94, %c0_95, %c0_96] : memref<4x1x32xf32, #tpu.memory_space<vmem>>, vector<1x1x32xf32>
    %143 = vector.shape_cast %142 : vector<1x1x32xf32> to vector<1x32xf32>
    %144 = vector.broadcast %143 : vector<1x32xf32> to vector<16x32xf32>
    %145 = arith.addf %141, %144 : vector<16x32xf32>
    %c3_97 = arith.constant 3 : index
    %c0_98 = arith.constant 0 : index
    %c0_99 = arith.constant 0 : index
    %146 = vector.load %arg4[%c3_97, %c0_98, %c0_99] : memref<4x128x32xbf16, #tpu.memory_space<vmem>>, vector<1x128x32xbf16>
    %147 = vector.shape_cast %146 : vector<1x128x32xbf16> to vector<128x32xbf16>
    %cst_100 = arith.constant dense<0.000000e+00> : vector<16x32xf32>
    %148 = tpu.matmul %2, %147, %cst_100 {dimension_numbers = #tpu.dot_dimension_numbers<[1], [0], [0], [1], [0, 0, 1, 1], [], []>} : vector<16x128xbf16>, vector<128x32xbf16>, vector<16x32xf32> -> vector<16x32xf32>
    %c3_101 = arith.constant 3 : index
    %c0_102 = arith.constant 0 : index
    %c0_103 = arith.constant 0 : index
    %149 = vector.load %arg5[%c3_101, %c0_102, %c0_103] : memref<4x1x32xf32, #tpu.memory_space<vmem>>, vector<1x1x32xf32>
    %150 = vector.shape_cast %149 : vector<1x1x32xf32> to vector<1x32xf32>
    %151 = vector.broadcast %150 : vector<1x32xf32> to vector<16x32xf32>
    %152 = arith.addf %148, %151 : vector<16x32xf32>
    %c3_104 = arith.constant 3 : index
    %c0_105 = arith.constant 0 : index
    %c0_106 = arith.constant 0 : index
    %153 = vector.load %arg6[%c3_104, %c0_105, %c0_106] : memref<4x128x32xbf16, #tpu.memory_space<vmem>>, vector<1x128x32xbf16>
    %154 = vector.shape_cast %153 : vector<1x128x32xbf16> to vector<128x32xbf16>
    %cst_107 = arith.constant dense<0.000000e+00> : vector<16x32xf32>
    %155 = tpu.matmul %2, %154, %cst_107 {dimension_numbers = #tpu.dot_dimension_numbers<[1], [0], [0], [1], [0, 0, 1, 1], [], []>} : vector<16x128xbf16>, vector<128x32xbf16>, vector<16x32xf32> -> vector<16x32xf32>
    %c3_108 = arith.constant 3 : index
    %c0_109 = arith.constant 0 : index
    %c0_110 = arith.constant 0 : index
    %156 = vector.load %arg7[%c3_108, %c0_109, %c0_110] : memref<4x1x32xf32, #tpu.memory_space<vmem>>, vector<1x1x32xf32>
    %157 = vector.shape_cast %156 : vector<1x1x32xf32> to vector<1x32xf32>
    %158 = vector.broadcast %157 : vector<1x32xf32> to vector<16x32xf32>
    %159 = arith.addf %155, %158 : vector<16x32xf32>
    %160 = arith.truncf %145 : vector<16x32xf32> to vector<16x32xbf16>
    %161 = arith.truncf %152 : vector<16x32xf32> to vector<16x32xbf16>
    %cst_111 = arith.constant dense<0.000000e+00> : vector<16x16xf32>
    %162 = tpu.matmul %160, %161, %cst_111 {dimension_numbers = #tpu.dot_dimension_numbers<[1], [1], [0], [0], [0, 0, 1, 0], [], []>} : vector<16x32xbf16>, vector<16x32xbf16>, vector<16x16xf32> -> vector<16x16xf32>
    %cst_112 = arith.constant 0.176776692 : f32
    %163 = vector.broadcast %cst_112 : f32 to vector<16x16xf32>
    %164 = arith.mulf %162, %163 : vector<16x16xf32>
    %165 = arith.addf %164, %1 : vector<16x16xf32>
    %cst_113 = arith.constant dense<0xFF800000> : vector<16xf32>
    %166 = vector.multi_reduction <maximumf>, %165, %cst_113 [1] : vector<16x16xf32> to vector<16xf32>
    %167 = vector.shape_cast %166 : vector<16xf32> to vector<16x1xf32>
    %168 = vector.broadcast %167 : vector<16x1xf32> to vector<16x16xf32>
    %169 = arith.subf %165, %168 : vector<16x16xf32>
    %170 = math.exp %169 : vector<16x16xf32>
    %cst_114 = arith.constant dense<0.000000e+00> : vector<16xf32>
    %171 = vector.multi_reduction <add>, %170, %cst_114 [1] : vector<16x16xf32> to vector<16xf32>
    %172 = vector.shape_cast %171 : vector<16xf32> to vector<16x1xf32>
    %173 = tpu.reciprocal %172 {approx = true} : vector<16x1xf32> -> vector<16x1xf32>
    %174 = vector.broadcast %173 : vector<16x1xf32> to vector<16x16xf32>
    %175 = arith.mulf %170, %174 : vector<16x16xf32>
    %176 = arith.truncf %175 : vector<16x16xf32> to vector<16x16xbf16>
    %177 = arith.truncf %159 : vector<16x32xf32> to vector<16x32xbf16>
    %cst_115 = arith.constant dense<0.000000e+00> : vector<16x32xf32>
    %178 = tpu.matmul %176, %177, %cst_115 {dimension_numbers = #tpu.dot_dimension_numbers<[1], [0], [0], [1], [0, 0, 1, 1], [], []>} : vector<16x16xbf16>, vector<16x32xbf16>, vector<16x32xf32> -> vector<16x32xf32>
    %179 = arith.truncf %178 : vector<16x32xf32> to vector<16x32xbf16>
    %c3_116 = arith.constant 3 : index
    %c0_117 = arith.constant 0 : index
    %c0_118 = arith.constant 0 : index
    %180 = vector.load %arg8[%c3_116, %c0_117, %c0_118] : memref<4x32x128xbf16, #tpu.memory_space<vmem>>, vector<1x32x128xbf16>
    %181 = vector.shape_cast %180 : vector<1x32x128xbf16> to vector<32x128xbf16>
    %cst_119 = arith.constant dense<0.000000e+00> : vector<16x128xf32>
    %182 = tpu.matmul %179, %181, %cst_119 {dimension_numbers = #tpu.dot_dimension_numbers<[1], [0], [0], [1], [0, 0, 1, 1], [], []>} : vector<16x32xbf16>, vector<32x128xbf16>, vector<16x128xf32> -> vector<16x128xf32>
    %183 = arith.addf %138, %182 : vector<16x128xf32>
    %c0_120 = arith.constant 0 : index
    %c0_121 = arith.constant 0 : index
    %184 = vector.load %arg9[%c0_120, %c0_121] : memref<1x128xf32, #tpu.memory_space<vmem>>, vector<1x128xf32>
    %185 = vector.broadcast %184 : vector<1x128xf32> to vector<16x128xf32>
    %186 = arith.addf %183, %185 : vector<16x128xf32>
    %187 = arith.addf %0, %186 : vector<16x128xf32>
    %c0_122 = arith.constant 0 : index
    %c0_123 = arith.constant 0 : index
    %188 = vector.load %arg10[%c0_122, %c0_123] : memref<1x128xf32, #tpu.memory_space<vmem>>, vector<1x128xf32>
    %c0_124 = arith.constant 0 : index
    %c0_125 = arith.constant 0 : index
    %189 = vector.load %arg11[%c0_124, %c0_125] : memref<1x128xf32, #tpu.memory_space<vmem>>, vector<1x128xf32>
    %cst_126 = arith.constant dense<0.000000e+00> : vector<16xf32>
    %190 = vector.multi_reduction <add>, %187, %cst_126 [1] : vector<16x128xf32> to vector<16xf32>
    %191 = vector.shape_cast %190 : vector<16xf32> to vector<16x1xf32>
    %cst_127 = arith.constant 1.280000e+02 : f32
    %192 = vector.broadcast %cst_127 : f32 to vector<16x1xf32>
    %193 = arith.divf %191, %192 : vector<16x1xf32>
    %194 = vector.broadcast %193 : vector<16x1xf32> to vector<16x128xf32>
    %195 = arith.subf %187, %194 : vector<16x128xf32>
    %196 = arith.mulf %195, %195 : vector<16x128xf32>
    %cst_128 = arith.constant dense<0.000000e+00> : vector<16xf32>
    %197 = vector.multi_reduction <add>, %196, %cst_128 [1] : vector<16x128xf32> to vector<16xf32>
    %198 = vector.shape_cast %197 : vector<16xf32> to vector<16x1xf32>
    %cst_129 = arith.constant 1.280000e+02 : f32
    %199 = vector.broadcast %cst_129 : f32 to vector<16x1xf32>
    %200 = arith.divf %198, %199 : vector<16x1xf32>
    %201 = vector.broadcast %193 : vector<16x1xf32> to vector<16x128xf32>
    %202 = arith.subf %187, %201 : vector<16x128xf32>
    %cst_130 = arith.constant 9.99999996E-13 : f32
    %203 = vector.broadcast %cst_130 : f32 to vector<16x1xf32>
    %204 = arith.addf %200, %203 : vector<16x1xf32>
    %205 = math.rsqrt %204 : vector<16x1xf32>
    %206 = vector.broadcast %205 : vector<16x1xf32> to vector<16x128xf32>
    %207 = arith.mulf %202, %206 : vector<16x128xf32>
    %208 = vector.broadcast %188 : vector<1x128xf32> to vector<16x128xf32>
    %209 = arith.mulf %207, %208 : vector<16x128xf32>
    %210 = vector.broadcast %189 : vector<1x128xf32> to vector<16x128xf32>
    %211 = arith.addf %209, %210 : vector<16x128xf32>
    %212 = arith.truncf %211 : vector<16x128xf32> to vector<16x128xbf16>
    %c0_131 = arith.constant 0 : index
    %c0_132 = arith.constant 0 : index
    %213 = vector.load %arg12[%c0_131, %c0_132] : memref<128x256xbf16, #tpu.memory_space<vmem>>, vector<128x256xbf16>
    %cst_133 = arith.constant dense<0.000000e+00> : vector<16x256xf32>
    %214 = tpu.matmul %212, %213, %cst_133 {dimension_numbers = #tpu.dot_dimension_numbers<[1], [0], [0], [1], [0, 0, 1, 1], [], []>} : vector<16x128xbf16>, vector<128x256xbf16>, vector<16x256xf32> -> vector<16x256xf32>
    %c0_134 = arith.constant 0 : index
    %c0_135 = arith.constant 0 : index
    %215 = vector.load %arg13[%c0_134, %c0_135] : memref<1x256xf32, #tpu.memory_space<vmem>>, vector<1x256xf32>
    %216 = vector.broadcast %215 : vector<1x256xf32> to vector<16x256xf32>
    %217 = arith.addf %214, %216 : vector<16x256xf32>
    %cst_136 = arith.constant 5.000000e-01 : f32
    %218 = vector.broadcast %cst_136 : f32 to vector<16x256xf32>
    %219 = arith.mulf %218, %217 : vector<16x256xf32>
    %cst_137 = arith.constant 4.471500e-02 : f32
    %220 = vector.broadcast %cst_137 : f32 to vector<16x256xf32>
    %221 = arith.mulf %220, %217 : vector<16x256xf32>
    %222 = arith.mulf %221, %217 : vector<16x256xf32>
    %223 = arith.mulf %222, %217 : vector<16x256xf32>
    %224 = arith.addf %217, %223 : vector<16x256xf32>
    %cst_138 = arith.constant 0.797884583 : f32
    %225 = vector.broadcast %cst_138 : f32 to vector<16x256xf32>
    %226 = arith.mulf %225, %224 : vector<16x256xf32>
    %227 = math.tanh %226 : vector<16x256xf32>
    %cst_139 = arith.constant 1.000000e+00 : f32
    %228 = vector.broadcast %cst_139 : f32 to vector<16x256xf32>
    %229 = arith.addf %228, %227 : vector<16x256xf32>
    %230 = arith.mulf %219, %229 : vector<16x256xf32>
    %231 = arith.truncf %230 : vector<16x256xf32> to vector<16x256xbf16>
    %c0_140 = arith.constant 0 : index
    %c0_141 = arith.constant 0 : index
    %232 = vector.load %arg14[%c0_140, %c0_141] : memref<256x128xbf16, #tpu.memory_space<vmem>>, vector<256x128xbf16>
    %cst_142 = arith.constant dense<0.000000e+00> : vector<16x128xf32>
    %233 = tpu.matmul %231, %232, %cst_142 {dimension_numbers = #tpu.dot_dimension_numbers<[1], [0], [0], [1], [0, 0, 1, 1], [], []>} : vector<16x256xbf16>, vector<256x128xbf16>, vector<16x128xf32> -> vector<16x128xf32>
    %c0_143 = arith.constant 0 : index
    %c0_144 = arith.constant 0 : index
    %234 = vector.load %arg15[%c0_143, %c0_144] : memref<1x128xf32, #tpu.memory_space<vmem>>, vector<1x128xf32>
    %235 = vector.broadcast %234 : vector<1x128xf32> to vector<16x128xf32>
    %236 = arith.addf %233, %235 : vector<16x128xf32>
    %237 = arith.addf %211, %236 : vector<16x128xf32>
    %c0_145 = arith.constant 0 : index
    %c0_146 = arith.constant 0 : index
    %238 = vector.load %arg16[%c0_145, %c0_146] : memref<1x128xf32, #tpu.memory_space<vmem>>, vector<1x128xf32>
    %c0_147 = arith.constant 0 : index
    %c0_148 = arith.constant 0 : index
    %239 = vector.load %arg17[%c0_147, %c0_148] : memref<1x128xf32, #tpu.memory_space<vmem>>, vector<1x128xf32>
    %cst_149 = arith.constant dense<0.000000e+00> : vector<16xf32>
    %240 = vector.multi_reduction <add>, %237, %cst_149 [1] : vector<16x128xf32> to vector<16xf32>
    %241 = vector.shape_cast %240 : vector<16xf32> to vector<16x1xf32>
    %cst_150 = arith.constant 1.280000e+02 : f32
    %242 = vector.broadcast %cst_150 : f32 to vector<16x1xf32>
    %243 = arith.divf %241, %242 : vector<16x1xf32>
    %244 = vector.broadcast %243 : vector<16x1xf32> to vector<16x128xf32>
    %245 = arith.subf %237, %244 : vector<16x128xf32>
    %246 = arith.mulf %245, %245 : vector<16x128xf32>
    %cst_151 = arith.constant dense<0.000000e+00> : vector<16xf32>
    %247 = vector.multi_reduction <add>, %246, %cst_151 [1] : vector<16x128xf32> to vector<16xf32>
    %248 = vector.shape_cast %247 : vector<16xf32> to vector<16x1xf32>
    %cst_152 = arith.constant 1.280000e+02 : f32
    %249 = vector.broadcast %cst_152 : f32 to vector<16x1xf32>
    %250 = arith.divf %248, %249 : vector<16x1xf32>
    %251 = vector.broadcast %243 : vector<16x1xf32> to vector<16x128xf32>
    %252 = arith.subf %237, %251 : vector<16x128xf32>
    %cst_153 = arith.constant 9.99999996E-13 : f32
    %253 = vector.broadcast %cst_153 : f32 to vector<16x1xf32>
    %254 = arith.addf %250, %253 : vector<16x1xf32>
    %255 = math.rsqrt %254 : vector<16x1xf32>
    %256 = vector.broadcast %255 : vector<16x1xf32> to vector<16x128xf32>
    %257 = arith.mulf %252, %256 : vector<16x128xf32>
    %258 = vector.broadcast %238 : vector<1x128xf32> to vector<16x128xf32>
    %259 = arith.mulf %257, %258 : vector<16x128xf32>
    %260 = vector.broadcast %239 : vector<1x128xf32> to vector<16x128xf32>
    %261 = arith.addf %259, %260 : vector<16x128xf32>
    %262 = arith.truncf %261 : vector<16x128xf32> to vector<16x128xbf16>
    %cst_154 = arith.constant 0.000000e+00 : f32
    %263 = vector.broadcast %cst_154 : f32 to vector<16x128xf32>
    %c0_155 = arith.constant 0 : index
    %c0_156 = arith.constant 0 : index
    %c0_157 = arith.constant 0 : index
    %264 = vector.load %arg18[%c0_155, %c0_156, %c0_157] : memref<4x128x32xbf16, #tpu.memory_space<vmem>>, vector<1x128x32xbf16>
    %265 = vector.shape_cast %264 : vector<1x128x32xbf16> to vector<128x32xbf16>
    %cst_158 = arith.constant dense<0.000000e+00> : vector<16x32xf32>
    %266 = tpu.matmul %262, %265, %cst_158 {dimension_numbers = #tpu.dot_dimension_numbers<[1], [0], [0], [1], [0, 0, 1, 1], [], []>} : vector<16x128xbf16>, vector<128x32xbf16>, vector<16x32xf32> -> vector<16x32xf32>
    %c0_159 = arith.constant 0 : index
    %c0_160 = arith.constant 0 : index
    %c0_161 = arith.constant 0 : index
    %267 = vector.load %arg19[%c0_159, %c0_160, %c0_161] : memref<4x1x32xf32, #tpu.memory_space<vmem>>, vector<1x1x32xf32>
    %268 = vector.shape_cast %267 : vector<1x1x32xf32> to vector<1x32xf32>
    %269 = vector.broadcast %268 : vector<1x32xf32> to vector<16x32xf32>
    %270 = arith.addf %266, %269 : vector<16x32xf32>
    %c0_162 = arith.constant 0 : index
    %c0_163 = arith.constant 0 : index
    %c0_164 = arith.constant 0 : index
    %271 = vector.load %arg20[%c0_162, %c0_163, %c0_164] : memref<4x128x32xbf16, #tpu.memory_space<vmem>>, vector<1x128x32xbf16>
    %272 = vector.shape_cast %271 : vector<1x128x32xbf16> to vector<128x32xbf16>
    %cst_165 = arith.constant dense<0.000000e+00> : vector<16x32xf32>
    %273 = tpu.matmul %262, %272, %cst_165 {dimension_numbers = #tpu.dot_dimension_numbers<[1], [0], [0], [1], [0, 0, 1, 1], [], []>} : vector<16x128xbf16>, vector<128x32xbf16>, vector<16x32xf32> -> vector<16x32xf32>
    %c0_166 = arith.constant 0 : index
    %c0_167 = arith.constant 0 : index
    %c0_168 = arith.constant 0 : index
    %274 = vector.load %arg21[%c0_166, %c0_167, %c0_168] : memref<4x1x32xf32, #tpu.memory_space<vmem>>, vector<1x1x32xf32>
    %275 = vector.shape_cast %274 : vector<1x1x32xf32> to vector<1x32xf32>
    %276 = vector.broadcast %275 : vector<1x32xf32> to vector<16x32xf32>
    %277 = arith.addf %273, %276 : vector<16x32xf32>
    %c0_169 = arith.constant 0 : index
    %c0_170 = arith.constant 0 : index
    %c0_171 = arith.constant 0 : index
    %278 = vector.load %arg22[%c0_169, %c0_170, %c0_171] : memref<4x128x32xbf16, #tpu.memory_space<vmem>>, vector<1x128x32xbf16>
    %279 = vector.shape_cast %278 : vector<1x128x32xbf16> to vector<128x32xbf16>
    %cst_172 = arith.constant dense<0.000000e+00> : vector<16x32xf32>
    %280 = tpu.matmul %262, %279, %cst_172 {dimension_numbers = #tpu.dot_dimension_numbers<[1], [0], [0], [1], [0, 0, 1, 1], [], []>} : vector<16x128xbf16>, vector<128x32xbf16>, vector<16x32xf32> -> vector<16x32xf32>
    %c0_173 = arith.constant 0 : index
    %c0_174 = arith.constant 0 : index
    %c0_175 = arith.constant 0 : index
    %281 = vector.load %arg23[%c0_173, %c0_174, %c0_175] : memref<4x1x32xf32, #tpu.memory_space<vmem>>, vector<1x1x32xf32>
    %282 = vector.shape_cast %281 : vector<1x1x32xf32> to vector<1x32xf32>
    %283 = vector.broadcast %282 : vector<1x32xf32> to vector<16x32xf32>
    %284 = arith.addf %280, %283 : vector<16x32xf32>
    %285 = arith.truncf %270 : vector<16x32xf32> to vector<16x32xbf16>
    %286 = arith.truncf %277 : vector<16x32xf32> to vector<16x32xbf16>
    %cst_176 = arith.constant dense<0.000000e+00> : vector<16x16xf32>
    %287 = tpu.matmul %285, %286, %cst_176 {dimension_numbers = #tpu.dot_dimension_numbers<[1], [1], [0], [0], [0, 0, 1, 0], [], []>} : vector<16x32xbf16>, vector<16x32xbf16>, vector<16x16xf32> -> vector<16x16xf32>
    %cst_177 = arith.constant 0.176776692 : f32
    %288 = vector.broadcast %cst_177 : f32 to vector<16x16xf32>
    %289 = arith.mulf %287, %288 : vector<16x16xf32>
    %290 = arith.addf %289, %1 : vector<16x16xf32>
    %cst_178 = arith.constant dense<0xFF800000> : vector<16xf32>
    %291 = vector.multi_reduction <maximumf>, %290, %cst_178 [1] : vector<16x16xf32> to vector<16xf32>
    %292 = vector.shape_cast %291 : vector<16xf32> to vector<16x1xf32>
    %293 = vector.broadcast %292 : vector<16x1xf32> to vector<16x16xf32>
    %294 = arith.subf %290, %293 : vector<16x16xf32>
    %295 = math.exp %294 : vector<16x16xf32>
    %cst_179 = arith.constant dense<0.000000e+00> : vector<16xf32>
    %296 = vector.multi_reduction <add>, %295, %cst_179 [1] : vector<16x16xf32> to vector<16xf32>
    %297 = vector.shape_cast %296 : vector<16xf32> to vector<16x1xf32>
    %298 = tpu.reciprocal %297 {approx = true} : vector<16x1xf32> -> vector<16x1xf32>
    %299 = vector.broadcast %298 : vector<16x1xf32> to vector<16x16xf32>
    %300 = arith.mulf %295, %299 : vector<16x16xf32>
    %301 = arith.truncf %300 : vector<16x16xf32> to vector<16x16xbf16>
    %302 = arith.truncf %284 : vector<16x32xf32> to vector<16x32xbf16>
    %cst_180 = arith.constant dense<0.000000e+00> : vector<16x32xf32>
    %303 = tpu.matmul %301, %302, %cst_180 {dimension_numbers = #tpu.dot_dimension_numbers<[1], [0], [0], [1], [0, 0, 1, 1], [], []>} : vector<16x16xbf16>, vector<16x32xbf16>, vector<16x32xf32> -> vector<16x32xf32>
    %304 = arith.truncf %303 : vector<16x32xf32> to vector<16x32xbf16>
    %c0_181 = arith.constant 0 : index
    %c0_182 = arith.constant 0 : index
    %c0_183 = arith.constant 0 : index
    %305 = vector.load %arg24[%c0_181, %c0_182, %c0_183] : memref<4x32x128xbf16, #tpu.memory_space<vmem>>, vector<1x32x128xbf16>
    %306 = vector.shape_cast %305 : vector<1x32x128xbf16> to vector<32x128xbf16>
    %cst_184 = arith.constant dense<0.000000e+00> : vector<16x128xf32>
    %307 = tpu.matmul %304, %306, %cst_184 {dimension_numbers = #tpu.dot_dimension_numbers<[1], [0], [0], [1], [0, 0, 1, 1], [], []>} : vector<16x32xbf16>, vector<32x128xbf16>, vector<16x128xf32> -> vector<16x128xf32>
    %308 = arith.addf %263, %307 : vector<16x128xf32>
    %c1_185 = arith.constant 1 : index
    %c0_186 = arith.constant 0 : index
    %c0_187 = arith.constant 0 : index
    %309 = vector.load %arg18[%c1_185, %c0_186, %c0_187] : memref<4x128x32xbf16, #tpu.memory_space<vmem>>, vector<1x128x32xbf16>
    %310 = vector.shape_cast %309 : vector<1x128x32xbf16> to vector<128x32xbf16>
    %cst_188 = arith.constant dense<0.000000e+00> : vector<16x32xf32>
    %311 = tpu.matmul %262, %310, %cst_188 {dimension_numbers = #tpu.dot_dimension_numbers<[1], [0], [0], [1], [0, 0, 1, 1], [], []>} : vector<16x128xbf16>, vector<128x32xbf16>, vector<16x32xf32> -> vector<16x32xf32>
    %c1_189 = arith.constant 1 : index
    %c0_190 = arith.constant 0 : index
    %c0_191 = arith.constant 0 : index
    %312 = vector.load %arg19[%c1_189, %c0_190, %c0_191] : memref<4x1x32xf32, #tpu.memory_space<vmem>>, vector<1x1x32xf32>
    %313 = vector.shape_cast %312 : vector<1x1x32xf32> to vector<1x32xf32>
    %314 = vector.broadcast %313 : vector<1x32xf32> to vector<16x32xf32>
    %315 = arith.addf %311, %314 : vector<16x32xf32>
    %c1_192 = arith.constant 1 : index
    %c0_193 = arith.constant 0 : index
    %c0_194 = arith.constant 0 : index
    %316 = vector.load %arg20[%c1_192, %c0_193, %c0_194] : memref<4x128x32xbf16, #tpu.memory_space<vmem>>, vector<1x128x32xbf16>
    %317 = vector.shape_cast %316 : vector<1x128x32xbf16> to vector<128x32xbf16>
    %cst_195 = arith.constant dense<0.000000e+00> : vector<16x32xf32>
    %318 = tpu.matmul %262, %317, %cst_195 {dimension_numbers = #tpu.dot_dimension_numbers<[1], [0], [0], [1], [0, 0, 1, 1], [], []>} : vector<16x128xbf16>, vector<128x32xbf16>, vector<16x32xf32> -> vector<16x32xf32>
    %c1_196 = arith.constant 1 : index
    %c0_197 = arith.constant 0 : index
    %c0_198 = arith.constant 0 : index
    %319 = vector.load %arg21[%c1_196, %c0_197, %c0_198] : memref<4x1x32xf32, #tpu.memory_space<vmem>>, vector<1x1x32xf32>
    %320 = vector.shape_cast %319 : vector<1x1x32xf32> to vector<1x32xf32>
    %321 = vector.broadcast %320 : vector<1x32xf32> to vector<16x32xf32>
    %322 = arith.addf %318, %321 : vector<16x32xf32>
    %c1_199 = arith.constant 1 : index
    %c0_200 = arith.constant 0 : index
    %c0_201 = arith.constant 0 : index
    %323 = vector.load %arg22[%c1_199, %c0_200, %c0_201] : memref<4x128x32xbf16, #tpu.memory_space<vmem>>, vector<1x128x32xbf16>
    %324 = vector.shape_cast %323 : vector<1x128x32xbf16> to vector<128x32xbf16>
    %cst_202 = arith.constant dense<0.000000e+00> : vector<16x32xf32>
    %325 = tpu.matmul %262, %324, %cst_202 {dimension_numbers = #tpu.dot_dimension_numbers<[1], [0], [0], [1], [0, 0, 1, 1], [], []>} : vector<16x128xbf16>, vector<128x32xbf16>, vector<16x32xf32> -> vector<16x32xf32>
    %c1_203 = arith.constant 1 : index
    %c0_204 = arith.constant 0 : index
    %c0_205 = arith.constant 0 : index
    %326 = vector.load %arg23[%c1_203, %c0_204, %c0_205] : memref<4x1x32xf32, #tpu.memory_space<vmem>>, vector<1x1x32xf32>
    %327 = vector.shape_cast %326 : vector<1x1x32xf32> to vector<1x32xf32>
    %328 = vector.broadcast %327 : vector<1x32xf32> to vector<16x32xf32>
    %329 = arith.addf %325, %328 : vector<16x32xf32>
    %330 = arith.truncf %315 : vector<16x32xf32> to vector<16x32xbf16>
    %331 = arith.truncf %322 : vector<16x32xf32> to vector<16x32xbf16>
    %cst_206 = arith.constant dense<0.000000e+00> : vector<16x16xf32>
    %332 = tpu.matmul %330, %331, %cst_206 {dimension_numbers = #tpu.dot_dimension_numbers<[1], [1], [0], [0], [0, 0, 1, 0], [], []>} : vector<16x32xbf16>, vector<16x32xbf16>, vector<16x16xf32> -> vector<16x16xf32>
    %cst_207 = arith.constant 0.176776692 : f32
    %333 = vector.broadcast %cst_207 : f32 to vector<16x16xf32>
    %334 = arith.mulf %332, %333 : vector<16x16xf32>
    %335 = arith.addf %334, %1 : vector<16x16xf32>
    %cst_208 = arith.constant dense<0xFF800000> : vector<16xf32>
    %336 = vector.multi_reduction <maximumf>, %335, %cst_208 [1] : vector<16x16xf32> to vector<16xf32>
    %337 = vector.shape_cast %336 : vector<16xf32> to vector<16x1xf32>
    %338 = vector.broadcast %337 : vector<16x1xf32> to vector<16x16xf32>
    %339 = arith.subf %335, %338 : vector<16x16xf32>
    %340 = math.exp %339 : vector<16x16xf32>
    %cst_209 = arith.constant dense<0.000000e+00> : vector<16xf32>
    %341 = vector.multi_reduction <add>, %340, %cst_209 [1] : vector<16x16xf32> to vector<16xf32>
    %342 = vector.shape_cast %341 : vector<16xf32> to vector<16x1xf32>
    %343 = tpu.reciprocal %342 {approx = true} : vector<16x1xf32> -> vector<16x1xf32>
    %344 = vector.broadcast %343 : vector<16x1xf32> to vector<16x16xf32>
    %345 = arith.mulf %340, %344 : vector<16x16xf32>
    %346 = arith.truncf %345 : vector<16x16xf32> to vector<16x16xbf16>
    %347 = arith.truncf %329 : vector<16x32xf32> to vector<16x32xbf16>
    %cst_210 = arith.constant dense<0.000000e+00> : vector<16x32xf32>
    %348 = tpu.matmul %346, %347, %cst_210 {dimension_numbers = #tpu.dot_dimension_numbers<[1], [0], [0], [1], [0, 0, 1, 1], [], []>} : vector<16x16xbf16>, vector<16x32xbf16>, vector<16x32xf32> -> vector<16x32xf32>
    %349 = arith.truncf %348 : vector<16x32xf32> to vector<16x32xbf16>
    %c1_211 = arith.constant 1 : index
    %c0_212 = arith.constant 0 : index
    %c0_213 = arith.constant 0 : index
    %350 = vector.load %arg24[%c1_211, %c0_212, %c0_213] : memref<4x32x128xbf16, #tpu.memory_space<vmem>>, vector<1x32x128xbf16>
    %351 = vector.shape_cast %350 : vector<1x32x128xbf16> to vector<32x128xbf16>
    %cst_214 = arith.constant dense<0.000000e+00> : vector<16x128xf32>
    %352 = tpu.matmul %349, %351, %cst_214 {dimension_numbers = #tpu.dot_dimension_numbers<[1], [0], [0], [1], [0, 0, 1, 1], [], []>} : vector<16x32xbf16>, vector<32x128xbf16>, vector<16x128xf32> -> vector<16x128xf32>
    %353 = arith.addf %308, %352 : vector<16x128xf32>
    %c2_215 = arith.constant 2 : index
    %c0_216 = arith.constant 0 : index
    %c0_217 = arith.constant 0 : index
    %354 = vector.load %arg18[%c2_215, %c0_216, %c0_217] : memref<4x128x32xbf16, #tpu.memory_space<vmem>>, vector<1x128x32xbf16>
    %355 = vector.shape_cast %354 : vector<1x128x32xbf16> to vector<128x32xbf16>
    %cst_218 = arith.constant dense<0.000000e+00> : vector<16x32xf32>
    %356 = tpu.matmul %262, %355, %cst_218 {dimension_numbers = #tpu.dot_dimension_numbers<[1], [0], [0], [1], [0, 0, 1, 1], [], []>} : vector<16x128xbf16>, vector<128x32xbf16>, vector<16x32xf32> -> vector<16x32xf32>
    %c2_219 = arith.constant 2 : index
    %c0_220 = arith.constant 0 : index
    %c0_221 = arith.constant 0 : index
    %357 = vector.load %arg19[%c2_219, %c0_220, %c0_221] : memref<4x1x32xf32, #tpu.memory_space<vmem>>, vector<1x1x32xf32>
    %358 = vector.shape_cast %357 : vector<1x1x32xf32> to vector<1x32xf32>
    %359 = vector.broadcast %358 : vector<1x32xf32> to vector<16x32xf32>
    %360 = arith.addf %356, %359 : vector<16x32xf32>
    %c2_222 = arith.constant 2 : index
    %c0_223 = arith.constant 0 : index
    %c0_224 = arith.constant 0 : index
    %361 = vector.load %arg20[%c2_222, %c0_223, %c0_224] : memref<4x128x32xbf16, #tpu.memory_space<vmem>>, vector<1x128x32xbf16>
    %362 = vector.shape_cast %361 : vector<1x128x32xbf16> to vector<128x32xbf16>
    %cst_225 = arith.constant dense<0.000000e+00> : vector<16x32xf32>
    %363 = tpu.matmul %262, %362, %cst_225 {dimension_numbers = #tpu.dot_dimension_numbers<[1], [0], [0], [1], [0, 0, 1, 1], [], []>} : vector<16x128xbf16>, vector<128x32xbf16>, vector<16x32xf32> -> vector<16x32xf32>
    %c2_226 = arith.constant 2 : index
    %c0_227 = arith.constant 0 : index
    %c0_228 = arith.constant 0 : index
    %364 = vector.load %arg21[%c2_226, %c0_227, %c0_228] : memref<4x1x32xf32, #tpu.memory_space<vmem>>, vector<1x1x32xf32>
    %365 = vector.shape_cast %364 : vector<1x1x32xf32> to vector<1x32xf32>
    %366 = vector.broadcast %365 : vector<1x32xf32> to vector<16x32xf32>
    %367 = arith.addf %363, %366 : vector<16x32xf32>
    %c2_229 = arith.constant 2 : index
    %c0_230 = arith.constant 0 : index
    %c0_231 = arith.constant 0 : index
    %368 = vector.load %arg22[%c2_229, %c0_230, %c0_231] : memref<4x128x32xbf16, #tpu.memory_space<vmem>>, vector<1x128x32xbf16>
    %369 = vector.shape_cast %368 : vector<1x128x32xbf16> to vector<128x32xbf16>
    %cst_232 = arith.constant dense<0.000000e+00> : vector<16x32xf32>
    %370 = tpu.matmul %262, %369, %cst_232 {dimension_numbers = #tpu.dot_dimension_numbers<[1], [0], [0], [1], [0, 0, 1, 1], [], []>} : vector<16x128xbf16>, vector<128x32xbf16>, vector<16x32xf32> -> vector<16x32xf32>
    %c2_233 = arith.constant 2 : index
    %c0_234 = arith.constant 0 : index
    %c0_235 = arith.constant 0 : index
    %371 = vector.load %arg23[%c2_233, %c0_234, %c0_235] : memref<4x1x32xf32, #tpu.memory_space<vmem>>, vector<1x1x32xf32>
    %372 = vector.shape_cast %371 : vector<1x1x32xf32> to vector<1x32xf32>
    %373 = vector.broadcast %372 : vector<1x32xf32> to vector<16x32xf32>
    %374 = arith.addf %370, %373 : vector<16x32xf32>
    %375 = arith.truncf %360 : vector<16x32xf32> to vector<16x32xbf16>
    %376 = arith.truncf %367 : vector<16x32xf32> to vector<16x32xbf16>
    %cst_236 = arith.constant dense<0.000000e+00> : vector<16x16xf32>
    %377 = tpu.matmul %375, %376, %cst_236 {dimension_numbers = #tpu.dot_dimension_numbers<[1], [1], [0], [0], [0, 0, 1, 0], [], []>} : vector<16x32xbf16>, vector<16x32xbf16>, vector<16x16xf32> -> vector<16x16xf32>
    %cst_237 = arith.constant 0.176776692 : f32
    %378 = vector.broadcast %cst_237 : f32 to vector<16x16xf32>
    %379 = arith.mulf %377, %378 : vector<16x16xf32>
    %380 = arith.addf %379, %1 : vector<16x16xf32>
    %cst_238 = arith.constant dense<0xFF800000> : vector<16xf32>
    %381 = vector.multi_reduction <maximumf>, %380, %cst_238 [1] : vector<16x16xf32> to vector<16xf32>
    %382 = vector.shape_cast %381 : vector<16xf32> to vector<16x1xf32>
    %383 = vector.broadcast %382 : vector<16x1xf32> to vector<16x16xf32>
    %384 = arith.subf %380, %383 : vector<16x16xf32>
    %385 = math.exp %384 : vector<16x16xf32>
    %cst_239 = arith.constant dense<0.000000e+00> : vector<16xf32>
    %386 = vector.multi_reduction <add>, %385, %cst_239 [1] : vector<16x16xf32> to vector<16xf32>
    %387 = vector.shape_cast %386 : vector<16xf32> to vector<16x1xf32>
    %388 = tpu.reciprocal %387 {approx = true} : vector<16x1xf32> -> vector<16x1xf32>
    %389 = vector.broadcast %388 : vector<16x1xf32> to vector<16x16xf32>
    %390 = arith.mulf %385, %389 : vector<16x16xf32>
    %391 = arith.truncf %390 : vector<16x16xf32> to vector<16x16xbf16>
    %392 = arith.truncf %374 : vector<16x32xf32> to vector<16x32xbf16>
    %cst_240 = arith.constant dense<0.000000e+00> : vector<16x32xf32>
    %393 = tpu.matmul %391, %392, %cst_240 {dimension_numbers = #tpu.dot_dimension_numbers<[1], [0], [0], [1], [0, 0, 1, 1], [], []>} : vector<16x16xbf16>, vector<16x32xbf16>, vector<16x32xf32> -> vector<16x32xf32>
    %394 = arith.truncf %393 : vector<16x32xf32> to vector<16x32xbf16>
    %c2_241 = arith.constant 2 : index
    %c0_242 = arith.constant 0 : index
    %c0_243 = arith.constant 0 : index
    %395 = vector.load %arg24[%c2_241, %c0_242, %c0_243] : memref<4x32x128xbf16, #tpu.memory_space<vmem>>, vector<1x32x128xbf16>
    %396 = vector.shape_cast %395 : vector<1x32x128xbf16> to vector<32x128xbf16>
    %cst_244 = arith.constant dense<0.000000e+00> : vector<16x128xf32>
    %397 = tpu.matmul %394, %396, %cst_244 {dimension_numbers = #tpu.dot_dimension_numbers<[1], [0], [0], [1], [0, 0, 1, 1], [], []>} : vector<16x32xbf16>, vector<32x128xbf16>, vector<16x128xf32> -> vector<16x128xf32>
    %398 = arith.addf %353, %397 : vector<16x128xf32>
    %c3_245 = arith.constant 3 : index
    %c0_246 = arith.constant 0 : index
    %c0_247 = arith.constant 0 : index
    %399 = vector.load %arg18[%c3_245, %c0_246, %c0_247] : memref<4x128x32xbf16, #tpu.memory_space<vmem>>, vector<1x128x32xbf16>
    %400 = vector.shape_cast %399 : vector<1x128x32xbf16> to vector<128x32xbf16>
    %cst_248 = arith.constant dense<0.000000e+00> : vector<16x32xf32>
    %401 = tpu.matmul %262, %400, %cst_248 {dimension_numbers = #tpu.dot_dimension_numbers<[1], [0], [0], [1], [0, 0, 1, 1], [], []>} : vector<16x128xbf16>, vector<128x32xbf16>, vector<16x32xf32> -> vector<16x32xf32>
    %c3_249 = arith.constant 3 : index
    %c0_250 = arith.constant 0 : index
    %c0_251 = arith.constant 0 : index
    %402 = vector.load %arg19[%c3_249, %c0_250, %c0_251] : memref<4x1x32xf32, #tpu.memory_space<vmem>>, vector<1x1x32xf32>
    %403 = vector.shape_cast %402 : vector<1x1x32xf32> to vector<1x32xf32>
    %404 = vector.broadcast %403 : vector<1x32xf32> to vector<16x32xf32>
    %405 = arith.addf %401, %404 : vector<16x32xf32>
    %c3_252 = arith.constant 3 : index
    %c0_253 = arith.constant 0 : index
    %c0_254 = arith.constant 0 : index
    %406 = vector.load %arg20[%c3_252, %c0_253, %c0_254] : memref<4x128x32xbf16, #tpu.memory_space<vmem>>, vector<1x128x32xbf16>
    %407 = vector.shape_cast %406 : vector<1x128x32xbf16> to vector<128x32xbf16>
    %cst_255 = arith.constant dense<0.000000e+00> : vector<16x32xf32>
    %408 = tpu.matmul %262, %407, %cst_255 {dimension_numbers = #tpu.dot_dimension_numbers<[1], [0], [0], [1], [0, 0, 1, 1], [], []>} : vector<16x128xbf16>, vector<128x32xbf16>, vector<16x32xf32> -> vector<16x32xf32>
    %c3_256 = arith.constant 3 : index
    %c0_257 = arith.constant 0 : index
    %c0_258 = arith.constant 0 : index
    %409 = vector.load %arg21[%c3_256, %c0_257, %c0_258] : memref<4x1x32xf32, #tpu.memory_space<vmem>>, vector<1x1x32xf32>
    %410 = vector.shape_cast %409 : vector<1x1x32xf32> to vector<1x32xf32>
    %411 = vector.broadcast %410 : vector<1x32xf32> to vector<16x32xf32>
    %412 = arith.addf %408, %411 : vector<16x32xf32>
    %c3_259 = arith.constant 3 : index
    %c0_260 = arith.constant 0 : index
    %c0_261 = arith.constant 0 : index
    %413 = vector.load %arg22[%c3_259, %c0_260, %c0_261] : memref<4x128x32xbf16, #tpu.memory_space<vmem>>, vector<1x128x32xbf16>
    %414 = vector.shape_cast %413 : vector<1x128x32xbf16> to vector<128x32xbf16>
    %cst_262 = arith.constant dense<0.000000e+00> : vector<16x32xf32>
    %415 = tpu.matmul %262, %414, %cst_262 {dimension_numbers = #tpu.dot_dimension_numbers<[1], [0], [0], [1], [0, 0, 1, 1], [], []>} : vector<16x128xbf16>, vector<128x32xbf16>, vector<16x32xf32> -> vector<16x32xf32>
    %c3_263 = arith.constant 3 : index
    %c0_264 = arith.constant 0 : index
    %c0_265 = arith.constant 0 : index
    %416 = vector.load %arg23[%c3_263, %c0_264, %c0_265] : memref<4x1x32xf32, #tpu.memory_space<vmem>>, vector<1x1x32xf32>
    %417 = vector.shape_cast %416 : vector<1x1x32xf32> to vector<1x32xf32>
    %418 = vector.broadcast %417 : vector<1x32xf32> to vector<16x32xf32>
    %419 = arith.addf %415, %418 : vector<16x32xf32>
    %420 = arith.truncf %405 : vector<16x32xf32> to vector<16x32xbf16>
    %421 = arith.truncf %412 : vector<16x32xf32> to vector<16x32xbf16>
    %cst_266 = arith.constant dense<0.000000e+00> : vector<16x16xf32>
    %422 = tpu.matmul %420, %421, %cst_266 {dimension_numbers = #tpu.dot_dimension_numbers<[1], [1], [0], [0], [0, 0, 1, 0], [], []>} : vector<16x32xbf16>, vector<16x32xbf16>, vector<16x16xf32> -> vector<16x16xf32>
    %cst_267 = arith.constant 0.176776692 : f32
    %423 = vector.broadcast %cst_267 : f32 to vector<16x16xf32>
    %424 = arith.mulf %422, %423 : vector<16x16xf32>
    %425 = arith.addf %424, %1 : vector<16x16xf32>
    %cst_268 = arith.constant dense<0xFF800000> : vector<16xf32>
    %426 = vector.multi_reduction <maximumf>, %425, %cst_268 [1] : vector<16x16xf32> to vector<16xf32>
    %427 = vector.shape_cast %426 : vector<16xf32> to vector<16x1xf32>
    %428 = vector.broadcast %427 : vector<16x1xf32> to vector<16x16xf32>
    %429 = arith.subf %425, %428 : vector<16x16xf32>
    %430 = math.exp %429 : vector<16x16xf32>
    %cst_269 = arith.constant dense<0.000000e+00> : vector<16xf32>
    %431 = vector.multi_reduction <add>, %430, %cst_269 [1] : vector<16x16xf32> to vector<16xf32>
    %432 = vector.shape_cast %431 : vector<16xf32> to vector<16x1xf32>
    %433 = tpu.reciprocal %432 {approx = true} : vector<16x1xf32> -> vector<16x1xf32>
    %434 = vector.broadcast %433 : vector<16x1xf32> to vector<16x16xf32>
    %435 = arith.mulf %430, %434 : vector<16x16xf32>
    %436 = arith.truncf %435 : vector<16x16xf32> to vector<16x16xbf16>
    %437 = arith.truncf %419 : vector<16x32xf32> to vector<16x32xbf16>
    %cst_270 = arith.constant dense<0.000000e+00> : vector<16x32xf32>
    %438 = tpu.matmul %436, %437, %cst_270 {dimension_numbers = #tpu.dot_dimension_numbers<[1], [0], [0], [1], [0, 0, 1, 1], [], []>} : vector<16x16xbf16>, vector<16x32xbf16>, vector<16x32xf32> -> vector<16x32xf32>
    %439 = arith.truncf %438 : vector<16x32xf32> to vector<16x32xbf16>
    %c3_271 = arith.constant 3 : index
    %c0_272 = arith.constant 0 : index
    %c0_273 = arith.constant 0 : index
    %440 = vector.load %arg24[%c3_271, %c0_272, %c0_273] : memref<4x32x128xbf16, #tpu.memory_space<vmem>>, vector<1x32x128xbf16>
    %441 = vector.shape_cast %440 : vector<1x32x128xbf16> to vector<32x128xbf16>
    %cst_274 = arith.constant dense<0.000000e+00> : vector<16x128xf32>
    %442 = tpu.matmul %439, %441, %cst_274 {dimension_numbers = #tpu.dot_dimension_numbers<[1], [0], [0], [1], [0, 0, 1, 1], [], []>} : vector<16x32xbf16>, vector<32x128xbf16>, vector<16x128xf32> -> vector<16x128xf32>
    %443 = arith.addf %398, %442 : vector<16x128xf32>
    %c0_275 = arith.constant 0 : index
    %c0_276 = arith.constant 0 : index
    %444 = vector.load %arg25[%c0_275, %c0_276] : memref<1x128xf32, #tpu.memory_space<vmem>>, vector<1x128xf32>
    %445 = vector.broadcast %444 : vector<1x128xf32> to vector<16x128xf32>
    %446 = arith.addf %443, %445 : vector<16x128xf32>
    %447 = arith.addf %261, %446 : vector<16x128xf32>
    %c0_277 = arith.constant 0 : index
    %c0_278 = arith.constant 0 : index
    %448 = vector.load %arg26[%c0_277, %c0_278] : memref<1x128xf32, #tpu.memory_space<vmem>>, vector<1x128xf32>
    %c0_279 = arith.constant 0 : index
    %c0_280 = arith.constant 0 : index
    %449 = vector.load %arg27[%c0_279, %c0_280] : memref<1x128xf32, #tpu.memory_space<vmem>>, vector<1x128xf32>
    %cst_281 = arith.constant dense<0.000000e+00> : vector<16xf32>
    %450 = vector.multi_reduction <add>, %447, %cst_281 [1] : vector<16x128xf32> to vector<16xf32>
    %451 = vector.shape_cast %450 : vector<16xf32> to vector<16x1xf32>
    %cst_282 = arith.constant 1.280000e+02 : f32
    %452 = vector.broadcast %cst_282 : f32 to vector<16x1xf32>
    %453 = arith.divf %451, %452 : vector<16x1xf32>
    %454 = vector.broadcast %453 : vector<16x1xf32> to vector<16x128xf32>
    %455 = arith.subf %447, %454 : vector<16x128xf32>
    %456 = arith.mulf %455, %455 : vector<16x128xf32>
    %cst_283 = arith.constant dense<0.000000e+00> : vector<16xf32>
    %457 = vector.multi_reduction <add>, %456, %cst_283 [1] : vector<16x128xf32> to vector<16xf32>
    %458 = vector.shape_cast %457 : vector<16xf32> to vector<16x1xf32>
    %cst_284 = arith.constant 1.280000e+02 : f32
    %459 = vector.broadcast %cst_284 : f32 to vector<16x1xf32>
    %460 = arith.divf %458, %459 : vector<16x1xf32>
    %461 = vector.broadcast %453 : vector<16x1xf32> to vector<16x128xf32>
    %462 = arith.subf %447, %461 : vector<16x128xf32>
    %cst_285 = arith.constant 9.99999996E-13 : f32
    %463 = vector.broadcast %cst_285 : f32 to vector<16x1xf32>
    %464 = arith.addf %460, %463 : vector<16x1xf32>
    %465 = math.rsqrt %464 : vector<16x1xf32>
    %466 = vector.broadcast %465 : vector<16x1xf32> to vector<16x128xf32>
    %467 = arith.mulf %462, %466 : vector<16x128xf32>
    %468 = vector.broadcast %448 : vector<1x128xf32> to vector<16x128xf32>
    %469 = arith.mulf %467, %468 : vector<16x128xf32>
    %470 = vector.broadcast %449 : vector<1x128xf32> to vector<16x128xf32>
    %471 = arith.addf %469, %470 : vector<16x128xf32>
    %472 = arith.truncf %471 : vector<16x128xf32> to vector<16x128xbf16>
    %c0_286 = arith.constant 0 : index
    %c0_287 = arith.constant 0 : index
    %473 = vector.load %arg28[%c0_286, %c0_287] : memref<128x256xbf16, #tpu.memory_space<vmem>>, vector<128x256xbf16>
    %cst_288 = arith.constant dense<0.000000e+00> : vector<16x256xf32>
    %474 = tpu.matmul %472, %473, %cst_288 {dimension_numbers = #tpu.dot_dimension_numbers<[1], [0], [0], [1], [0, 0, 1, 1], [], []>} : vector<16x128xbf16>, vector<128x256xbf16>, vector<16x256xf32> -> vector<16x256xf32>
    %c0_289 = arith.constant 0 : index
    %c0_290 = arith.constant 0 : index
    %475 = vector.load %arg29[%c0_289, %c0_290] : memref<1x256xf32, #tpu.memory_space<vmem>>, vector<1x256xf32>
    %476 = vector.broadcast %475 : vector<1x256xf32> to vector<16x256xf32>
    %477 = arith.addf %474, %476 : vector<16x256xf32>
    %cst_291 = arith.constant 5.000000e-01 : f32
    %478 = vector.broadcast %cst_291 : f32 to vector<16x256xf32>
    %479 = arith.mulf %478, %477 : vector<16x256xf32>
    %cst_292 = arith.constant 4.471500e-02 : f32
    %480 = vector.broadcast %cst_292 : f32 to vector<16x256xf32>
    %481 = arith.mulf %480, %477 : vector<16x256xf32>
    %482 = arith.mulf %481, %477 : vector<16x256xf32>
    %483 = arith.mulf %482, %477 : vector<16x256xf32>
    %484 = arith.addf %477, %483 : vector<16x256xf32>
    %cst_293 = arith.constant 0.797884583 : f32
    %485 = vector.broadcast %cst_293 : f32 to vector<16x256xf32>
    %486 = arith.mulf %485, %484 : vector<16x256xf32>
    %487 = math.tanh %486 : vector<16x256xf32>
    %cst_294 = arith.constant 1.000000e+00 : f32
    %488 = vector.broadcast %cst_294 : f32 to vector<16x256xf32>
    %489 = arith.addf %488, %487 : vector<16x256xf32>
    %490 = arith.mulf %479, %489 : vector<16x256xf32>
    %491 = arith.truncf %490 : vector<16x256xf32> to vector<16x256xbf16>
    %c0_295 = arith.constant 0 : index
    %c0_296 = arith.constant 0 : index
    %492 = vector.load %arg30[%c0_295, %c0_296] : memref<256x128xbf16, #tpu.memory_space<vmem>>, vector<256x128xbf16>
    %cst_297 = arith.constant dense<0.000000e+00> : vector<16x128xf32>
    %493 = tpu.matmul %491, %492, %cst_297 {dimension_numbers = #tpu.dot_dimension_numbers<[1], [0], [0], [1], [0, 0, 1, 1], [], []>} : vector<16x256xbf16>, vector<256x128xbf16>, vector<16x128xf32> -> vector<16x128xf32>
    %c0_298 = arith.constant 0 : index
    %c0_299 = arith.constant 0 : index
    %494 = vector.load %arg31[%c0_298, %c0_299] : memref<1x128xf32, #tpu.memory_space<vmem>>, vector<1x128xf32>
    %495 = vector.broadcast %494 : vector<1x128xf32> to vector<16x128xf32>
    %496 = arith.addf %493, %495 : vector<16x128xf32>
    %497 = arith.addf %471, %496 : vector<16x128xf32>
    %c0_300 = arith.constant 0 : index
    %c0_301 = arith.constant 0 : index
    %498 = vector.load %arg32[%c0_300, %c0_301] : memref<1x128xf32, #tpu.memory_space<vmem>>, vector<1x128xf32>
    %c0_302 = arith.constant 0 : index
    %c0_303 = arith.constant 0 : index
    %499 = vector.load %arg33[%c0_302, %c0_303] : memref<1x128xf32, #tpu.memory_space<vmem>>, vector<1x128xf32>
    %cst_304 = arith.constant dense<0.000000e+00> : vector<16xf32>
    %500 = vector.multi_reduction <add>, %497, %cst_304 [1] : vector<16x128xf32> to vector<16xf32>
    %501 = vector.shape_cast %500 : vector<16xf32> to vector<16x1xf32>
    %cst_305 = arith.constant 1.280000e+02 : f32
    %502 = vector.broadcast %cst_305 : f32 to vector<16x1xf32>
    %503 = arith.divf %501, %502 : vector<16x1xf32>
    %504 = vector.broadcast %503 : vector<16x1xf32> to vector<16x128xf32>
    %505 = arith.subf %497, %504 : vector<16x128xf32>
    %506 = arith.mulf %505, %505 : vector<16x128xf32>
    %cst_306 = arith.constant dense<0.000000e+00> : vector<16xf32>
    %507 = vector.multi_reduction <add>, %506, %cst_306 [1] : vector<16x128xf32> to vector<16xf32>
    %508 = vector.shape_cast %507 : vector<16xf32> to vector<16x1xf32>
    %cst_307 = arith.constant 1.280000e+02 : f32
    %509 = vector.broadcast %cst_307 : f32 to vector<16x1xf32>
    %510 = arith.divf %508, %509 : vector<16x1xf32>
    %511 = vector.broadcast %503 : vector<16x1xf32> to vector<16x128xf32>
    %512 = arith.subf %497, %511 : vector<16x128xf32>
    %cst_308 = arith.constant 9.99999996E-13 : f32
    %513 = vector.broadcast %cst_308 : f32 to vector<16x1xf32>
    %514 = arith.addf %510, %513 : vector<16x1xf32>
    %515 = math.rsqrt %514 : vector<16x1xf32>
    %516 = vector.broadcast %515 : vector<16x1xf32> to vector<16x128xf32>
    %517 = arith.mulf %512, %516 : vector<16x128xf32>
    %518 = vector.broadcast %498 : vector<1x128xf32> to vector<16x128xf32>
    %519 = arith.mulf %517, %518 : vector<16x128xf32>
    %520 = vector.broadcast %499 : vector<1x128xf32> to vector<16x128xf32>
    %521 = arith.addf %519, %520 : vector<16x128xf32>
    %522 = arith.truncf %521 : vector<16x128xf32> to vector<16x128xbf16>
    %c0_309 = arith.constant 0 : index
    %c0_310 = arith.constant 0 : index
    %523 = vector.load %arg34[%c0_309, %c0_310] : memref<128x128xbf16, #tpu.memory_space<vmem>>, vector<128x128xbf16>
    %cst_311 = arith.constant dense<0.000000e+00> : vector<16x128xf32>
    %524 = tpu.matmul %522, %523, %cst_311 {dimension_numbers = #tpu.dot_dimension_numbers<[1], [0], [0], [1], [0, 0, 1, 1], [], []>} : vector<16x128xbf16>, vector<128x128xbf16>, vector<16x128xf32> -> vector<16x128xf32>
    %c0_312 = arith.constant 0 : index
    %c0_313 = arith.constant 0 : index
    %525 = vector.load %arg35[%c0_312, %c0_313] : memref<1x128xf32, #tpu.memory_space<vmem>>, vector<1x128xf32>
    %526 = vector.broadcast %525 : vector<1x128xf32> to vector<16x128xf32>
    %527 = arith.addf %524, %526 : vector<16x128xf32>
    %c0_314 = arith.constant 0 : index
    %c0_315 = arith.constant 0 : index
    %528 = vector.load %arg36[%c0_314, %c0_315] : memref<16x128xf32, #tpu.memory_space<vmem>>, vector<16x128xf32>
    tpu.vector_store %arg36[%c0_314, %c0_315], %527 {strides = array<i32>} : memref<16x128xf32, #tpu.memory_space<vmem>>, vector<16x128xf32>,
    return
  }
}

</mosaic_0001>

<bundles_post_ra>
// kernel: tpu_custom_call.1
= control target key start
LH: loop header
LB: loop body
LE: loop exit
PB: predicated region body
PF: predicated region fallthrough
CT: control target
= control target key end

     0   :  { %s7558_s6 = smov 1   ;;  %s7559_s10 = smov 2   ;;  %s8644_s0 = inlined_call_operand.smem [shape: u32[37], index: -1, kind: input, shape index: {}] }
   0x1   :  { %s7608_s5 = sld [smem:[%s8644_s0]]   ;;  %s7560_s14 = smov 3  }
   0x2   :  { %s7613_s9 = sld [smem:[%s8644_s0 + %s7558_s6]]   ;;  %s7561_s18 = smov 4  }
   0x3   :  { %s7618_s13 = sld [smem:[%s8644_s0 + %s7559_s10]]   ;;  %s7562_s22 = smov 5  }
   0x4   :  { %s7623_s17 = sld [smem:[%s8644_s0 + %s7560_s14]]   ;;  %s7563_s26 = smov 6  }
   0x5   :  { %s7628_s21 = sld [smem:[%s8644_s0 + %s7561_s18]]   ;;  %s7564_s30 = smov 7  }
   0x6   :  { %s7633_s25 = sld [smem:[%s8644_s0 + %s7562_s22]]   ;;  %s7565_s4 = smov 8  }
   0x7   :  { %s7638_s29 = sld [smem:[%s8644_s0 + %s7563_s26]]   ;;  %s7566_s10 = smov 9  }
   0x8   :  { %s7643_s3 = sld [smem:[%s8644_s0 + %s7564_s30]]   ;;  %s7567_s15 = smov 10  }
   0x9   :  { %s7648_s8 = sld [smem:[%s8644_s0 + %s7565_s4]]   ;;  %s7568_s20 = smov 11  }
   0xa   :  { %s7653_s14 = sld [smem:[%s8644_s0 + %s7566_s10]]   ;;  %s7569_s26 = smov 12  }
   0xb   :  { %s7658_s19 = sld [smem:[%s8644_s0 + %s7567_s15]]   ;;  %s7570_s1 = smov 13  }
   0xc   :  { %s7663_s24 = sld [smem:[%s8644_s0 + %s7568_s20]]   ;;  %s7571_s7 = smov 14  }
   0xd   :  { %s7668_s30 = sld [smem:[%s8644_s0 + %s7569_s26]]   ;;  %s7572_s15 = smov 15  }
   0xe   :  { %s7673_s6 = sld [smem:[%s8644_s0 + %s7570_s1]]   ;;  %s7573_s22 = smov 16  }
   0xf   :  { %s7678_s12 = sld [smem:[%s8644_s0 + %s7571_s7]]   ;;  %s7574_s28 = smov 17  }
  0x10   :  { %s7683_s20 = sld [smem:[%s8644_s0 + %s7572_s15]]   ;;  %s7575_s7 = smov 18  }
  0x11   :  { %s7688_s27 = sld [smem:[%s8644_s0 + %s7573_s22]]   ;;  %s7576_s15 = smov 19  }
  0x12   :  { %s7693_s4 = sld [smem:[%s8644_s0 + %s7574_s28]]   ;;  %s7577_s22 = smov 20  }
  0x13   :  { %s7578_s28 = smov 21  }
  0x14   :  { %8654 = sst [smem:[#allocation5_spill]] %s7673_s6 }
  0x15   :  { %s7698_s6 = sld [smem:[%s8644_s0 + %s7575_s7]]   ;;  %s7579_s7 = smov 22  }
  0x16   :  { %8655 = sst [smem:[#allocation6_spill]] %s7683_s20 }
  0x17   :  { %8656 = sst [smem:[#allocation7_spill]] %s7688_s27 }
  0x18   :  { %8657 = sst [smem:[#allocation8_spill]] %s7693_s4 }
  0x19   :  { %s7703_s20 = sld [smem:[%s8644_s0 + %s7576_s15]]   ;;  %s7580_s15 = smov 23  }
  0x1a   :  { %s7708_s27 = sld [smem:[%s8644_s0 + %s7577_s22]]   ;;  %s7581_s22 = smov 24  }
  0x1b   :  { %8658 = sst [smem:[#allocation9_spill]] %s7698_s6 }
  0x1c   :  { %s7713_s4 = sld [smem:[%s8644_s0 + %s7578_s28]]   ;;  %s7582_s28 = smov 25  }
  0x1d   :  { %s7718_s6 = sld [smem:[%s8644_s0 + %s7579_s7]]   ;;  %s7583_s7 = smov 26  }
  0x1f   :  { %8659 = sst [smem:[#allocation10_spill]] %s7703_s20 }
  0x20   :  { %8660 = sst [smem:[#allocation11_spill]] %s7708_s27 }
  0x21   :  { %s7723_s20 = sld [smem:[%s8644_s0 + %s7580_s15]]   ;;  %s7584_s15 = smov 27  }
  0x22   :  { %8661 = sst [smem:[#allocation12_spill]] %s7713_s4 }
  0x23   :  { %8662 = sst [smem:[#allocation13_spill]] %s7718_s6 }
  0x24   :  { %s7728_s27 = sld [smem:[%s8644_s0 + %s7581_s22]]   ;;  %s7585_s22 = smov 28  }
  0x25   :  { %s7733_s4 = sld [smem:[%s8644_s0 + %s7582_s28]]   ;;  %s7586_s28 = smov 29  }
  0x26   :  { %s7738_s6 = sld [smem:[%s8644_s0 + %s7583_s7]]   ;;  %s7587_s7 = smov 30  }
  0x27   :  { %8663 = sst [smem:[#allocation14_spill]] %s7723_s20 }
  0x28   :  { %s7743_s20 = sld [smem:[%s8644_s0 + %s7584_s15]]   ;;  %s7588_s15 = smov 31  }
  0x2a   :  { %8664 = sst [smem:[#allocation15_spill]] %s7728_s27 }
  0x2b   :  { %8665 = sst [smem:[#allocation16_spill]] %s7733_s4 }
  0x2c   :  { %8666 = sst [smem:[#allocation17_spill]] %s7738_s6 }
  0x2d   :  { %s7748_s27 = sld [smem:[%s8644_s0 + %s7585_s22]]   ;;  %s7589_s22 = smov 32  }
  0x2e   :  { %8667 = sst [smem:[#allocation18_spill]] %s7743_s20 }
  0x2f   :  { %s7753_s4 = sld [smem:[%s8644_s0 + %s7586_s28]]   ;;  %s7590_s28 = smov 33  }
  0x30   :  { %s7758_s6 = sld [smem:[%s8644_s0 + %s7587_s7]]   ;;  %s7591_s7 = smov 34  }
  0x31   :  { %s7763_s20 = sld [smem:[%s8644_s0 + %s7588_s15]]   ;;  %s7592_s15 = smov 35  }
  0x33   :  { %8668 = sst [smem:[#allocation19_spill]] %s7748_s27 }
  0x34   :  { %s7768_s27 = sld [smem:[%s8644_s0 + %s7589_s22]]   ;;  %s7593_s22 = smov 36  }
  0x35   :  { %8669 = sst [smem:[#allocation20_spill]] %s7753_s4 }
  0x36   :  { %8670 = sst [smem:[#allocation21_spill]] %s7758_s6 }
  0x37   :  { %8671 = sst [smem:[#allocation22_spill]] %s7763_s20 }
  0x38   :  { %s7773_s4 = sld [smem:[%s8644_s0 + %s7590_s28]]  }
  0x39   :  { %s7778_s6 = sld [smem:[%s8644_s0 + %s7591_s7]]  }
  0x3a   :  { %8672 = sst [smem:[#allocation23_spill]] %s7768_s27 }
  0x3b   :  { %s7783_s20 = sld [smem:[%s8644_s0 + %s7592_s15]]  }
  0x3c   :  { %s7788_s27 = sld [smem:[%s8644_s0 + %s7593_s22]]  }
  0x3d   :  { %v7138_v0 = vld [vmem:[%s7628_s21] sm:$0xff]   ;;  %v7594_v1 = vmov 0.0   ;;  %v7139_v2 = vld [vmem:[%s7628_s21 + $0x8] sm:$0xff]   ;;  %vm7595_vm0 = vmmov 0   ;;  %v7141_v5 = vld [vmem:[%s7628_s21 + $0x10] sm:$0xff]  }
  0x3e   :  { %6456 = vmatprep.subr.bf16.mxu1 %v7594_v1  ;;  %6436 = vmatprep.subr.bf16.mxu0 %v7594_v1  ;;  %v7140_v3 = vld [vmem:[%s7618_s13] sm:$0xff]   ;;  %v7142_v4 = vld [vmem:[%s7618_s13 + $0x8] sm:$0xff]   ;;  %v7144_v6 = vld [vmem:[%s7618_s13 + $0x10] sm:$0xff]  }
  0x3f   :  { %6457 = vmatpush3.bf16.msra.mxu1 %v7138_v0  ;;  %6472 = vmatprep.mubr.msk.bf16.mxu1 %vm7595_vm0, %v7594_v1  ;;  %v7143_v7 = vld [vmem:[%s7628_s21 + $0x18] sm:$0xff]   ;;  %v7145_v9 = vld [vmem:[%s7628_s21 + $0x20] sm:$0xff]   ;;  %v7147_v10 = vld [vmem:[%s7628_s21 + $0x28] sm:$0xff]  }
  0x40   :  { %6458 = vmatprep.subr.bf16.mxu1 %v7594_v1  ;;  %6452 = vmatprep.mubr.msk.bf16.mxu0 %vm7595_vm0, %v7594_v1  ;;  %v7146_v8 = vld [vmem:[%s7618_s13 + $0x18] sm:$0xff]   ;;  %v7148_v11 = vld [vmem:[%s7618_s13 + $0x20] sm:$0xff]   ;;  %v7150_v12 = vld [vmem:[%s7618_s13 + $0x28] sm:$0xff]  }
  0x41   :  { %6437 = vmatpush3.bf16.msra.mxu0 %v7140_v3  ;;  %v7149_v13 = vld [vmem:[%s7628_s21 + $0x30] sm:$0xff]   ;;  %v7151_v15 = vld [vmem:[%s7628_s21 + $0x38] sm:$0xff]   ;;  %v152_v16 = vld [vmem:[%s7608_s5] sm:$0xff] }
  0x42   :  { %6438 = vmatprep.subr.bf16.mxu0 %v7594_v1  ;;  %v7152_v14 = vld [vmem:[%s7618_s13 + $0x30] sm:$0xff]   ;;  %v153_v17 = vld [vmem:[%s7608_s5 + $0x8] sm:$0xff]  ;;  %v7153_v18 = vld [vmem:[%s7618_s13 + $0x38] sm:$0xff]  }
  0x43   :  { %6459 = vmatpush3.bf16.msra.mxu1 %v7139_v2  ;;  %v7827_v19 = vpack.c.bf16 %v153_v17, %v152_v16 }
  0x44   :  { %6460 = vmatprep.subr.bf16.mxu1 %v7594_v1 }
  0x45   :  { %6439 = vmatpush3.bf16.msra.mxu0 %v7142_v4 }
  0x46   :  { %6440 = vmatprep.subr.bf16.mxu0 %v7594_v1 }
  0x47   :  { %6461 = vmatpush3.bf16.msra.mxu1 %v7141_v5 }
  0x48   :  { %6462 = vmatprep.subr.bf16.mxu1 %v7594_v1 }
  0x49   :  { %6441 = vmatpush3.bf16.msra.mxu0 %v7144_v6 }
  0x4a   :  { %6442 = vmatprep.subr.bf16.mxu0 %v7594_v1 }
  0x4b   :  { %6463 = vmatpush3.bf16.msra.mxu1 %v7143_v7 }
  0x4c   :  { %6464 = vmatprep.subr.bf16.mxu1 %v7594_v1 }
  0x4d   :  { %6443 = vmatpush3.bf16.msra.mxu0 %v7146_v8 }
  0x4e   :  { %6444 = vmatprep.subr.bf16.mxu0 %v7594_v1 }
  0x4f   :  { %6465 = vmatpush3.bf16.msra.mxu1 %v7145_v9 }
  0x50   :  { %6466 = vmatprep.subr.bf16.mxu1 %v7594_v1 }
  0x51   :  { %6445 = vmatpush3.bf16.msra.mxu0 %v7148_v11 }
  0x52   :  { %6446 = vmatprep.subr.bf16.mxu0 %v7594_v1 }
  0x53   :  { %6467 = vmatpush3.bf16.msra.mxu1 %v7147_v10 }
  0x54   :  { %6468 = vmatprep.subr.bf16.mxu1 %v7594_v1 }
  0x55   :  { %6447 = vmatpush3.bf16.msra.mxu0 %v7150_v12 }
  0x56   :  { %6448 = vmatprep.subr.bf16.mxu0 %v7594_v1 }
  0x57   :  { %6469 = vmatpush3.bf16.msra.mxu1 %v7149_v13 }
  0x58   :  { %6470 = vmatprep.subr.bf16.mxu1 %v7594_v1 }
  0x59   :  { %6449 = vmatpush3.bf16.msra.mxu0 %v7152_v14 }
  0x5a   :  { %6450 = vmatprep.subr.bf16.mxu0 %v7594_v1 }
  0x5b   :  { %6471 = vmatpush3.bf16.msra.mxu1 %v7151_v15 }
  0x5c   :  { %6496 = vmatprep.subr.bf16.mxu1 %v7594_v1 }
  0x5d   :  { %6451 = vmatpush3.bf16.msra.mxu0 %v7153_v18 }
  0x5e   :  { %6473 = vmatmul.mubr.bf16.vlgmr.msra.gmra.mrb[0].mxu1 %v7827_v19  ;;  %6476 = vmatprep.subr.bf16.mxu0 %v7594_v1 }
  0x5f   :  { %6498 = vmatprep.mubr.msk.bf16.mxu1 %vm7595_vm0, %v7594_v1 }
  0x60   :  { %6453 = vmatmul.mubr.bf16.vlgmr.msra.gmra.mrb[0].mxu0 %v7827_v19 }
  0x61   :  { %6492 = vmatprep.mubr.msk.bf16.mxu0 %vm7595_vm0, %v7594_v1 }
  0x62   :  { %78 = vsyncpa [#allocation3], 0  ;;  %v5449_v20 = vld [vmem:[%s7633_s25] ss:$0 sm:$0xff]  ;;  %vm495_vm1 = vcmask 261120   ;;  %v7155_v38 = vld [vmem:[%s7638_s29 + $0x8] sm:$0xff]  }
  0x63   :  { %v5440_v22 = vld [vmem:[%s7623_s17] ss:$0 sm:$0xff]  ;;  %v7156_v39 = vld [vmem:[%s7638_s29 + $0x10] sm:$0xff]   ;;  %v7157_v40 = vld [vmem:[%s7638_s29 + $0x18] sm:$0xff]   ;;  %vm547_vm2 = vcmask 130048   ;;  %s8673_s0 = sld [smem:[#allocation5_spill]] }
  0x64   :  { %v7154_v37 = vld [vmem:[%s7638_s29] sm:$0xff]   ;;  %v7159_v42 = vld [vmem:[%s7638_s29 + $0x28] sm:$0xff]   ;;  %v7160_v43 = vld [vmem:[%s7638_s29 + $0x30] sm:$0xff]   ;;  %s8688_s28 = sld [smem:[#allocation21_spill]]  ;;  %s8689_s1 = sld [smem:[#allocation20_spill]] }
  0x65   :  { %6477 = vmatpush3.bf16.msra.mxu0 %v7154_v37  ;;  %v7158_v41 = vld [vmem:[%s7638_s29 + $0x20] sm:$0xff]   ;;  %v7161_v44 = vld [vmem:[%s7638_s29 + $0x38] sm:$0xff]   ;;  %v7868_v50 = vld [vmem:[%s7613_s9 + $0x8] sm:$0xff]  ;;  %s8690_s2 = sld [smem:[#allocation22_spill]]  ;;  %s8691_s7 = sld [smem:[#allocation23_spill]] }
  0x66   :  { %6478 = vmatprep.subr.bf16.mxu0 %v7594_v1  ;;  %v7865_v46 = vld [vmem:[%s7613_s9] sm:$0xff]  ;;  %v7163_v12 = vld [vmem:[%s7628_s21 + $0x48] sm:$0xff]   ;;  %v7164_v14 = vld [vmem:[%s7628_s21 + $0x50] sm:$0xff]  }
  0x67   :  { %v7162_v6 = vld [vmem:[%s7628_s21 + $0x40] sm:$0xff]   ;;  %v7166_v15 = vld [vmem:[%s7628_s21 + $0x58] sm:$0xff]   ;;  %v7170_v17 = vld [vmem:[%s7628_s21 + $0x68] sm:$0xff]  }
  0x68   :  { %v5458_v8 = vld [vmem:[%s7643_s3] ss:$0 sm:$0xff]  ;;  %v7172_v18 = vld [vmem:[%s7628_s21 + $0x70] sm:$0xff]   ;;  %v7179_v37 = vld [vmem:[%s7638_s29 + $0x48] sm:$0xff]  }
  0x69   :  { %6479 = vmatpush3.bf16.msra.mxu0 %v7155_v38  ;;  %v7168_v16 = vld [vmem:[%s7628_s21 + $0x60] sm:$0xff]   ;;  %v7180_v38 = vld [vmem:[%s7638_s29 + $0x50] sm:$0xff]  }
  0x6a   :  { %6480 = vmatprep.subr.bf16.mxu0 %v7594_v1 }
  0x6d   :  { %6481 = vmatpush3.bf16.msra.mxu0 %v7156_v39  ;;  %v7181_v39 = vld [vmem:[%s7638_s29 + $0x58] sm:$0xff]  }
  0x6e   :  { %6482 = vmatprep.subr.bf16.mxu0 %v7594_v1 }
  0x71   :  { %6483 = vmatpush3.bf16.msra.mxu0 %v7157_v40  ;;  %v7182_v40 = vld [vmem:[%s7638_s29 + $0x60] sm:$0xff]  }
  0x72   :  { %6484 = vmatprep.subr.bf16.mxu0 %v7594_v1 }
  0x75   :  { %6485 = vmatpush3.bf16.msra.mxu0 %v7158_v41  ;;  %v7183_v41 = vld [vmem:[%s7638_s29 + $0x68] sm:$0xff]  }
  0x76   :  { %6486 = vmatprep.subr.bf16.mxu0 %v7594_v1 }
  0x79   :  { %6487 = vmatpush3.bf16.msra.mxu0 %v7159_v42  ;;  %v7184_v42 = vld [vmem:[%s7638_s29 + $0x70] sm:$0xff]  }
  0x7a   :  { %6488 = vmatprep.subr.bf16.mxu0 %v7594_v1 }
  0x7d   :  { %6489 = vmatpush3.bf16.msra.mxu0 %v7160_v43  ;;  %v7185_v43 = vld [vmem:[%s7638_s29 + $0x78] sm:$0xff]  }
  0x7e   :  { %6490 = vmatprep.subr.bf16.mxu0 %v7594_v1 }
  0x81   :  { %6491 = vmatpush3.bf16.msra.mxu0 %v7161_v44  ;;  %v5512_v44 = vld [vmem:[%s7633_s25 + $0x1] ss:$0 sm:$0xff] }
  0x82   :  { %6528 = vmatprep.subr.bf16.mxu0 %v7594_v1 }
  0x84   :  { %6493 = vmatmul.mubr.bf16.vlgmr.msra.gmra.mrb[4].mxu0 %v7827_v19 }
  0x85   :  { %6544 = vmatprep.mubr.msk.bf16.mxu0 %vm7595_vm0, %v7594_v1  ;;  %6529 = vmatpush3.bf16.msra.mxu0 %v7162_v6 }
  0x86   :  { %6530 = vmatprep.subr.bf16.mxu0 %v7594_v1 }
  0x89   :  { %6531 = vmatpush3.bf16.msra.mxu0 %v7163_v12 }
  0x8a   :  { %6532 = vmatprep.subr.bf16.mxu0 %v7594_v1 }
  0x8d   :  { %6533 = vmatpush3.bf16.msra.mxu0 %v7164_v14 }
  0x8e   :  { %6534 = vmatprep.subr.bf16.mxu0 %v7594_v1 }
  0x91   :  { %6535 = vmatpush3.bf16.msra.mxu0 %v7166_v15 }
  0x92   :  { %6536 = vmatprep.subr.bf16.mxu0 %v7594_v1 }
  0x95   :  { %6537 = vmatpush3.bf16.msra.mxu0 %v7168_v16 }
  0x96   :  { %6538 = vmatprep.subr.bf16.mxu0 %v7594_v1 }
  0x99   :  { %6539 = vmatpush3.bf16.msra.mxu0 %v7170_v17 }
  0x9a   :  { %6540 = vmatprep.subr.bf16.mxu0 %v7594_v1 }
  0x9d   :  { %6541 = vmatpush3.bf16.msra.mxu0 %v7172_v18 }
  0x9e   :  { %6542 = vmatprep.subr.bf16.mxu0 %v7594_v1 }
 0x131   :  { %v374_v21 = vpop.f32.mrb[0].mxu1 }
 0x132   :  { %v6474_v23 = vpop.f32.mrb[1].mxu1  ;;  %v375_v26 = vadd.f32 %v5449_v20, %v374_v21 }
 0x133   :  { %v377_v24 = vpop.f32.mrb[2].mxu1  ;;  %v262_v25 = vpop.f32.mrb[0].mxu0 }
 0x134   :  { %v378_v27 = vadd.f32 %v5449_v20, %v377_v24  ;;  %v6475_v28 = vpop.f32.mrb[3].mxu1  ;;  %v263_v29 = vadd.f32 %v5440_v22, %v262_v25  ;;  %v6454_v30 = vpop.f32.mrb[1].mxu0  ;;  %v7174_v20 = vld [vmem:[%s7628_s21 + $0x78] sm:$0xff]  }
 0x135   :  { %v265_v31 = vpop.f32.mrb[2].mxu0  ;;  %6543 = vmatpush3.bf16.msra.mxu0 %v7174_v20  ;;  %v7169_v30 = vld [vmem:[%s7618_s13 + $0x50] sm:$0xff]  }
 0x136   :  { %v494_v32 = vpack.c.bf16 %v378_v27, %v375_v26  ;;  %v266_v33 = vadd.f32 %v5440_v22, %v265_v31  ;;  %v6455_v34 = vpop.f32.mrb[3].mxu0  ;;  %6580 = vmatprep.subr.bf16.mxu0 %v7594_v1  ;;  %v7165_v27 = vld [vmem:[%s7618_s13 + $0x40] sm:$0xff]   ;;  %v7171_v31 = vld [vmem:[%s7618_s13 + $0x58] sm:$0xff]  }
 0x137   :  { %v7176_v34 = vld [vmem:[%s7618_s13 + $0x70] sm:$0xff]  }
 0x138   :  { %v493_v35 = vpack.c.bf16 %v266_v33, %v263_v29  ;;  %v500_v36 = vsel %vm495_vm1, %v494_v32, 0  ;;  %6545 = vmatmul.mubr.bf16.vlgmr.msra.gmra.mrb[8].mxu0 %v7827_v19  ;;  %v7167_v29 = vld [vmem:[%s7618_s13 + $0x48] sm:$0xff]   ;;  %v7173_v32 = vld [vmem:[%s7618_s13 + $0x60] sm:$0xff]  }
 0x139   :  { %6497 = vmatpush3.bf16.xpose.msra.mxu1 %v500_v36  ;;  %6584 = vmatprep.mubr.msk.bf16.mxu0 %vm7595_vm0, %v7594_v1  ;;  %v7175_v33 = vld [vmem:[%s7618_s13 + $0x68] sm:$0xff]   ;;  %v7178_v36 = vld [vmem:[%s7638_s29 + $0x40] sm:$0xff]  }
 0x13a   :  { %6502 = vmatprep.subr.bf16.mxu1 %v7594_v1 }
 0x140   :  { %6499 = vmatmul.mubr.msk.bf16.vlgmr.msra.gmra.mrb[4].mxu1 %vm495_vm1, %v493_v35  ;;  %v7177_v35 = vld [vmem:[%s7618_s13 + $0x78] sm:$0xff]  }
 0x141   :  { %6504 = vmatprep.mubr.msk.bf16.mxu1 %vm7595_vm0, %v7594_v1 }
 0x157   :  { %v486_v4 = vpop.f32.mrb[4].mxu0 }
 0x158   :  { %v6494_v5 = vpop.f32.mrb[5].mxu0  ;;  %v487_v10 = vadd.f32 %v5458_v8, %v486_v4 }
 0x159   :  { %v489_v7 = vpop.f32.mrb[6].mxu0  ;;  %v5538_v5 = vld [vmem:[%s7643_s3 + $0x1] ss:$0 sm:$0xff] }
 0x15a   :  { %v6495_v9 = vpop.f32.mrb[7].mxu0  ;;  %v490_v11 = vadd.f32 %v5458_v8, %v489_v7 }
 0x15c   :  { %v571_v13 = vpack.c.bf16 %v490_v11, %v487_v10 }
 0x15e   :  { %6503 = vmatpush3.bf16.msra.mxu1 %v571_v13 }
 0x15f   :  { %6508 = vmatprep.subr.bf16.mxu1 %v7594_v1 }
 0x213   :  { %v536_v45 = vpop.f32.mrb[4].mxu1 }
 0x214   :  { %v543_v47 = vmul.f32 0.17677669, %v536_v45  ;;  %v6500_v48 = vpop.f32.mrb[5].mxu1  ;;  %v842_v45 = vpop.f32.mrb[8].mxu0 }
 0x215   :  { %v539_v49 = vpop.f32.mrb[6].mxu1  ;;  %v6546_v48 = vpop.f32.mrb[9].mxu0 }
 0x216   :  { %v544_v51 = vmul.f32 0.17677669, %v539_v49  ;;  %v6501_v52 = vpop.f32.mrb[7].mxu1  ;;  %v545_v53 = vadd.f32 %v543_v47, %v7865_v46  ;;  %v843_v47 = vadd.f32 %v5512_v44, %v842_v45  ;;  %v845_v49 = vpop.f32.mrb[10].mxu0  ;;  %v7190_v45 = vld [vmem:[%s7628_s21 + $0x88] sm:$0xff]   ;;  %v7192_v48 = vld [vmem:[%s7628_s21 + $0x90] sm:$0xff]  }
 0x217   :  { %v6547_v52 = vpop.f32.mrb[11].mxu0 }
 0x218   :  { %v548_v54 = vsel %vm547_vm2, %v545_v53, -inf  ;;  %v546_v55 = vadd.f32 %v544_v51, %v7868_v50  ;;  %v846_v51 = vadd.f32 %v5512_v44, %v845_v49  ;;  %v7188_v44 = vld [vmem:[%s7628_s21 + $0x80] sm:$0xff]   ;;  %v7194_v49 = vld [vmem:[%s7628_s21 + $0x98] sm:$0xff]   ;;  %v7198_v52 = vld [vmem:[%s7628_s21 + $0xa8] sm:$0xff]  }
 0x219   :  { %549 = vmax.xlane.f32.xlu0 %v548_v54 }
 0x21a   :  { %v551_v56 = vsel %vm547_vm2, %v546_v55, -inf }
 0x21d   :  { %552 = vmax.xlane.f32.xlu0 %v551_v56 }
 0x2a6   :  { %v550_v57 = vpop.xlane.xlu0 %549 }
 0x2a7   :  { %v554_v58 = vsub.f32 %v545_v53, %v550_v57  ;;  %v964_v53 = vpack.c.bf16 %v846_v51, %v843_v47  ;;  %v7191_v47 = vld [vmem:[%s7648_s8 + $0x18] sm:$0xff]   ;;  %v7196_v51 = vld [vmem:[%s7628_s21 + $0xa0] sm:$0xff]  }
 0x2a9   :  { %v556_v59 = vmul.f32 1.442695, %v554_v58  ;;  %v969_v54 = vsel %vm495_vm1, %v964_v53, 0  ;;  %v7200_v53 = vld [vmem:[%s7628_s21 + $0xb0] sm:$0xff]  }
 0x2aa   :  { %v553_v60 = vpop.xlane.xlu0 %552 }
 0x2ab   :  { %7434 = vpow2.f32 %v556_v59  ;;  %v555_v61 = vsub.f32 %v546_v55, %v553_v60  ;;  %v5486_v60 = vld [vmem:[%s7623_s17 + $0x1] ss:$0 sm:$0xff] }
 0x2ad   :  { %v558_v62 = vmul.f32 1.442695, %v555_v61 }
 0x2af   :  { %7436 = vpow2.f32 %v558_v62 }
 0x2b5   :  { %v7435_v63 = vpop.eup %7434 }
 0x2b6   :  { %v560_v0 = vsel %vm547_vm2, %v7435_v63, 0.0 }
 0x2b7   :  { %561 = vadd.xlane.f32.xlu1 %v560_v0 }
 0x2b9   :  { %v7437_v2 = vpop.eup %7436 }
 0x2ba   :  { %v563_v3 = vsel %vm547_vm2, %v7437_v2, 0.0 }
 0x2bb   :  { %564 = vadd.xlane.f32.xlu1 %v563_v3 }
 0x344   :  { %v562_v21 = vpop.xlane.xlu1 %561 }
 0x345   :  { %7438 = vrcp.f32 %v562_v21 }
 0x348   :  { %v565_v22 = vpop.xlane.xlu1 %564 }
 0x349   :  { %7440 = vrcp.f32 %v565_v22 }
 0x34f   :  { %v7439_v23 = vpop.eup %7438 }
 0x350   :  { %v568_v25 = vmul.f32 %v7439_v23, %v7435_v63 }
 0x353   :  { %v7441_v24 = vpop.eup %7440 }
 0x354   :  { %v569_v26 = vmul.f32 %v7441_v24, %v7437_v2 }
 0x356   :  { %v570_v28 = vpack.c.bf16 %v569_v26, %v568_v25 }
 0x358   :  { %6505 = vmatmul.mubr.msk.bf16.vlgmr.msra.gmra.mrb[8].mxu1 %vm547_vm2, %v570_v28 }
 0x359   :  { %6509 = vmatpush3.bf16.msra.mxu1 %v7165_v27  ;;  %6524 = vmatprep.mubr.msk.bf16.mxu1 %vm7595_vm0, %v7594_v1 }
 0x35a   :  { %6510 = vmatprep.subr.bf16.mxu1 %v7594_v1 }
 0x35d   :  { %6511 = vmatpush3.bf16.msra.mxu1 %v7167_v29 }
 0x35e   :  { %6512 = vmatprep.subr.bf16.mxu1 %v7594_v1 }
 0x361   :  { %6513 = vmatpush3.bf16.msra.mxu1 %v7169_v30 }
 0x362   :  { %6514 = vmatprep.subr.bf16.mxu1 %v7594_v1 }
 0x365   :  { %6515 = vmatpush3.bf16.msra.mxu1 %v7171_v31 }
 0x366   :  { %6516 = vmatprep.subr.bf16.mxu1 %v7594_v1 }
 0x369   :  { %6517 = vmatpush3.bf16.msra.mxu1 %v7173_v32 }
 0x36a   :  { %6518 = vmatprep.subr.bf16.mxu1 %v7594_v1 }
 0x36d   :  { %6519 = vmatpush3.bf16.msra.mxu1 %v7175_v33 }
 0x36e   :  { %6520 = vmatprep.subr.bf16.mxu1 %v7594_v1 }
 0x371   :  { %6521 = vmatpush3.bf16.msra.mxu1 %v7176_v34  ;;  %v7189_v34 = vld [vmem:[%s7648_s8 + $0x10] sm:$0xff]  }
 0x372   :  { %6522 = vmatprep.subr.bf16.mxu1 %v7594_v1  ;;  %6581 = vmatpush3.bf16.msra.mxu0 %v7189_v34  ;;  %v7207_v34 = vld [vmem:[%s7638_s29 + $0x88] sm:$0xff]  }
 0x373   :  { %6582 = vmatprep.subr.bf16.mxu0 %v7594_v1 }
 0x375   :  { %6523 = vmatpush3.bf16.msra.mxu1 %v7177_v35 }
 0x376   :  { %6548 = vmatprep.subr.bf16.mxu1 %v7594_v1  ;;  %6583 = vmatpush3.bf16.msra.mxu0 %v7191_v47 }
 0x377   :  { %6596 = vmatprep.subr.bf16.mxu0 %v7594_v1 }
 0x378   :  { %6525 = vmatmul.mubr.bf16.vlgmr.msra.gmra.mrb[12].mxu1 %v7827_v19 }
 0x379   :  { %6549 = vmatpush3.bf16.msra.mxu1 %v7178_v36  ;;  %6564 = vmatprep.mubr.msk.bf16.mxu1 %vm7595_vm0, %v7594_v1 }
 0x37a   :  { %6550 = vmatprep.subr.bf16.mxu1 %v7594_v1 }
 0x37d   :  { %6551 = vmatpush3.bf16.msra.mxu1 %v7179_v37 }
 0x37e   :  { %6552 = vmatprep.subr.bf16.mxu1 %v7594_v1 }
 0x381   :  { %6553 = vmatpush3.bf16.msra.mxu1 %v7180_v38 }
 0x382   :  { %6554 = vmatprep.subr.bf16.mxu1 %v7594_v1 }
 0x385   :  { %6555 = vmatpush3.bf16.msra.mxu1 %v7181_v39 }
 0x386   :  { %6556 = vmatprep.subr.bf16.mxu1 %v7594_v1 }
 0x389   :  { %6557 = vmatpush3.bf16.msra.mxu1 %v7182_v40 }
 0x38a   :  { %6558 = vmatprep.subr.bf16.mxu1 %v7594_v1 }
 0x38d   :  { %6559 = vmatpush3.bf16.msra.mxu1 %v7183_v41  ;;  %v7186_v41 = vld [vmem:[%s7648_s8] sm:$0xff]  }
 0x38e   :  { %6560 = vmatprep.subr.bf16.mxu1 %v7594_v1 }
 0x391   :  { %6561 = vmatpush3.bf16.msra.mxu1 %v7184_v42 }
 0x392   :  { %6562 = vmatprep.subr.bf16.mxu1 %v7594_v1 }
 0x395   :  { %6563 = vmatpush3.bf16.msra.mxu1 %v7185_v43  ;;  %v7187_v43 = vld [vmem:[%s7648_s8 + $0x8] sm:$0xff]  }
 0x396   :  { %6568 = vmatprep.subr.bf16.mxu1 %v7594_v1 }
 0x398   :  { %6565 = vmatmul.mubr.bf16.vlgmr.msra.gmra.mrb[16].mxu1 %v7827_v19 }
 0x399   :  { %6570 = vmatprep.mubr.msk.bf16.mxu1 %vm7595_vm0, %v7594_v1 }
 0x39e   :  { %6569 = vmatpush3.bf16.xpose.msra.mxu1 %v969_v54  ;;  %v7202_v54 = vld [vmem:[%s7628_s21 + $0xb8] sm:$0xff]  }
 0x39f   :  { %6574 = vmatprep.subr.bf16.mxu1 %v7594_v1 }
 0x42b   :  { %v7941_v55 = vpop.f32.mrb[8].mxu1 }
 0x42c   :  { %v6506_v56 = vpop.f32.mrb[9].mxu1 }
 0x42d   :  { %v7943_v57 = vpop.f32.mrb[10].mxu1 }
 0x42e   :  { %v616_v58 = vpack.c.bf16 %v7943_v57, %v7941_v55  ;;  %v6507_v59 = vpop.f32.mrb[11].mxu1 }
 0x44b   :  { %v728_v61 = vpop.f32.mrb[12].mxu1 }
 0x44c   :  { %v6526_v62 = vpop.f32.mrb[13].mxu1  ;;  %v729_v0 = vadd.f32 %v5486_v60, %v728_v61  ;;  %v7195_v61 = vld [vmem:[%s7618_s13 + $0x88] sm:$0xff]  }
 0x44d   :  { %v731_v63 = vpop.f32.mrb[14].mxu1 }
 0x44e   :  { %v732_v2 = vadd.f32 %v5486_v60, %v731_v63  ;;  %v6527_v3 = vpop.f32.mrb[15].mxu1 }
 0x450   :  { %v963_v4 = vpack.c.bf16 %v732_v2, %v729_v0  ;;  %v7197_v2 = vld [vmem:[%s7618_s13 + $0x90] sm:$0xff]  }
 0x452   :  { %6571 = vmatmul.mubr.msk.bf16.vlgmr.msra.gmra.mrb[20].mxu1 %vm495_vm1, %v963_v4  ;;  %v7199_v4 = vld [vmem:[%s7618_s13 + $0x98] sm:$0xff]  }
 0x453   :  { %6576 = vmatprep.mubr.msk.bf16.mxu1 %vm7595_vm0, %v7594_v1 }
 0x46b   :  { %v956_v6 = vpop.f32.mrb[16].mxu1 }
 0x46c   :  { %v957_v7 = vadd.f32 %v5538_v5, %v956_v6  ;;  %v6566_v8 = vpop.f32.mrb[17].mxu1  ;;  %v7203_v6 = vld [vmem:[%s7618_s13 + $0xa8] sm:$0xff]  }
 0x46d   :  { %v959_v9 = vpop.f32.mrb[18].mxu1  ;;  %v7205_v8 = vld [vmem:[%s7618_s13 + $0xb8] sm:$0xff]  }
 0x46e   :  { %v960_v10 = vadd.f32 %v5538_v5, %v959_v9  ;;  %v6567_v11 = vpop.f32.mrb[19].mxu1  ;;  %v7201_v5 = vld [vmem:[%s7618_s13 + $0xa0] sm:$0xff]  }
 0x46f   :  { %v5602_v9 = vld [vmem:[%s7633_s25 + $0x2] ss:$0 sm:$0xff] }
 0x470   :  { %v1039_v12 = vpack.c.bf16 %v960_v10, %v957_v7  ;;  %v7204_v7 = vld [vmem:[%s7618_s13 + $0xb0] sm:$0xff]  }
 0x472   :  { %6575 = vmatpush3.bf16.msra.mxu1 %v1039_v12 }
 0x473   :  { %6588 = vmatprep.subr.bf16.mxu1 %v7594_v1 }
 0x525   :  { %v1005_v13 = vpop.f32.mrb[20].mxu1 }
 0x526   :  { %v1012_v14 = vmul.f32 0.17677669, %v1005_v13  ;;  %v6572_v15 = vpop.f32.mrb[21].mxu1 }
 0x527   :  { %v1008_v16 = vpop.f32.mrb[22].mxu1 }
 0x528   :  { %v1013_v17 = vmul.f32 0.17677669, %v1008_v16  ;;  %v6573_v18 = vpop.f32.mrb[23].mxu1  ;;  %v1014_v20 = vadd.f32 %v1012_v14, %v7865_v46 }
 0x52a   :  { %v1016_v21 = vsel %vm547_vm2, %v1014_v20, -inf  ;;  %v1015_v22 = vadd.f32 %v1013_v17, %v7868_v50 }
 0x52b   :  { %1017 = vmax.xlane.f32.xlu0 %v1016_v21 }
 0x52c   :  { %v1019_v23 = vsel %vm547_vm2, %v1015_v22, -inf }
 0x52d   :  { %1020 = vmax.xlane.f32.xlu1 %v1019_v23 }
 0x5b8   :  { %v1018_v24 = vpop.xlane.xlu0 %1017 }
 0x5b9   :  { %v1022_v25 = vsub.f32 %v1014_v20, %v1018_v24 }
 0x5ba   :  { %v1021_v26 = vpop.xlane.xlu1 %1020 }
 0x5bb   :  { %v1024_v27 = vmul.f32 1.442695, %v1022_v25  ;;  %v1023_v28 = vsub.f32 %v1015_v22, %v1021_v26  ;;  %v5576_v25 = vld [vmem:[%s7623_s17 + $0x2] ss:$0 sm:$0xff] }
 0x5bd   :  { %7442 = vpow2.f32 %v1024_v27  ;;  %v1026_v29 = vmul.f32 1.442695, %v1023_v28 }
 0x5bf   :  { %7444 = vpow2.f32 %v1026_v29 }
 0x5c7   :  { %v7443_v30 = vpop.eup %7442 }
 0x5c8   :  { %v1028_v31 = vsel %vm547_vm2, %v7443_v30, 0.0 }
 0x5c9   :  { %v7445_v32 = vpop.eup %7444  ;;  %1029 = vadd.xlane.f32.xlu0 %v1028_v31 }
 0x5ca   :  { %v1031_v33 = vsel %vm547_vm2, %v7445_v32, 0.0 }
 0x5cb   :  { %1032 = vadd.xlane.f32.xlu1 %v1031_v33  ;;  %v7206_v33 = vld [vmem:[%s7638_s29 + $0x80] sm:$0xff]  }
 0x656   :  { %v1030_v35 = vpop.xlane.xlu0 %1029 }
 0x657   :  { %7446 = vrcp.f32 %v1030_v35  ;;  %v7208_v35 = vld [vmem:[%s7638_s29 + $0x90] sm:$0xff]  }
 0x658   :  { %v1033_v36 = vpop.xlane.xlu1 %1032 }
 0x659   :  { %7448 = vrcp.f32 %v1033_v36  ;;  %v7209_v36 = vld [vmem:[%s7638_s29 + $0x98] sm:$0xff]  }
 0x661   :  { %v7447_v37 = vpop.eup %7446 }
 0x662   :  { %v1036_v39 = vmul.f32 %v7447_v37, %v7443_v30  ;;  %v7210_v37 = vld [vmem:[%s7638_s29 + $0xa0] sm:$0xff]  }
 0x663   :  { %v7449_v38 = vpop.eup %7448 }
 0x664   :  { %v1037_v40 = vmul.f32 %v7449_v38, %v7445_v32  ;;  %v7211_v38 = vld [vmem:[%s7638_s29 + $0xa8] sm:$0xff]  }
 0x666   :  { %v1038_v42 = vpack.c.bf16 %v1037_v40, %v1036_v39  ;;  %v7212_v39 = vld [vmem:[%s7638_s29 + $0xb0] sm:$0xff]   ;;  %v7213_v40 = vld [vmem:[%s7638_s29 + $0xb8] sm:$0xff]  }
 0x668   :  { %6577 = vmatmul.mubr.msk.bf16.vlgmr.msra.gmra.mrb[24].mxu1 %vm547_vm2, %v1038_v42 }
 0x669   :  { %6589 = vmatpush3.bf16.msra.mxu1 %v7186_v41  ;;  %6592 = vmatprep.mubr.msk.bf16.mxu1 %vm7595_vm0, %v7594_v1 }
 0x66a   :  { %6590 = vmatprep.subr.bf16.mxu1 %v7594_v1 }
 0x66d   :  { %6591 = vmatpush3.bf16.msra.mxu1 %v7187_v43 }
 0x66e   :  { %6616 = vmatprep.subr.bf16.mxu1 %v7594_v1 }
 0x670   :  { %6593 = vmatmul.mubr.msk.bf16.vlgmr.msra.gmra.mrb[28].mxu1 %vm495_vm1, %v616_v58  ;;  %v7193_v58 = vld [vmem:[%s7618_s13 + $0x80] sm:$0xff]  }
 0x671   :  { %6617 = vmatpush3.bf16.msra.mxu1 %v7188_v44  ;;  %6632 = vmatprep.mubr.msk.bf16.mxu1 %vm7595_vm0, %v7594_v1 }
 0x672   :  { %6618 = vmatprep.subr.bf16.mxu1 %v7594_v1 }
 0x675   :  { %6619 = vmatpush3.bf16.msra.mxu1 %v7190_v45 }
 0x676   :  { %6620 = vmatprep.subr.bf16.mxu1 %v7594_v1 }
 0x679   :  { %6621 = vmatpush3.bf16.msra.mxu1 %v7192_v48 }
 0x67a   :  { %6622 = vmatprep.subr.bf16.mxu1 %v7594_v1 }
 0x67d   :  { %6623 = vmatpush3.bf16.msra.mxu1 %v7194_v49 }
 0x67e   :  { %6624 = vmatprep.subr.bf16.mxu1 %v7594_v1 }
 0x681   :  { %6625 = vmatpush3.bf16.msra.mxu1 %v7196_v51 }
 0x682   :  { %6626 = vmatprep.subr.bf16.mxu1 %v7594_v1 }
 0x685   :  { %6627 = vmatpush3.bf16.msra.mxu1 %v7198_v52 }
 0x686   :  { %6628 = vmatprep.subr.bf16.mxu1 %v7594_v1 }
 0x689   :  { %6629 = vmatpush3.bf16.msra.mxu1 %v7200_v53 }
 0x68a   :  { %6630 = vmatprep.subr.bf16.mxu1 %v7594_v1 }
 0x68d   :  { %6631 = vmatpush3.bf16.msra.mxu1 %v7202_v54 }
 0x68e   :  { %6656 = vmatprep.subr.bf16.mxu1 %v7594_v1 }
 0x690   :  { %6633 = vmatmul.mubr.bf16.vlgmr.msra.gmra.mrb[32].mxu1 %v7827_v19 }
 0x691   :  { %6658 = vmatprep.mubr.msk.bf16.mxu1 %vm7595_vm0, %v7594_v1 }
 0x73b   :  { %v1077_v55 = vpop.f32.mrb[24].mxu1 }
 0x73c   :  { %v6578_v56 = vpop.f32.mrb[25].mxu1 }
 0x73d   :  { %v1080_v57 = vpop.f32.mrb[26].mxu1 }
 0x73e   :  { %v1084_v59 = vpack.c.bf16 %v1080_v57, %v1077_v55  ;;  %v6579_v60 = vpop.f32.mrb[27].mxu1 }
 0x740   :  { %6585 = vmatmul.mubr.msk.bf16.vlgmr.msra.gmra.mrb[12].mxu0 %vm495_vm1, %v1084_v59 }
 0x741   :  { %6597 = vmatpush3.bf16.msra.mxu0 %v7193_v58  ;;  %6612 = vmatprep.mubr.msk.bf16.mxu0 %vm7595_vm0, %v7594_v1 }
 0x742   :  { %6598 = vmatprep.subr.bf16.mxu0 %v7594_v1 }
 0x743   :  { %v1195_v62 = vpop.f32.mrb[28].mxu1 }
 0x744   :  { %v6594_v63 = vpop.f32.mrb[29].mxu1 }
 0x745   :  { %6599 = vmatpush3.bf16.msra.mxu0 %v7195_v61  ;;  %v1198_v0 = vpop.f32.mrb[30].mxu1 }
 0x746   :  { %v6595_v3 = vpop.f32.mrb[31].mxu1  ;;  %6600 = vmatprep.subr.bf16.mxu0 %v7594_v1 }
 0x747   :  { %v5628_v3 = vld [vmem:[%s7643_s3 + $0x2] ss:$0 sm:$0xff] }
 0x749   :  { %6601 = vmatpush3.bf16.msra.mxu0 %v7197_v2 }
 0x74a   :  { %6602 = vmatprep.subr.bf16.mxu0 %v7594_v1 }
 0x74d   :  { %6603 = vmatpush3.bf16.msra.mxu0 %v7199_v4 }
 0x74e   :  { %6604 = vmatprep.subr.bf16.mxu0 %v7594_v1 }
 0x751   :  { %6605 = vmatpush3.bf16.msra.mxu0 %v7201_v5 }
 0x752   :  { %6606 = vmatprep.subr.bf16.mxu0 %v7594_v1 }
 0x755   :  { %6607 = vmatpush3.bf16.msra.mxu0 %v7203_v6 }
 0x756   :  { %6608 = vmatprep.subr.bf16.mxu0 %v7594_v1 }
 0x759   :  { %6609 = vmatpush3.bf16.msra.mxu0 %v7204_v7 }
 0x75a   :  { %6610 = vmatprep.subr.bf16.mxu0 %v7594_v1 }
 0x75d   :  { %6611 = vmatpush3.bf16.msra.mxu0 %v7205_v8  ;;  %v7214_v8 = vld [vmem:[%s7628_s21 + $0xc0] sm:$0xff]  }
 0x75e   :  { %6636 = vmatprep.subr.bf16.mxu0 %v7594_v1 }
 0x760   :  { %6613 = vmatmul.mubr.bf16.vlgmr.msra.gmra.mrb[16].mxu0 %v7827_v19 }
 0x761   :  { %6652 = vmatprep.mubr.msk.bf16.mxu0 %vm7595_vm0, %v7594_v1  ;;  %6637 = vmatpush3.bf16.msra.mxu0 %v7206_v33 }
 0x762   :  { %6638 = vmatprep.subr.bf16.mxu0 %v7594_v1 }
 0x763   :  { %v1423_v10 = vpop.f32.mrb[32].mxu1 }
 0x764   :  { %v1424_v11 = vadd.f32 %v5602_v9, %v1423_v10  ;;  %v6634_v12 = vpop.f32.mrb[33].mxu1 }
 0x765   :  { %v1426_v13 = vpop.f32.mrb[34].mxu1  ;;  %6639 = vmatpush3.bf16.msra.mxu0 %v7207_v34  ;;  %v7221_v34 = vld [vmem:[%s7618_s13 + $0xc8] sm:$0xff]  }
 0x766   :  { %v1427_v14 = vadd.f32 %v5602_v9, %v1426_v13  ;;  %v6635_v15 = vpop.f32.mrb[35].mxu1  ;;  %6640 = vmatprep.subr.bf16.mxu0 %v7594_v1  ;;  %v7216_v9 = vld [vmem:[%s7628_s21 + $0xc8] sm:$0xff]  }
 0x768   :  { %v1545_v16 = vpack.c.bf16 %v1427_v14, %v1424_v11 }
 0x769   :  { %6641 = vmatpush3.bf16.msra.mxu0 %v7208_v35  ;;  %v7223_v35 = vld [vmem:[%s7618_s13 + $0xd0] sm:$0xff]  }
 0x76a   :  { %v1550_v17 = vsel %vm495_vm1, %v1545_v16, 0  ;;  %6642 = vmatprep.subr.bf16.mxu0 %v7594_v1  ;;  %v7215_v16 = vld [vmem:[%s7648_s8 + $0x20] sm:$0xff]  }
 0x76b   :  { %6657 = vmatpush3.bf16.xpose.msra.mxu1 %v1550_v17 }
 0x76c   :  { %6662 = vmatprep.subr.bf16.mxu1 %v7594_v1 }
 0x76d   :  { %6643 = vmatpush3.bf16.msra.mxu0 %v7209_v36  ;;  %v7225_v36 = vld [vmem:[%s7618_s13 + $0xd8] sm:$0xff]  }
 0x76e   :  { %6644 = vmatprep.subr.bf16.mxu0 %v7594_v1 }
 0x771   :  { %6645 = vmatpush3.bf16.msra.mxu0 %v7210_v37  ;;  %v7227_v37 = vld [vmem:[%s7618_s13 + $0xe0] sm:$0xff]  }
 0x772   :  { %6646 = vmatprep.subr.bf16.mxu0 %v7594_v1 }
 0x775   :  { %6647 = vmatpush3.bf16.msra.mxu0 %v7211_v38  ;;  %v7229_v38 = vld [vmem:[%s7618_s13 + $0xe8] sm:$0xff]  }
 0x776   :  { %6648 = vmatprep.subr.bf16.mxu0 %v7594_v1 }
 0x779   :  { %6649 = vmatpush3.bf16.msra.mxu0 %v7212_v39  ;;  %v7230_v39 = vld [vmem:[%s7618_s13 + $0xf0] sm:$0xff]  }
 0x77a   :  { %6650 = vmatprep.subr.bf16.mxu0 %v7594_v1 }
 0x77d   :  { %6651 = vmatpush3.bf16.msra.mxu0 %v7213_v40  ;;  %v7231_v40 = vld [vmem:[%s7618_s13 + $0xf8] sm:$0xff]  }
 0x77e   :  { %6696 = vmatprep.subr.bf16.mxu0 %v7594_v1 }
 0x780   :  { %6653 = vmatmul.mubr.bf16.vlgmr.msra.gmra.mrb[20].mxu0 %v7827_v19 }
 0x781   :  { %6712 = vmatprep.mubr.msk.bf16.mxu0 %vm7595_vm0, %v7594_v1  ;;  %6697 = vmatpush3.bf16.msra.mxu0 %v7214_v8  ;;  %v7239_v8 = vld [vmem:[%s7638_s29 + $0xf8] sm:$0xff]  }
 0x782   :  { %6698 = vmatprep.subr.bf16.mxu0 %v7594_v1 }
 0x785   :  { %6699 = vmatpush3.bf16.msra.mxu0 %v7216_v9 }
 0x786   :  { %6700 = vmatprep.subr.bf16.mxu0 %v7594_v1 }
 0x813   :  { %v1139_v18 = vpop.f32.mrb[12].mxu0 }
 0x814   :  { %v8020_v20 = vadd.f32 %v1195_v62, %v1139_v18  ;;  %v6586_v21 = vpop.f32.mrb[13].mxu0  ;;  %v7217_v18 = vld [vmem:[%s7648_s8 + $0x28] sm:$0xff]  }
 0x815   :  { %v1142_v22 = vpop.f32.mrb[14].mxu0  ;;  %v7218_v21 = vld [vmem:[%s7628_s21 + $0xd0] sm:$0xff]  }
 0x816   :  { %v8022_v23 = vadd.f32 %v1198_v0, %v1142_v22  ;;  %v6587_v24 = vpop.f32.mrb[15].mxu0  ;;  %6701 = vmatpush3.bf16.msra.mxu0 %v7218_v21  ;;  %v7220_v22 = vld [vmem:[%s7628_s21 + $0xd8] sm:$0xff]  }
 0x817   :  { %6702 = vmatprep.subr.bf16.mxu0 %v7594_v1  ;;  %v7222_v24 = vld [vmem:[%s7628_s21 + $0xe0] sm:$0xff]  }
 0x81a   :  { %6703 = vmatpush3.bf16.msra.mxu0 %v7220_v22 }
 0x81b   :  { %6704 = vmatprep.subr.bf16.mxu0 %v7594_v1 }
 0x81e   :  { %6705 = vmatpush3.bf16.msra.mxu0 %v7222_v24 }
 0x81f   :  { %6706 = vmatprep.subr.bf16.mxu0 %v7594_v1 }
 0x833   :  { %v1309_v26 = vpop.f32.mrb[16].mxu0 }
 0x834   :  { %v6614_v27 = vpop.f32.mrb[17].mxu0  ;;  %v1310_v29 = vadd.f32 %v5576_v25, %v1309_v26  ;;  %v7226_v26 = vld [vmem:[%s7628_s21 + $0xf0] sm:$0xff]  }
 0x835   :  { %v1312_v28 = vpop.f32.mrb[18].mxu0  ;;  %v7228_v27 = vld [vmem:[%s7628_s21 + $0xf8] sm:$0xff]  }
 0x836   :  { %v1313_v30 = vadd.f32 %v5576_v25, %v1312_v28  ;;  %v6615_v31 = vpop.f32.mrb[19].mxu0  ;;  %v7224_v25 = vld [vmem:[%s7628_s21 + $0xe8] sm:$0xff]   ;;  %s8677_s21 = sld [smem:[#allocation7_spill]] }
 0x837   :  { %6707 = vmatpush3.bf16.msra.mxu0 %v7224_v25  ;;  %v7219_v31 = vld [vmem:[%s7618_s13 + $0xc0] sm:$0xff]   ;;  %s8675_s13 = sld [smem:[#allocation9_spill]] }
 0x838   :  { %v1544_v32 = vpack.c.bf16 %v1313_v30, %v1310_v29  ;;  %6708 = vmatprep.subr.bf16.mxu0 %v7594_v1 }
 0x83a   :  { %6659 = vmatmul.mubr.msk.bf16.vlgmr.msra.gmra.mrb[36].mxu1 %vm495_vm1, %v1544_v32 }
 0x83b   :  { %6664 = vmatprep.mubr.msk.bf16.mxu1 %vm7595_vm0, %v7594_v1  ;;  %6709 = vmatpush3.bf16.msra.mxu0 %v7226_v26 }
 0x83c   :  { %6710 = vmatprep.subr.bf16.mxu0 %v7594_v1 }
 0x83f   :  { %6711 = vmatpush3.bf16.msra.mxu0 %v7228_v27 }
 0x840   :  { %6736 = vmatprep.subr.bf16.mxu0 %v7594_v1 }
 0x842   :  { %6713 = vmatmul.mubr.bf16.vlgmr.msra.gmra.mrb[24].mxu0 %v7827_v19 }
 0x843   :  { %6738 = vmatprep.mubr.msk.bf16.mxu0 %vm7595_vm0, %v7594_v1 }
 0x853   :  { %v1537_v63 = vpop.f32.mrb[20].mxu0 }
 0x854   :  { %v6654_v0 = vpop.f32.mrb[21].mxu0  ;;  %v1538_v5 = vadd.f32 %v5628_v3, %v1537_v63 }
 0x855   :  { %v1540_v2 = vpop.f32.mrb[22].mxu0 }
 0x856   :  { %v6655_v4 = vpop.f32.mrb[23].mxu0  ;;  %v1541_v6 = vadd.f32 %v5628_v3, %v1540_v2  ;;  %v7234_v3 = vld [vmem:[%s7638_s29 + $0xd0] sm:$0xff]  }
 0x857   :  { %v7235_v4 = vld [vmem:[%s7638_s29 + $0xd8] sm:$0xff]  }
 0x858   :  { %v1620_v7 = vpack.c.bf16 %v1541_v6, %v1538_v5  ;;  %v7236_v5 = vld [vmem:[%s7638_s29 + $0xe0] sm:$0xff]   ;;  %v7237_v6 = vld [vmem:[%s7638_s29 + $0xe8] sm:$0xff]  }
 0x85a   :  { %6663 = vmatpush3.bf16.msra.mxu1 %v1620_v7  ;;  %v7238_v7 = vld [vmem:[%s7638_s29 + $0xf0] sm:$0xff]  }
 0x85b   :  { %6668 = vmatprep.subr.bf16.mxu1 %v7594_v1 }
 0x90d   :  { %v1586_v41 = vpop.f32.mrb[36].mxu1 }
 0x90e   :  { %v1593_v42 = vmul.f32 0.17677669, %v1586_v41  ;;  %v6660_v43 = vpop.f32.mrb[37].mxu1  ;;  %v5689_v41 = vld [vmem:[%s7633_s25 + $0x3] ss:$0 sm:$0xff]  ;;  %s8678_s25 = sld [smem:[#allocation8_spill]] }
 0x90f   :  { %v1589_v44 = vpop.f32.mrb[38].mxu1 }
 0x910   :  { %v1594_v45 = vmul.f32 0.17677669, %v1589_v44  ;;  %v6661_v47 = vpop.f32.mrb[39].mxu1  ;;  %v1595_v48 = vadd.f32 %v1593_v42, %v7865_v46 }
 0x912   :  { %v1597_v49 = vsel %vm547_vm2, %v1595_v48, -inf  ;;  %v1596_v51 = vadd.f32 %v1594_v45, %v7868_v50 }
 0x913   :  { %1598 = vmax.xlane.f32.xlu0 %v1597_v49 }
 0x914   :  { %v1600_v52 = vsel %vm547_vm2, %v1596_v51, -inf }
 0x915   :  { %1601 = vmax.xlane.f32.xlu1 %v1600_v52  ;;  %v1950_v42 = vpop.f32.mrb[24].mxu0 }
 0x916   :  { %v1951_v43 = vadd.f32 %v5689_v41, %v1950_v42  ;;  %v6714_v44 = vpop.f32.mrb[25].mxu0 }
 0x917   :  { %v1953_v45 = vpop.f32.mrb[26].mxu0 }
 0x918   :  { %v1954_v47 = vadd.f32 %v5689_v41, %v1953_v45  ;;  %v7241_v45 = vld [vmem:[%s7648_s8 + $0x38] sm:$0xff]  }
 0x91a   :  { %v2072_v49 = vpack.c.bf16 %v1954_v47, %v1951_v43  ;;  %v7240_v43 = vld [vmem:[%s7648_s8 + $0x30] sm:$0xff]   ;;  %s8681_s8 = sld [smem:[#allocation12_spill]] }
 0x9a0   :  { %v1599_v53 = vpop.xlane.xlu0 %1598 }
 0x9a1   :  { %v1603_v54 = vsub.f32 %v1595_v48, %v1599_v53  ;;  %v6715_v48 = vpop.f32.mrb[27].mxu0 }
 0x9a2   :  { %v1602_v55 = vpop.xlane.xlu1 %1601 }
 0x9a3   :  { %v1605_v56 = vmul.f32 1.442695, %v1603_v54  ;;  %v1604_v57 = vsub.f32 %v1596_v51, %v1602_v55  ;;  %v2077_v51 = vsel %vm495_vm1, %v2072_v49, 0 }
 0x9a4   :  { %6737 = vmatpush3.bf16.xpose.msra.mxu0 %v2077_v51 }
 0x9a5   :  { %7450 = vpow2.f32 %v1605_v56  ;;  %v1607_v58 = vmul.f32 1.442695, %v1604_v57  ;;  %6742 = vmatprep.subr.bf16.mxu0 %v7594_v1 }
 0x9a7   :  { %7452 = vpow2.f32 %v1607_v58  ;;  %v5663_v58 = vld [vmem:[%s7623_s17 + $0x3] ss:$0 sm:$0xff]  ;;  %s8676_s17 = sld [smem:[#allocation11_spill]] }
 0x9af   :  { %v7451_v59 = vpop.eup %7450 }
 0x9b0   :  { %v1609_v60 = vsel %vm547_vm2, %v7451_v59, 0.0 }
 0x9b1   :  { %v7453_v61 = vpop.eup %7452  ;;  %1610 = vadd.xlane.f32.xlu0 %v1609_v60 }
 0x9b2   :  { %v1612_v62 = vsel %vm547_vm2, %v7453_v61, 0.0 }
 0x9b3   :  { %1613 = vadd.xlane.f32.xlu1 %v1612_v62 }
 0xa3e   :  { %v1611_v10 = vpop.xlane.xlu0 %1610 }
 0xa3f   :  { %7454 = vrcp.f32 %v1611_v10 }
 0xa40   :  { %v1614_v11 = vpop.xlane.xlu1 %1613 }
 0xa41   :  { %7456 = vrcp.f32 %v1614_v11 }
 0xa49   :  { %v7455_v12 = vpop.eup %7454 }
 0xa4a   :  { %v1617_v14 = vmul.f32 %v7455_v12, %v7451_v59 }
 0xa4b   :  { %v7457_v13 = vpop.eup %7456 }
 0xa4c   :  { %v1618_v15 = vmul.f32 %v7457_v13, %v7453_v61 }
 0xa4e   :  { %v1619_v17 = vpack.c.bf16 %v1618_v15, %v1617_v14 }
 0xa50   :  { %6665 = vmatmul.mubr.msk.bf16.vlgmr.msra.gmra.mrb[40].mxu1 %vm547_vm2, %v1619_v17 }
 0xa51   :  { %6669 = vmatpush3.bf16.msra.mxu1 %v7215_v16  ;;  %6672 = vmatprep.mubr.msk.bf16.mxu1 %vm7595_vm0, %v7594_v1 }
 0xa52   :  { %6670 = vmatprep.subr.bf16.mxu1 %v7594_v1 }
 0xa55   :  { %6671 = vmatpush3.bf16.msra.mxu1 %v7217_v18 }
 0xa56   :  { %6676 = vmatprep.subr.bf16.mxu1 %v7594_v1 }
 0xb23   :  { %v1658_v28 = vpop.f32.mrb[40].mxu1 }
 0xb24   :  { %v6666_v29 = vpop.f32.mrb[41].mxu1 }
 0xb25   :  { %v1661_v30 = vpop.f32.mrb[42].mxu1 }
 0xb26   :  { %v1665_v32 = vpack.c.bf16 %v1661_v30, %v1658_v28  ;;  %v6667_v33 = vpop.f32.mrb[43].mxu1 }
 0xb28   :  { %6673 = vmatmul.mubr.msk.bf16.vlgmr.msra.gmra.mrb[44].mxu1 %vm495_vm1, %v1665_v32  ;;  %v5715_v32 = vld [vmem:[%s7643_s3 + $0x3] ss:$0 sm:$0xff]  ;;  %s8680_s3 = sld [smem:[#allocation10_spill]] }
 0xb29   :  { %6677 = vmatpush3.bf16.msra.mxu1 %v7219_v31  ;;  %6692 = vmatprep.mubr.msk.bf16.mxu1 %vm7595_vm0, %v7594_v1 }
 0xb2a   :  { %6678 = vmatprep.subr.bf16.mxu1 %v7594_v1 }
 0xb2d   :  { %6679 = vmatpush3.bf16.msra.mxu1 %v7221_v34 }
 0xb2e   :  { %6680 = vmatprep.subr.bf16.mxu1 %v7594_v1 }
 0xb31   :  { %6681 = vmatpush3.bf16.msra.mxu1 %v7223_v35 }
 0xb32   :  { %6682 = vmatprep.subr.bf16.mxu1 %v7594_v1 }
 0xb35   :  { %6683 = vmatpush3.bf16.msra.mxu1 %v7225_v36 }
 0xb36   :  { %6684 = vmatprep.subr.bf16.mxu1 %v7594_v1 }
 0xb39   :  { %6685 = vmatpush3.bf16.msra.mxu1 %v7227_v37 }
 0xb3a   :  { %6686 = vmatprep.subr.bf16.mxu1 %v7594_v1 }
 0xb3d   :  { %6687 = vmatpush3.bf16.msra.mxu1 %v7229_v38 }
 0xb3e   :  { %6688 = vmatprep.subr.bf16.mxu1 %v7594_v1 }
 0xb41   :  { %6689 = vmatpush3.bf16.msra.mxu1 %v7230_v39 }
 0xb42   :  { %6690 = vmatprep.subr.bf16.mxu1 %v7594_v1 }
 0xb45   :  { %6691 = vmatpush3.bf16.msra.mxu1 %v7231_v40 }
 0xb46   :  { %6716 = vmatprep.subr.bf16.mxu1 %v7594_v1 }
 0xb48   :  { %6693 = vmatmul.mubr.bf16.vlgmr.msra.gmra.mrb[48].mxu1 %v7827_v19 }
 0xb49   :  { %6732 = vmatprep.mubr.msk.bf16.mxu1 %vm7595_vm0, %v7594_v1 }
 0xbfb   :  { %v1720_v52 = vpop.f32.mrb[44].mxu1 }
 0xbfc   :  { %v8107_v53 = vadd.f32 %v1720_v52, %v8020_v20  ;;  %v6674_v54 = vpop.f32.mrb[45].mxu1  ;;  %v7232_v20 = vld [vmem:[%s7638_s29 + $0xc0] sm:$0xff]  }
 0xbfd   :  { %v1723_v55 = vpop.f32.mrb[46].mxu1  ;;  %6717 = vmatpush3.bf16.msra.mxu1 %v7232_v20  ;;  %v7531_v20 = vld [vmem:[%s7608_s5 + $0x8] sm:$0xff] }
 0xbfe   :  { %v8110_v56 = vadd.f32 %v1723_v55, %v8022_v23  ;;  %v6675_v57 = vpop.f32.mrb[47].mxu1  ;;  %v7233_v23 = vld [vmem:[%s7638_s29 + $0xc8] sm:$0xff]   ;;  %6718 = vmatprep.subr.bf16.mxu1 %v7594_v1  ;;  %v5733_v55 = vld [vmem:[%s7653_s14] ss:$0 sm:$0xff]  ;;  %s8679_s29 = sld [smem:[#allocation13_spill]]  ;;  %s8682_s14 = sld [smem:[#allocation14_spill]] }
 0xc01   :  { %6719 = vmatpush3.bf16.msra.mxu1 %v7233_v23 }
 0xc02   :  { %6720 = vmatprep.subr.bf16.mxu1 %v7594_v1 }
 0xc05   :  { %6721 = vmatpush3.bf16.msra.mxu1 %v7234_v3  ;;  %v7242_v3 = vld [vmem:[%s7668_s30] ss:$8 sps:$4 sm:$0xff]  }
 0xc06   :  { %6722 = vmatprep.subr.bf16.mxu1 %v7594_v1 }
 0xc09   :  { %6723 = vmatpush3.bf16.msra.mxu1 %v7235_v4  ;;  %v7244_v4 = vld [vmem:[%s7668_s30 + $0x4] ss:$8 sps:$4 sm:$0xff]  }
 0xc0a   :  { %6724 = vmatprep.subr.bf16.mxu1 %v7594_v1 }
 0xc0d   :  { %6725 = vmatpush3.bf16.msra.mxu1 %v7236_v5  ;;  %v7247_v5 = vld [vmem:[%s7668_s30 + $0x14] ss:$8 sps:$4 sm:$0xff]  }
 0xc0e   :  { %6726 = vmatprep.subr.bf16.mxu1 %v7594_v1 }
 0xc11   :  { %6727 = vmatpush3.bf16.msra.mxu1 %v7237_v6 }
 0xc12   :  { %6728 = vmatprep.subr.bf16.mxu1 %v7594_v1 }
 0xc15   :  { %6729 = vmatpush3.bf16.msra.mxu1 %v7238_v7 }
 0xc16   :  { %6730 = vmatprep.subr.bf16.mxu1 %v7594_v1 }
 0xc19   :  { %6731 = vmatpush3.bf16.msra.mxu1 %v7239_v8 }
 0xc1b   :  { %v1836_v59 = vpop.f32.mrb[48].mxu1 }
 0xc1c   :  { %v6694_v60 = vpop.f32.mrb[49].mxu1  ;;  %v1837_v62 = vadd.f32 %v5663_v58, %v1836_v59  ;;  %6733 = vmatmul.mubr.bf16.vlgmr.msra.gmra.mrb[52].mxu1 %v7827_v19 }
 0xc1d   :  { %v1839_v61 = vpop.f32.mrb[50].mxu1 }
 0xc1e   :  { %v1840_v63 = vadd.f32 %v5663_v58, %v1839_v61  ;;  %v6695_v0 = vpop.f32.mrb[51].mxu1 }
 0xc1f   :  { %v7530_v0 = vld [vmem:[%s7608_s5] sm:$0xff]  ;;  %s8674_s5 = sld [smem:[#allocation6_spill]] }
 0xc20   :  { %v2071_v2 = vpack.c.bf16 %v1840_v63, %v1837_v62 }
 0xc22   :  { %6739 = vmatmul.mubr.msk.bf16.vlgmr.msra.gmra.mrb[28].mxu0 %vm495_vm1, %v2071_v2 }
 0xc23   :  { %6744 = vmatprep.mubr.msk.bf16.mxu0 %vm7595_vm0, %v7594_v1 }
 0xcef   :  { %v2064_v29 = vpop.f32.mrb[52].mxu1 }
 0xcf0   :  { %v6734_v30 = vpop.f32.mrb[53].mxu1  ;;  %v2065_v34 = vadd.f32 %v5715_v32, %v2064_v29 }
 0xcf1   :  { %v2067_v31 = vpop.f32.mrb[54].mxu1 }
 0xcf2   :  { %v6735_v33 = vpop.f32.mrb[55].mxu1  ;;  %v2068_v35 = vadd.f32 %v5715_v32, %v2067_v31 }
 0xcf3   :  { %v5734_v33 = vld [vmem:[%s7658_s19] ss:$0 sm:$0xff]  ;;  %s8684_s19 = sld [smem:[#allocation16_spill]] }
 0xcf4   :  { %v2147_v36 = vpack.c.bf16 %v2068_v35, %v2065_v34 }
 0xcf5   :  { %v2113_v9 = vpop.f32.mrb[28].mxu0 }
 0xcf6   :  { %v2120_v10 = vmul.f32 0.17677669, %v2113_v9  ;;  %v6740_v11 = vpop.f32.mrb[29].mxu0  ;;  %6743 = vmatpush3.bf16.msra.mxu0 %v2147_v36 }
 0xcf7   :  { %v2116_v12 = vpop.f32.mrb[30].mxu0  ;;  %6748 = vmatprep.subr.bf16.mxu0 %v7594_v1 }
 0xcf8   :  { %v2121_v13 = vmul.f32 0.17677669, %v2116_v12  ;;  %v6741_v14 = vpop.f32.mrb[31].mxu0  ;;  %v2122_v15 = vadd.f32 %v2120_v10, %v7865_v46 }
 0xcf9   :  { %v7248_v14 = vld [vmem:[%s7668_s30 + $0x20] ss:$8 sps:$4 sm:$0xff]  }
 0xcfa   :  { %v2124_v16 = vsel %vm547_vm2, %v2122_v15, -inf  ;;  %v2123_v17 = vadd.f32 %v2121_v13, %v7868_v50  ;;  %v7250_v13 = vld [vmem:[%s7668_s30 + $0x24] ss:$8 sps:$4 sm:$0xff]  }
 0xcfb   :  { %2125 = vmax.xlane.f32.xlu0 %v2124_v16  ;;  %v7251_v16 = vld [vmem:[%s7668_s30 + $0x30] ss:$8 sps:$4 sm:$0xff]  }
 0xcfc   :  { %v2127_v18 = vsel %vm547_vm2, %v2123_v17, -inf }
 0xcfd   :  { %2128 = vmax.xlane.f32.xlu1 %v2127_v18  ;;  %v7254_v18 = vld [vmem:[%s7668_s30 + $0x40] ss:$8 sps:$4 sm:$0xff]  }
 0xd88   :  { %v2126_v21 = vpop.xlane.xlu0 %2125 }
 0xd89   :  { %v2130_v22 = vsub.f32 %v2122_v15, %v2126_v21  ;;  %v7253_v15 = vld [vmem:[%s7668_s30 + $0x34] ss:$8 sps:$4 sm:$0xff]  }
 0xd8a   :  { %v2129_v19 = vpop.xlane.xlu1 %2128  ;;  %v7259_v21 = vld [vmem:[%s7668_s30 + $0x54] ss:$8 sps:$4 sm:$0xff]  }
 0xd8b   :  { %v2132_v24 = vmul.f32 1.442695, %v2130_v22  ;;  %v2131_v25 = vsub.f32 %v2123_v17, %v2129_v19  ;;  %v7256_v17 = vld [vmem:[%s7668_s30 + $0x44] ss:$8 sps:$4 sm:$0xff]   ;;  %v7257_v22 = vld [vmem:[%s7668_s30 + $0x50] ss:$8 sps:$4 sm:$0xff]  }
 0xd8c   :  { %v7262_v19 = vld [vmem:[%s7668_s30 + $0x64] ss:$8 sps:$4 sm:$0xff]  }
 0xd8d   :  { %7458 = vpow2.f32 %v2132_v24  ;;  %v2134_v26 = vmul.f32 1.442695, %v2131_v25  ;;  %v7260_v24 = vld [vmem:[%s7668_s30 + $0x60] ss:$8 sps:$4 sm:$0xff]   ;;  %v7265_v25 = vld [vmem:[%s7668_s30 + $0x74] ss:$8 sps:$4 sm:$0xff]  }
 0xd8f   :  { %7460 = vpow2.f32 %v2134_v26  ;;  %v7263_v26 = vld [vmem:[%s7668_s30 + $0x70] ss:$8 sps:$4 sm:$0xff]  }
 0xd97   :  { %v7459_v27 = vpop.eup %7458 }
 0xd98   :  { %v2136_v46 = vsel %vm547_vm2, %v7459_v27, 0.0 }
 0xd99   :  { %v7461_v28 = vpop.eup %7460  ;;  %2137 = vadd.xlane.f32.xlu0 %v2136_v46 }
 0xd9a   :  { %v2139_v50 = vsel %vm547_vm2, %v7461_v28, 0.0 }
 0xd9b   :  { %2140 = vadd.xlane.f32.xlu1 %v2139_v50 }
 0xe26   :  { %v2138_v37 = vpop.xlane.xlu0 %2137 }
 0xe27   :  { %7462 = vrcp.f32 %v2138_v37 }
 0xe28   :  { %v2141_v38 = vpop.xlane.xlu1 %2140 }
 0xe29   :  { %7464 = vrcp.f32 %v2141_v38  ;;  %v5735_v38 = vld [vmem:[%s7663_s24] ss:$0 sm:$0xff]  ;;  %s8685_s24 = sld [smem:[#allocation19_spill]] }
 0xe31   :  { %v7463_v39 = vpop.eup %7462 }
 0xe32   :  { %v2144_v41 = vmul.f32 %v7463_v39, %v7459_v27  ;;  %v7596_v27 = vmov 0  }
 0xe33   :  { %v7465_v40 = vpop.eup %7464 }
 0xe34   :  { %v2145_v42 = vmul.f32 %v7465_v40, %v7461_v28 }
 0xe36   :  { %v2146_v44 = vpack.c.bf16 %v2145_v42, %v2144_v41 }
 0xe38   :  { %6745 = vmatmul.mubr.msk.bf16.vlgmr.msra.gmra.mrb[32].mxu0 %vm547_vm2, %v2146_v44  ;;  %v7267_v44 = vld [vmem:[%s7678_s12] sm:$0xff]  }
 0xe39   :  { %6749 = vmatpush3.bf16.msra.mxu0 %v7240_v43  ;;  %6752 = vmatprep.mubr.msk.bf16.mxu0 %vm7595_vm0, %v7594_v1  ;;  %v7266_v43 = vld [vmem:[%s7678_s12 + $0x40] sm:$0xff]  }
 0xe3a   :  { %6750 = vmatprep.subr.bf16.mxu0 %v7594_v1  ;;  %6247 = vmatprep.subr.bf16.mxu1 %v7266_v43 }
 0xe3b   :  { %6248 = vmatpush3.bf16.msra.mxu1 %v7267_v44 }
 0xe3d   :  { %6751 = vmatpush3.bf16.msra.mxu0 %v7241_v45  ;;  %v7268_v45 = vld [vmem:[%s7678_s12 + $0x48] sm:$0xff]  }
 0xe3e   :  { %2417 = vmatprep.subr.bf16.mxu0 %v7244_v4  ;;  %6249 = vmatprep.subr.bf16.mxu1 %v7268_v45 }
 0xf0b   :  { %v2185_v47 = vpop.f32.mrb[32].mxu0 }
 0xf0c   :  { %v6746_v48 = vpop.f32.mrb[33].mxu0 }
 0xf0d   :  { %v2188_v49 = vpop.f32.mrb[34].mxu0  ;;  %v7270_v48 = vld [vmem:[%s7678_s12 + $0x50] sm:$0xff]  }
 0xf0e   :  { %v2192_v51 = vpack.c.bf16 %v2188_v49, %v2185_v47  ;;  %v6747_v52 = vpop.f32.mrb[35].mxu0  ;;  %v7269_v47 = vld [vmem:[%s7678_s12 + $0x8] sm:$0xff]   ;;  %v7271_v49 = vld [vmem:[%s7678_s12 + $0x10] sm:$0xff]  }
 0xf0f   :  { %6250 = vmatpush3.bf16.msra.mxu1 %v7269_v47  ;;  %v7273_v52 = vld [vmem:[%s7678_s12 + $0x18] sm:$0xff]  }
 0xf10   :  { %6753 = vmatmul.mubr.msk.bf16.vlgmr.msra.gmra.mrb[36].mxu0 %vm495_vm1, %v2192_v51  ;;  %6251 = vmatprep.subr.bf16.mxu1 %v7270_v48  ;;  %v7272_v51 = vld [vmem:[%s7678_s12 + $0x58] sm:$0xff]  }
 0xf11   :  { %2418 = vmatpush1.bf16.msra.mxu0 %v7242_v3  ;;  %2449 = vmatprep.mubr.bf16.mxu0 %v7596_v27 }
 0xf12   :  { %2419 = vmatprep.subr.bf16.mxu0 %v7247_v5 }
 0xf13   :  { %6252 = vmatpush3.bf16.msra.mxu1 %v7271_v49 }
 0xf14   :  { %6253 = vmatprep.subr.bf16.mxu1 %v7272_v51 }
 0xf17   :  { %6254 = vmatpush3.bf16.msra.mxu1 %v7273_v52 }
 0xfe3   :  { %v2247_v54 = vpop.f32.mrb[36].mxu0 }
 0xfe4   :  { %v2254_v57 = vadd.f32 %v2247_v54, %v8107_v53  ;;  %v6754_v58 = vpop.f32.mrb[37].mxu0  ;;  %v7245_v53 = vld [vmem:[%s7668_s30 + $0x10] ss:$8 sps:$4 sm:$0xff]   ;;  %v7274_v54 = vld [vmem:[%s7678_s12 + $0x60] sm:$0xff]   ;;  %s8686_s30 = sld [smem:[#allocation17_spill]] }
 0xfe5   :  { %v2250_v59 = vpop.f32.mrb[38].mxu0  ;;  %2420 = vmatpush1.bf16.msra.mxu0 %v7245_v53  ;;  %6255 = vmatprep.subr.bf16.mxu1 %v7274_v54  ;;  %v7277_v58 = vld [vmem:[%s7678_s12 + $0x28] sm:$0xff]  }
 0xfe6   :  { %v2263_v60 = vadd.f32 %v5733_v55, %v2254_v57  ;;  %v2255_v61 = vadd.f32 %v2250_v59, %v8110_v56  ;;  %v6755_v62 = vpop.f32.mrb[39].mxu0  ;;  %2421 = vmatprep.subr.bf16.mxu0 %v7250_v13  ;;  %v7276_v57 = vld [vmem:[%s7678_s12 + $0x68] sm:$0xff]   ;;  %v7278_v59 = vld [vmem:[%s7678_s12 + $0x70] sm:$0xff]  }
 0xfe7   :  { %v7281_v62 = vld [vmem:[%s7678_s12 + $0x38] sm:$0xff]  }
 0xfe8   :  { %v2264_v63 = vadd.f32 %v5733_v55, %v2255_v61  ;;  %v2265_v2 = vadd.f32 %v7530_v0, %v2263_v60  ;;  %v7275_v55 = vld [vmem:[%s7678_s12 + $0x20] sm:$0xff]   ;;  %v7279_v60 = vld [vmem:[%s7678_s12 + $0x30] sm:$0xff]   ;;  %v7280_v61 = vld [vmem:[%s7678_s12 + $0x78] sm:$0xff]   ;;  %s8687_s12 = sld [smem:[#allocation18_spill]] }
 0xfe9   :  { %2422 = vmatpush1.bf16.msra.mxu0 %v7248_v14  ;;  %6256 = vmatpush3.bf16.msra.mxu1 %v7275_v55 }
 0xfea   :  { %2269 = vadd.xlane.f32.xlu0 %v2265_v2  ;;  %v2266_v23 = vadd.f32 %v7531_v20, %v2264_v63  ;;  %2423 = vmatprep.subr.bf16.mxu0 %v7253_v15  ;;  %v2327_v63 = vlaneseq  ;;  %v2325_v20 = vld [vmem:[%s8673_s0] sm:$0x3] }
 0xfeb   :  { %6257 = vmatprep.subr.bf16.mxu1 %v7276_v57  ;;  %v5752_v57 = vld [vmem:[%s8674_s5] ss:$0 sm:$0xff] }
 0xfec   :  { %2271 = vadd.xlane.f32.xlu1 %v2266_v23  ;;  %v8197_v0 = vshrl.u32 %v2327_v63, 7 }
 0xfed   :  { %2424 = vmatpush1.bf16.msra.mxu0 %v7251_v16  ;;  %6258 = vmatpush3.bf16.msra.mxu1 %v7277_v58 }
 0xfee   :  { %2425 = vmatprep.subr.bf16.mxu0 %v7256_v17  ;;  %6259 = vmatprep.subr.bf16.mxu1 %v7278_v59 }
 0xff1   :  { %2426 = vmatpush1.bf16.msra.mxu0 %v7254_v18  ;;  %6260 = vmatpush3.bf16.msra.mxu1 %v7279_v60 }
 0xff2   :  { %2427 = vmatprep.subr.bf16.mxu0 %v7259_v21  ;;  %6261 = vmatprep.subr.bf16.mxu1 %v7280_v61 }
 0xff5   :  { %2428 = vmatpush1.bf16.msra.mxu0 %v7257_v22  ;;  %6262 = vmatpush3.bf16.msra.mxu1 %v7281_v62 }
 0xff6   :  { %2429 = vmatprep.subr.bf16.mxu0 %v7262_v19  ;;  %6776 = vmatprep.subr.bf16.mxu1 %v7594_v1 }
 0xff9   :  { %2430 = vmatpush1.bf16.msra.mxu0 %v7260_v24 }
 0xffa   :  { %2431 = vmatprep.subr.bf16.mxu0 %v7265_v25 }
 0xffd   :  { %2432 = vmatpush1.bf16.msra.mxu0 %v7263_v26 }
 0xffe   :  { %6756 = vmatprep.subr.bf16.mxu0 %v7594_v1 }
0x1077   :  { %v2270_v56 = vpop.xlane.xlu0 %2269 }
0x1078   :  { %v2274_v6 = vmul.f32 0.0078125, %v2270_v56 }
0x1079   :  { %v2272_v7 = vpop.xlane.xlu1 %2271 }
0x107a   :  { %v2276_v8 = vsub.f32 %v2265_v2, %v2274_v6  ;;  %v2275_v9 = vmul.f32 0.0078125, %v2272_v7  ;;  %v2329_v2 = vsub.s32 0, %v8197_v0 }
0x107c   :  { %v2277_v10 = vsub.f32 %v2266_v23, %v2275_v9  ;;  %v2278_v11 = vmul.f32 %v2276_v8, %v2276_v8  ;;  %v2333_v23 = vsub.s32 1, %v8197_v0  ;;  %v2330_v3 = vrot.slane %v2325_v20, %v2329_v2 }
0x107e   :  { %2280 = vadd.xlane.f32.xlu0 %v2278_v11  ;;  %v2279_v12 = vmul.f32 %v2277_v10, %v2277_v10  ;;  %v2334_v4 = vrot.slane %v2325_v20, %v2333_v23 }
0x1080   :  { %2282 = vadd.xlane.f32.xlu1 %v2279_v12 }
0x110b   :  { %v2281_v46 = vpop.xlane.xlu0 %2280 }
0x110c   :  { %v2284_v28 = vmul.f32 0.0078125, %v2281_v46 }
0x110d   :  { %v2283_v50 = vpop.xlane.xlu1 %2282 }
0x110e   :  { %v2286_v29 = vadd.f32 1e-12, %v2284_v28  ;;  %v2285_v30 = vmul.f32 0.0078125, %v2283_v50 }
0x1110   :  { %7466 = vrsqrt.f32 %v2286_v29  ;;  %v2287_v31 = vadd.f32 1e-12, %v2285_v30 }
0x1112   :  { %7468 = vrsqrt.f32 %v2287_v31 }
0x111a   :  { %v7467_v32 = vpop.eup %7466 }
0x111b   :  { %v2290_v34 = vmul.f32 %v7467_v32, %v2276_v8 }
0x111c   :  { %v7469_v35 = vpop.eup %7468 }
0x111d   :  { %v2291_v36 = vmul.f32 %v7469_v35, %v2277_v10  ;;  %v2298_v37 = vmul.f32 %v5734_v33, %v2290_v34 }
0x111f   :  { %v2299_v39 = vmul.f32 %v5734_v33, %v2291_v36  ;;  %v8172_v40 = vadd.f32 %v5735_v38, %v2298_v37 }
0x1121   :  { %v8174_v41 = vadd.f32 %v5735_v38, %v2299_v39 }
0x1123   :  { %v2308_v42 = vpack.c.bf16 %v8174_v41, %v8172_v40 }
0x1125   :  { %2450 = vmatmul.mubr.bf16.vlgmr.msra.gmra.mrb[40].mxu0 %v2308_v42 }
0x1126   :  { %6772 = vmatprep.mubr.msk.bf16.mxu0 %vm7595_vm0, %v7594_v1 }
0x11f8   :  { %v2451_v5 = vpop.f32.mrb[40].mxu0 }
0x11f9   :  { %v2452_v53 = vadd.f32 %v2451_v5, %v2330_v3  ;;  %v2453_v56 = vpop.f32.mrb[41].mxu0  ;;  %v7282_v5 = vld [vmem:[%s8675_s13] sm:$0xff]  }
0x11fa   :  { %v2454_v6 = vadd.f32 %v2453_v56, %v2334_v4  ;;  %v2455_v7 = vpop.f32.mrb[42].mxu0  ;;  %6757 = vmatpush3.bf16.msra.mxu0 %v7282_v5  ;;  %v7284_v56 = vld [vmem:[%s8675_s13 + $0x8] sm:$0xff]   ;;  %v5780_v5 = vld [vmem:[%s8681_s8] ss:$0 sm:$0xff] }
0x11fb   :  { %v2464_v8 = vmul.f32 0.044715, %v2452_v53  ;;  %v2456_v9 = vadd.f32 %v2455_v7, %v2330_v3  ;;  %v2457_v10 = vpop.f32.mrb[43].mxu0  ;;  %v2460_v38 = vmul.f32 0.5, %v2452_v53  ;;  %6758 = vmatprep.subr.bf16.mxu0 %v7594_v1 }
0x11fc   :  { %v2465_v11 = vmul.f32 0.044715, %v2454_v6  ;;  %v2458_v12 = vadd.f32 %v2457_v10, %v2334_v4  ;;  %v2461_v43 = vmul.f32 0.5, %v2454_v6 }
0x11fd   :  { %v2468_v13 = vmul.f32 %v2464_v8, %v2452_v53  ;;  %v2466_v14 = vmul.f32 0.044715, %v2456_v9  ;;  %v2462_v39 = vmul.f32 0.5, %v2456_v9 }
0x11fe   :  { %v2469_v15 = vmul.f32 %v2465_v11, %v2454_v6  ;;  %v2467_v16 = vmul.f32 0.044715, %v2458_v12  ;;  %v2463_v44 = vmul.f32 0.5, %v2458_v12  ;;  %6759 = vmatpush3.bf16.msra.mxu0 %v7284_v56 }
0x11ff   :  { %v2472_v17 = vmul.f32 %v2468_v13, %v2452_v53  ;;  %v2470_v18 = vmul.f32 %v2466_v14, %v2456_v9  ;;  %6760 = vmatprep.subr.bf16.mxu0 %v7594_v1  ;;  %v7286_v13 = vld [vmem:[%s8675_s13 + $0x10] sm:$0xff]  }
0x1200   :  { %v2473_v21 = vmul.f32 %v2469_v15, %v2454_v6  ;;  %v2471_v22 = vmul.f32 %v2467_v16, %v2458_v12  ;;  %v7287_v14 = vld [vmem:[%s8676_s17 + $0x10] sm:$0xff]   ;;  %v7288_v15 = vld [vmem:[%s8675_s13 + $0x18] sm:$0xff]  }
0x1201   :  { %v2476_v19 = vadd.f32 %v2472_v17, %v2452_v53  ;;  %v2474_v24 = vmul.f32 %v2470_v18, %v2456_v9  ;;  %v7283_v53 = vld [vmem:[%s8676_s17] sm:$0xff]   ;;  %v7289_v16 = vld [vmem:[%s8676_s17 + $0x18] sm:$0xff]  }
0x1202   :  { %v2475_v25 = vmul.f32 %v2471_v22, %v2458_v12  ;;  %v2477_v26 = vadd.f32 %v2473_v21, %v2454_v6  ;;  %v7285_v6 = vld [vmem:[%s8676_s17 + $0x8] sm:$0xff]   ;;  %6761 = vmatpush3.bf16.msra.mxu0 %v7286_v13  ;;  %v7290_v17 = vld [vmem:[%s8675_s13 + $0x20] sm:$0xff]  }
0x1203   :  { %v2480_v46 = vmul.f32 0.7978846, %v2476_v19  ;;  %v2478_v28 = vadd.f32 %v2474_v24, %v2456_v9  ;;  %6762 = vmatprep.subr.bf16.mxu0 %v7594_v1  ;;  %v7291_v18 = vld [vmem:[%s8676_s17 + $0x20] sm:$0xff]   ;;  %v7292_v21 = vld [vmem:[%s8675_s13 + $0x28] sm:$0xff]   ;;  %v7294_v19 = vld [vmem:[%s8675_s13 + $0x30] sm:$0xff]  }
0x1204   :  { %v2479_v50 = vadd.f32 %v2475_v25, %v2458_v12  ;;  %v2481_v29 = vmul.f32 0.7978846, %v2477_v26  ;;  %v7293_v22 = vld [vmem:[%s8676_s17 + $0x28] sm:$0xff]   ;;  %v7295_v24 = vld [vmem:[%s8676_s17 + $0x30] sm:$0xff]   ;;  %v7296_v25 = vld [vmem:[%s8675_s13 + $0x38] sm:$0xff]  }
0x1205   :  { %7470 = vtanh.f32 %v2480_v46  ;;  %v2482_v30 = vmul.f32 0.7978846, %v2478_v28  ;;  %v7297_v26 = vld [vmem:[%s8676_s17 + $0x38] sm:$0xff]  }
0x1206   :  { %v2483_v31 = vmul.f32 0.7978846, %v2479_v50  ;;  %7472 = vtanh.f32 %v2481_v29  ;;  %6763 = vmatpush3.bf16.msra.mxu0 %v7288_v15 }
0x1207   :  { %7474 = vtanh.f32 %v2482_v30  ;;  %6764 = vmatprep.subr.bf16.mxu0 %v7594_v1 }
0x1208   :  { %7476 = vtanh.f32 %v2483_v31 }
0x120a   :  { %6765 = vmatpush3.bf16.msra.mxu0 %v7290_v17 }
0x120b   :  { %6766 = vmatprep.subr.bf16.mxu0 %v7594_v1 }
0x120e   :  { %6767 = vmatpush3.bf16.msra.mxu0 %v7292_v21 }
0x120f   :  { %v7471_v32 = vpop.eup %7470  ;;  %6768 = vmatprep.subr.bf16.mxu0 %v7594_v1 }
0x1210   :  { %v7473_v33 = vpop.eup %7472  ;;  %v2488_v34 = vadd.f32 1.0, %v7471_v32 }
0x1211   :  { %v7475_v35 = vpop.eup %7474  ;;  %v2489_v36 = vadd.f32 1.0, %v7473_v33  ;;  %v5769_v33 = vld [vmem:[%s8677_s21] ss:$0 sm:$0xff] }
0x1212   :  { %v7477_v37 = vpop.eup %7476  ;;  %v2490_v42 = vadd.f32 1.0, %v7475_v35  ;;  %v2492_v47 = vmul.f32 %v2488_v34, %v2460_v38  ;;  %6769 = vmatpush3.bf16.msra.mxu0 %v7294_v19  ;;  %v5770_v38 = vld [vmem:[%s8678_s25] ss:$0 sm:$0xff] }
0x1213   :  { %v2491_v45 = vadd.f32 1.0, %v7477_v37  ;;  %v2493_v49 = vmul.f32 %v2489_v36, %v2461_v43  ;;  %6770 = vmatprep.subr.bf16.mxu0 %v7594_v1 }
0x1214   :  { %v2494_v48 = vmul.f32 %v2490_v42, %v2462_v39 }
0x1215   :  { %v2495_v51 = vmul.f32 %v2491_v45, %v2463_v44  ;;  %v7298_v44 = vld [vmem:[%s8679_s29] sm:$0xff]  }
0x1216   :  { %v2496_v52 = vpack.c.bf16 %v2494_v48, %v2492_v47  ;;  %6771 = vmatpush3.bf16.msra.mxu0 %v7296_v25  ;;  %v7299_v47 = vld [vmem:[%s8679_s29 + $0x8] sm:$0xff]   ;;  %v7300_v48 = vld [vmem:[%s8679_s29 + $0x10] sm:$0xff]  }
0x1217   :  { %v2497_v54 = vpack.c.bf16 %v2495_v51, %v2493_v49  ;;  %6796 = vmatprep.subr.bf16.mxu0 %v7594_v1  ;;  %v7301_v49 = vld [vmem:[%s8679_s29 + $0x18] sm:$0xff]   ;;  %v7302_v51 = vld [vmem:[%s8679_s29 + $0x20] sm:$0xff]  }
0x1219   :  { %2665 = vmatprep.mubr.bf16.mxu1 %v2497_v54  ;;  %v7304_v54 = vld [vmem:[%s8679_s29 + $0x30] sm:$0xff]  }
0x121a   :  { %2666 = vmatmul.mubr.bf16.vlgmr.msra.gmra.mrb[56].mxu1 %v2496_v52  ;;  %v7303_v52 = vld [vmem:[%s8679_s29 + $0x28] sm:$0xff]  }
0x121b   :  { %6792 = vmatprep.mubr.msk.bf16.mxu1 %vm7595_vm0, %v7594_v1  ;;  %6777 = vmatpush3.bf16.msra.mxu1 %v7283_v53 }
0x121c   :  { %6778 = vmatprep.subr.bf16.mxu1 %v7594_v1 }
0x121f   :  { %6779 = vmatpush3.bf16.msra.mxu1 %v7285_v6 }
0x1220   :  { %6780 = vmatprep.subr.bf16.mxu1 %v7594_v1 }
0x1223   :  { %6781 = vmatpush3.bf16.msra.mxu1 %v7287_v14 }
0x1224   :  { %6782 = vmatprep.subr.bf16.mxu1 %v7594_v1 }
0x1227   :  { %6783 = vmatpush3.bf16.msra.mxu1 %v7289_v16  ;;  %v5789_v16 = vld [vmem:[%s8682_s14] ss:$0 sm:$0xff] }
0x1228   :  { %6784 = vmatprep.subr.bf16.mxu1 %v7594_v1 }
0x122b   :  { %6785 = vmatpush3.bf16.msra.mxu1 %v7291_v18 }
0x122c   :  { %6786 = vmatprep.subr.bf16.mxu1 %v7594_v1 }
0x122f   :  { %6787 = vmatpush3.bf16.msra.mxu1 %v7293_v22 }
0x1230   :  { %6788 = vmatprep.subr.bf16.mxu1 %v7594_v1 }
0x1233   :  { %6789 = vmatpush3.bf16.msra.mxu1 %v7295_v24 }
0x1234   :  { %6790 = vmatprep.subr.bf16.mxu1 %v7594_v1 }
0x1237   :  { %6791 = vmatpush3.bf16.msra.mxu1 %v7297_v26  ;;  %v5843_v26 = vld [vmem:[%s8681_s8 + $0x1] ss:$0 sm:$0xff] }
0x1238   :  { %6816 = vmatprep.subr.bf16.mxu1 %v7594_v1 }
0x12ed   :  { %v6263_v55 = vpop.f32.mrb[56].mxu1 }
0x12ee   :  { %v6264_v58 = vpop.f32.mrb[57].mxu1 }
0x12ef   :  { %v6265_v59 = vadd.f32 %v6264_v58, %v6263_v55  ;;  %v6266_v60 = vpop.f32.mrb[58].mxu1  ;;  %v7305_v55 = vld [vmem:[%s8679_s29 + $0x38] sm:$0xff]   ;;  %v7307_v58 = vld [vmem:[%s8676_s17 + $0x48] sm:$0xff]  }
0x12f0   :  { %v6267_v61 = vpop.f32.mrb[59].mxu1 }
0x12f1   :  { %v2668_v62 = vadd.f32 %v6265_v59, %v5752_v57  ;;  %v6268_v63 = vadd.f32 %v6267_v61, %v6266_v60  ;;  %v7308_v59 = vld [vmem:[%s8676_s17 + $0x50] sm:$0xff]   ;;  %v7309_v60 = vld [vmem:[%s8676_s17 + $0x58] sm:$0xff]   ;;  %v7310_v61 = vld [vmem:[%s8676_s17 + $0x60] sm:$0xff]  }
0x12f3   :  { %v2671_v20 = vadd.f32 %v6268_v63, %v5752_v57  ;;  %v2674_v3 = vadd.f32 %v2668_v62, %v8172_v40  ;;  %v7306_v57 = vld [vmem:[%s8676_s17 + $0x40] sm:$0xff]   ;;  %v7311_v62 = vld [vmem:[%s8676_s17 + $0x68] sm:$0xff]   ;;  %v7312_v63 = vld [vmem:[%s8676_s17 + $0x70] sm:$0xff]  }
0x12f5   :  { %2678 = vadd.xlane.f32.xlu0 %v2674_v3  ;;  %v2675_v4 = vadd.f32 %v2671_v20, %v8174_v41  ;;  %v7313_v20 = vld [vmem:[%s8676_s17 + $0x78] sm:$0xff]  }
0x12f7   :  { %2680 = vadd.xlane.f32.xlu1 %v2675_v4 }
0x1382   :  { %v2679_v40 = vpop.xlane.xlu0 %2678 }
0x1383   :  { %v2682_v41 = vmul.f32 0.0078125, %v2679_v40 }
0x1384   :  { %v2681_v7 = vpop.xlane.xlu1 %2680 }
0x1385   :  { %v2684_v8 = vsub.f32 %v2674_v3, %v2682_v41  ;;  %v2683_v9 = vmul.f32 0.0078125, %v2681_v7  ;;  %v5771_v3 = vld [vmem:[%s8680_s3] ss:$0 sm:$0xff] }
0x1387   :  { %v2685_v10 = vsub.f32 %v2675_v4, %v2683_v9  ;;  %v2686_v11 = vmul.f32 %v2684_v8, %v2684_v8 }
0x1389   :  { %2688 = vadd.xlane.f32.xlu0 %v2686_v11  ;;  %v2687_v12 = vmul.f32 %v2685_v10, %v2685_v10 }
0x138b   :  { %2690 = vadd.xlane.f32.xlu1 %v2687_v12 }
0x1416   :  { %v2689_v46 = vpop.xlane.xlu0 %2688 }
0x1417   :  { %v2692_v28 = vmul.f32 0.0078125, %v2689_v46 }
0x1418   :  { %v2691_v50 = vpop.xlane.xlu1 %2690 }
0x1419   :  { %v2694_v29 = vadd.f32 1e-12, %v2692_v28  ;;  %v2693_v30 = vmul.f32 0.0078125, %v2691_v50 }
0x141b   :  { %7478 = vrsqrt.f32 %v2694_v29  ;;  %v2695_v31 = vadd.f32 1e-12, %v2693_v30 }
0x141d   :  { %7480 = vrsqrt.f32 %v2695_v31 }
0x1425   :  { %v7479_v32 = vpop.eup %7478 }
0x1426   :  { %v2698_v34 = vmul.f32 %v7479_v32, %v2684_v8 }
0x1427   :  { %v7481_v35 = vpop.eup %7480 }
0x1428   :  { %v2706_v36 = vmul.f32 %v5769_v33, %v2698_v34  ;;  %v2699_v37 = vmul.f32 %v7481_v35, %v2685_v10 }
0x142a   :  { %v2707_v39 = vmul.f32 %v5769_v33, %v2699_v37  ;;  %v8245_v42 = vadd.f32 %v5770_v38, %v2706_v36 }
0x142c   :  { %v8247_v43 = vadd.f32 %v5770_v38, %v2707_v39 }
0x142e   :  { %v8252_v45 = vpack.c.bf16 %v8247_v43, %v8245_v42 }
0x1430   :  { %6773 = vmatmul.mubr.bf16.vlgmr.msra.gmra.mrb[44].mxu0 %v8252_v45  ;;  %6793 = vmatmul.mubr.bf16.vlgmr.msra.gmra.mrb[60].mxu1 %v8252_v45 }
0x1431   :  { %6797 = vmatpush3.bf16.msra.mxu0 %v7298_v44  ;;  %6812 = vmatprep.mubr.msk.bf16.mxu0 %vm7595_vm0, %v7594_v1  ;;  %v8310_v44 = vld [vmem:[%s7613_s9] sm:$0xff] }
0x1432   :  { %6798 = vmatprep.subr.bf16.mxu0 %v7594_v1  ;;  %6818 = vmatprep.mubr.msk.bf16.mxu1 %vm7595_vm0, %v7594_v1 }
0x1435   :  { %6799 = vmatpush3.bf16.msra.mxu0 %v7299_v47 }
0x1436   :  { %6800 = vmatprep.subr.bf16.mxu0 %v7594_v1 }
0x1439   :  { %6801 = vmatpush3.bf16.msra.mxu0 %v7300_v48 }
0x143a   :  { %6802 = vmatprep.subr.bf16.mxu0 %v7594_v1 }
0x143d   :  { %6803 = vmatpush3.bf16.msra.mxu0 %v7301_v49  ;;  %v8315_v49 = vld [vmem:[%s7613_s9 + $0x8] sm:$0xff]  ;;  %s8683_s9 = sld [smem:[#allocation15_spill]] }
0x143e   :  { %6804 = vmatprep.subr.bf16.mxu0 %v7594_v1 }
0x1441   :  { %6805 = vmatpush3.bf16.msra.mxu0 %v7302_v51 }
0x1442   :  { %6806 = vmatprep.subr.bf16.mxu0 %v7594_v1 }
0x1445   :  { %6807 = vmatpush3.bf16.msra.mxu0 %v7303_v52 }
0x1446   :  { %6808 = vmatprep.subr.bf16.mxu0 %v7594_v1 }
0x1449   :  { %6809 = vmatpush3.bf16.msra.mxu0 %v7304_v54 }
0x144a   :  { %6810 = vmatprep.subr.bf16.mxu0 %v7594_v1 }
0x144d   :  { %6811 = vmatpush3.bf16.msra.mxu0 %v7305_v55 }
0x144e   :  { %6848 = vmatprep.subr.bf16.mxu0 %v7594_v1 }
0x1450   :  { %6813 = vmatmul.mubr.bf16.vlgmr.msra.gmra.mrb[48].mxu0 %v8252_v45 }
0x1451   :  { %6849 = vmatpush3.bf16.msra.mxu0 %v7306_v57  ;;  %6864 = vmatprep.mubr.msk.bf16.mxu0 %vm7595_vm0, %v7594_v1 }
0x1452   :  { %6850 = vmatprep.subr.bf16.mxu0 %v7594_v1 }
0x1455   :  { %6851 = vmatpush3.bf16.msra.mxu0 %v7307_v58 }
0x1456   :  { %6852 = vmatprep.subr.bf16.mxu0 %v7594_v1 }
0x1459   :  { %6853 = vmatpush3.bf16.msra.mxu0 %v7308_v59 }
0x145a   :  { %6854 = vmatprep.subr.bf16.mxu0 %v7594_v1 }
0x145d   :  { %6855 = vmatpush3.bf16.msra.mxu0 %v7309_v60 }
0x145e   :  { %6856 = vmatprep.subr.bf16.mxu0 %v7594_v1 }
0x1461   :  { %6857 = vmatpush3.bf16.msra.mxu0 %v7310_v61 }
0x1462   :  { %6858 = vmatprep.subr.bf16.mxu0 %v7594_v1 }
0x1465   :  { %6859 = vmatpush3.bf16.msra.mxu0 %v7311_v62 }
0x1466   :  { %6860 = vmatprep.subr.bf16.mxu0 %v7594_v1 }
0x1469   :  { %6861 = vmatpush3.bf16.msra.mxu0 %v7312_v63 }
0x146a   :  { %6862 = vmatprep.subr.bf16.mxu0 %v7594_v1 }
0x146d   :  { %6863 = vmatpush3.bf16.msra.mxu0 %v7313_v20 }
0x146e   :  { %6888 = vmatprep.subr.bf16.mxu0 %v7594_v1 }
0x1470   :  { %6865 = vmatmul.mubr.bf16.vlgmr.msra.gmra.mrb[52].mxu0 %v8252_v45 }
0x1471   :  { %6890 = vmatprep.mubr.msk.bf16.mxu0 %vm7595_vm0, %v7594_v1 }
0x1503   :  { %v2822_v4 = vpop.f32.mrb[44].mxu0  ;;  %v2934_v53 = vpop.f32.mrb[60].mxu1 }
0x1504   :  { %v6774_v56 = vpop.f32.mrb[45].mxu0  ;;  %v6794_v6 = vpop.f32.mrb[61].mxu1  ;;  %v2823_v7 = vadd.f32 %v5771_v3, %v2822_v4  ;;  %v2935_v8 = vadd.f32 %v5780_v5, %v2934_v53 }
0x1505   :  { %v2825_v40 = vpop.f32.mrb[46].mxu0  ;;  %v2937_v41 = vpop.f32.mrb[62].mxu1 }
0x1506   :  { %v2826_v9 = vadd.f32 %v5771_v3, %v2825_v40  ;;  %v2938_v10 = vadd.f32 %v5780_v5, %v2937_v41  ;;  %v6775_v11 = vpop.f32.mrb[47].mxu0  ;;  %v6795_v12 = vpop.f32.mrb[63].mxu1  ;;  %v7314_v40 = vld [vmem:[%s8675_s13 + $0x40] sm:$0xff]  }
0x1507   :  { %v7319_v11 = vld [vmem:[%s8675_s13 + $0x68] sm:$0xff]   ;;  %v7320_v12 = vld [vmem:[%s8675_s13 + $0x70] sm:$0xff]  }
0x1508   :  { %v3053_v13 = vpack.c.bf16 %v2826_v9, %v2823_v7  ;;  %v3054_v14 = vpack.c.bf16 %v2938_v10, %v2935_v8  ;;  %v7315_v7 = vld [vmem:[%s8675_s13 + $0x48] sm:$0xff]   ;;  %v7316_v8 = vld [vmem:[%s8675_s13 + $0x50] sm:$0xff]   ;;  %v7317_v9 = vld [vmem:[%s8675_s13 + $0x58] sm:$0xff]  }
0x1509   :  { %v7318_v10 = vld [vmem:[%s8675_s13 + $0x60] sm:$0xff]  }
0x150a   :  { %v3059_v15 = vsel %vm495_vm1, %v3054_v14, 0  ;;  %v7322_v14 = vld [vmem:[%s8679_s29 + $0x40] sm:$0xff]  }
0x150b   :  { %6817 = vmatpush3.bf16.xpose.msra.mxu1 %v3059_v15  ;;  %v7323_v15 = vld [vmem:[%s8679_s29 + $0x48] sm:$0xff]  }
0x150c   :  { %6822 = vmatprep.subr.bf16.mxu1 %v7594_v1 }
0x1512   :  { %6819 = vmatmul.mubr.msk.bf16.vlgmr.msra.gmra.mrb[64].mxu1 %vm495_vm1, %v3053_v13  ;;  %v7321_v13 = vld [vmem:[%s8675_s13 + $0x78] sm:$0xff]  }
0x1513   :  { %6824 = vmatprep.mubr.msk.bf16.mxu1 %vm7595_vm0, %v7594_v1 }
0x1523   :  { %v3046_v17 = vpop.f32.mrb[48].mxu0 }
0x1524   :  { %v6814_v18 = vpop.f32.mrb[49].mxu0  ;;  %v3047_v22 = vadd.f32 %v5789_v16, %v3046_v17  ;;  %v7325_v17 = vld [vmem:[%s8679_s29 + $0x58] sm:$0xff]  }
0x1525   :  { %v3049_v21 = vpop.f32.mrb[50].mxu0  ;;  %v7326_v18 = vld [vmem:[%s8679_s29 + $0x60] sm:$0xff]  }
0x1526   :  { %v3050_v19 = vadd.f32 %v5789_v16, %v3049_v21  ;;  %v6815_v24 = vpop.f32.mrb[51].mxu0  ;;  %v7324_v16 = vld [vmem:[%s8679_s29 + $0x50] sm:$0xff]   ;;  %v7327_v21 = vld [vmem:[%s8679_s29 + $0x68] sm:$0xff]  }
0x1527   :  { %v7330_v24 = vld [vmem:[%s8683_s9] sm:$0xff]  }
0x1528   :  { %v3129_v25 = vpack.c.bf16 %v3050_v19, %v3047_v22  ;;  %v7328_v22 = vld [vmem:[%s8679_s29 + $0x70] sm:$0xff]   ;;  %v7329_v19 = vld [vmem:[%s8679_s29 + $0x78] sm:$0xff]  }
0x152a   :  { %6823 = vmatpush3.bf16.msra.mxu1 %v3129_v25  ;;  %v7331_v25 = vld [vmem:[%s8683_s9 + $0x8] sm:$0xff]  }
0x152b   :  { %6828 = vmatprep.subr.bf16.mxu1 %v7594_v1 }
0x1543   :  { %v3400_v46 = vpop.f32.mrb[52].mxu0 }
0x1544   :  { %v6866_v28 = vpop.f32.mrb[53].mxu0  ;;  %v3401_v29 = vadd.f32 %v5843_v26, %v3400_v46 }
0x1545   :  { %v3403_v50 = vpop.f32.mrb[54].mxu0 }
0x1546   :  { %v3404_v30 = vadd.f32 %v5843_v26, %v3403_v50  ;;  %v6867_v31 = vpop.f32.mrb[55].mxu0  ;;  %v7332_v50 = vld [vmem:[%s8676_s17 + $0x80] sm:$0xff]  }
0x1547   :  { %v7333_v31 = vld [vmem:[%s8676_s17 + $0x88] sm:$0xff]  }
0x1548   :  { %v3522_v32 = vpack.c.bf16 %v3404_v30, %v3401_v29 }
0x154a   :  { %v3527_v33 = vsel %vm495_vm1, %v3522_v32, 0  ;;  %v7334_v32 = vld [vmem:[%s8676_s17 + $0x90] sm:$0xff]  }
0x154b   :  { %6889 = vmatpush3.bf16.xpose.msra.mxu0 %v3527_v33  ;;  %v7335_v33 = vld [vmem:[%s8676_s17 + $0x98] sm:$0xff]  }
0x154c   :  { %6894 = vmatprep.subr.bf16.mxu0 %v7594_v1 }
0x15e5   :  { %v3095_v34 = vpop.f32.mrb[64].mxu1 }
0x15e6   :  { %v3102_v35 = vmul.f32 0.17677669, %v3095_v34  ;;  %v6820_v36 = vpop.f32.mrb[65].mxu1  ;;  %v7336_v34 = vld [vmem:[%s8676_s17 + $0xa0] sm:$0xff]  }
0x15e7   :  { %v3098_v37 = vpop.f32.mrb[66].mxu1  ;;  %v7338_v36 = vld [vmem:[%s8676_s17 + $0xb0] sm:$0xff]  }
0x15e8   :  { %v3103_v38 = vmul.f32 0.17677669, %v3098_v37  ;;  %v6821_v39 = vpop.f32.mrb[67].mxu1  ;;  %v3104_v47 = vadd.f32 %v8310_v44, %v3102_v35  ;;  %v7337_v35 = vld [vmem:[%s8676_s17 + $0xa8] sm:$0xff]   ;;  %v7339_v37 = vld [vmem:[%s8676_s17 + $0xb8] sm:$0xff]  }
0x15ea   :  { %v3106_v48 = vsel %vm547_vm2, %v3104_v47, -inf  ;;  %v3105_v51 = vadd.f32 %v8315_v49, %v3103_v38  ;;  %v5817_v38 = vld [vmem:[%s8680_s3 + $0x1] ss:$0 sm:$0xff] }
0x15eb   :  { %3107 = vmax.xlane.f32.xlu0 %v3106_v48 }
0x15ec   :  { %v3109_v52 = vsel %vm547_vm2, %v3105_v51, -inf }
0x15ed   :  { %3110 = vmax.xlane.f32.xlu1 %v3109_v52 }
0x1678   :  { %v3108_v54 = vpop.xlane.xlu0 %3107 }
0x1679   :  { %v3112_v55 = vsub.f32 %v3104_v47, %v3108_v54 }
0x167a   :  { %v3111_v57 = vpop.xlane.xlu1 %3110 }
0x167b   :  { %v3114_v58 = vmul.f32 1.442695, %v3112_v55  ;;  %v3113_v59 = vsub.f32 %v3105_v51, %v3111_v57  ;;  %v5869_v57 = vld [vmem:[%s8682_s14 + $0x1] ss:$0 sm:$0xff] }
0x167d   :  { %7482 = vpow2.f32 %v3114_v58  ;;  %v3116_v60 = vmul.f32 1.442695, %v3113_v59 }
0x167f   :  { %7484 = vpow2.f32 %v3116_v60 }
0x1687   :  { %v7483_v61 = vpop.eup %7482 }
0x1688   :  { %v3118_v62 = vsel %vm547_vm2, %v7483_v61, 0.0 }
0x1689   :  { %v7485_v63 = vpop.eup %7484  ;;  %3119 = vadd.xlane.f32.xlu0 %v3118_v62 }
0x168a   :  { %v3121_v20 = vsel %vm547_vm2, %v7485_v63, 0.0 }
0x168b   :  { %3122 = vadd.xlane.f32.xlu1 %v3121_v20 }
0x1716   :  { %v3120_v3 = vpop.xlane.xlu0 %3119 }
0x1717   :  { %7486 = vrcp.f32 %v3120_v3 }
0x1718   :  { %v3123_v4 = vpop.xlane.xlu1 %3122 }
0x1719   :  { %7488 = vrcp.f32 %v3123_v4 }
0x1721   :  { %v7487_v5 = vpop.eup %7486 }
0x1722   :  { %v3126_v56 = vmul.f32 %v7487_v5, %v7483_v61 }
0x1723   :  { %v7489_v53 = vpop.eup %7488 }
0x1724   :  { %v3127_v6 = vmul.f32 %v7489_v53, %v7485_v63 }
0x1726   :  { %v3128_v41 = vpack.c.bf16 %v3127_v6, %v3126_v56  ;;  %v5933_v56 = vld [vmem:[%s8681_s8 + $0x2] ss:$0 sm:$0xff] }
0x1728   :  { %6825 = vmatmul.mubr.msk.bf16.vlgmr.msra.gmra.mrb[68].mxu1 %vm547_vm2, %v3128_v41 }
0x1729   :  { %6829 = vmatpush3.bf16.msra.mxu1 %v7314_v40  ;;  %6844 = vmatprep.mubr.msk.bf16.mxu1 %vm7595_vm0, %v7594_v1 }
0x172a   :  { %6830 = vmatprep.subr.bf16.mxu1 %v7594_v1 }
0x172d   :  { %6831 = vmatpush3.bf16.msra.mxu1 %v7315_v7 }
0x172e   :  { %6832 = vmatprep.subr.bf16.mxu1 %v7594_v1 }
0x1731   :  { %6833 = vmatpush3.bf16.msra.mxu1 %v7316_v8 }
0x1732   :  { %6834 = vmatprep.subr.bf16.mxu1 %v7594_v1 }
0x1735   :  { %6835 = vmatpush3.bf16.msra.mxu1 %v7317_v9 }
0x1736   :  { %6836 = vmatprep.subr.bf16.mxu1 %v7594_v1 }
0x1739   :  { %6837 = vmatpush3.bf16.msra.mxu1 %v7318_v10 }
0x173a   :  { %6838 = vmatprep.subr.bf16.mxu1 %v7594_v1 }
0x173d   :  { %6839 = vmatpush3.bf16.msra.mxu1 %v7319_v11 }
0x173e   :  { %6840 = vmatprep.subr.bf16.mxu1 %v7594_v1 }
0x1741   :  { %6841 = vmatpush3.bf16.msra.mxu1 %v7320_v12 }
0x1742   :  { %6842 = vmatprep.subr.bf16.mxu1 %v7594_v1 }
0x1745   :  { %6843 = vmatpush3.bf16.msra.mxu1 %v7321_v13 }
0x1746   :  { %6868 = vmatprep.subr.bf16.mxu1 %v7594_v1 }
0x1748   :  { %6845 = vmatmul.mubr.bf16.vlgmr.msra.gmra.mrb[72].mxu1 %v8252_v45 }
0x1749   :  { %6869 = vmatpush3.bf16.msra.mxu1 %v7322_v14  ;;  %6884 = vmatprep.mubr.msk.bf16.mxu1 %vm7595_vm0, %v7594_v1 }
0x174a   :  { %6870 = vmatprep.subr.bf16.mxu1 %v7594_v1 }
0x174d   :  { %6871 = vmatpush3.bf16.msra.mxu1 %v7323_v15 }
0x174e   :  { %6872 = vmatprep.subr.bf16.mxu1 %v7594_v1 }
0x1751   :  { %6873 = vmatpush3.bf16.msra.mxu1 %v7324_v16 }
0x1752   :  { %6874 = vmatprep.subr.bf16.mxu1 %v7594_v1 }
0x1755   :  { %6875 = vmatpush3.bf16.msra.mxu1 %v7325_v17 }
0x1756   :  { %6876 = vmatprep.subr.bf16.mxu1 %v7594_v1 }
0x1759   :  { %6877 = vmatpush3.bf16.msra.mxu1 %v7326_v18 }
0x175a   :  { %6878 = vmatprep.subr.bf16.mxu1 %v7594_v1 }
0x175d   :  { %6879 = vmatpush3.bf16.msra.mxu1 %v7327_v21 }
0x175e   :  { %6880 = vmatprep.subr.bf16.mxu1 %v7594_v1 }
0x1761   :  { %6881 = vmatpush3.bf16.msra.mxu1 %v7328_v22 }
0x1762   :  { %6882 = vmatprep.subr.bf16.mxu1 %v7594_v1 }
0x1765   :  { %6883 = vmatpush3.bf16.msra.mxu1 %v7329_v19 }
0x1766   :  { %6908 = vmatprep.subr.bf16.mxu1 %v7594_v1 }
0x1768   :  { %6885 = vmatmul.mubr.bf16.vlgmr.msra.gmra.mrb[76].mxu1 %v8252_v45 }
0x1769   :  { %6909 = vmatpush3.bf16.msra.mxu1 %v7330_v24  ;;  %6912 = vmatprep.mubr.msk.bf16.mxu1 %vm7595_vm0, %v7594_v1 }
0x176a   :  { %6910 = vmatprep.subr.bf16.mxu1 %v7594_v1 }
0x176d   :  { %6911 = vmatpush3.bf16.msra.mxu1 %v7331_v25 }
0x176e   :  { %6936 = vmatprep.subr.bf16.mxu1 %v7594_v1 }
0x17fb   :  { %v3167_v26 = vpop.f32.mrb[68].mxu1 }
0x17fc   :  { %v6826_v46 = vpop.f32.mrb[69].mxu1 }
0x17fd   :  { %v3170_v28 = vpop.f32.mrb[70].mxu1 }
0x17fe   :  { %v3174_v29 = vpack.c.bf16 %v3170_v28, %v3167_v26  ;;  %v6827_v30 = vpop.f32.mrb[71].mxu1 }
0x1800   :  { %6913 = vmatmul.mubr.msk.bf16.vlgmr.msra.gmra.mrb[80].mxu1 %vm495_vm1, %v3174_v29 }
0x1801   :  { %6937 = vmatpush3.bf16.msra.mxu1 %v7332_v50  ;;  %6952 = vmatprep.mubr.msk.bf16.mxu1 %vm7595_vm0, %v7594_v1 }
0x1802   :  { %6938 = vmatprep.subr.bf16.mxu1 %v7594_v1 }
0x1805   :  { %6939 = vmatpush3.bf16.msra.mxu1 %v7333_v31 }
0x1806   :  { %6940 = vmatprep.subr.bf16.mxu1 %v7594_v1 }
0x1809   :  { %6941 = vmatpush3.bf16.msra.mxu1 %v7334_v32 }
0x180a   :  { %6942 = vmatprep.subr.bf16.mxu1 %v7594_v1 }
0x180d   :  { %6943 = vmatpush3.bf16.msra.mxu1 %v7335_v33 }
0x180e   :  { %6944 = vmatprep.subr.bf16.mxu1 %v7594_v1 }
0x1811   :  { %6945 = vmatpush3.bf16.msra.mxu1 %v7336_v34 }
0x1812   :  { %6946 = vmatprep.subr.bf16.mxu1 %v7594_v1 }
0x1815   :  { %6947 = vmatpush3.bf16.msra.mxu1 %v7337_v35 }
0x1816   :  { %6948 = vmatprep.subr.bf16.mxu1 %v7594_v1 }
0x1819   :  { %6949 = vmatpush3.bf16.msra.mxu1 %v7338_v36 }
0x181a   :  { %6950 = vmatprep.subr.bf16.mxu1 %v7594_v1 }
0x181b   :  { %v3286_v39 = vpop.f32.mrb[72].mxu1 }
0x181c   :  { %v6846_v47 = vpop.f32.mrb[73].mxu1  ;;  %v3287_v51 = vadd.f32 %v5817_v38, %v3286_v39  ;;  %v7340_v39 = vld [vmem:[%s8683_s9 + $0x10] sm:$0xff]  }
0x181d   :  { %v3289_v48 = vpop.f32.mrb[74].mxu1  ;;  %6951 = vmatpush3.bf16.msra.mxu1 %v7339_v37 }
0x181e   :  { %v3290_v52 = vadd.f32 %v5817_v38, %v3289_v48  ;;  %v6847_v54 = vpop.f32.mrb[75].mxu1  ;;  %6976 = vmatprep.subr.bf16.mxu1 %v7594_v1  ;;  %v7341_v48 = vld [vmem:[%s8683_s9 + $0x18] sm:$0xff]  }
0x1820   :  { %v3521_v55 = vpack.c.bf16 %v3290_v52, %v3287_v51  ;;  %6953 = vmatmul.mubr.bf16.vlgmr.msra.gmra.mrb[84].mxu1 %v8252_v45 }
0x1821   :  { %6978 = vmatprep.mubr.msk.bf16.mxu1 %vm7595_vm0, %v7594_v1 }
0x1822   :  { %6891 = vmatmul.mubr.msk.bf16.vlgmr.msra.gmra.mrb[56].mxu0 %vm495_vm1, %v3521_v55  ;;  %v7342_v55 = vld [vmem:[%s8675_s13 + $0x80] sm:$0xff]  }
0x1823   :  { %6896 = vmatprep.mubr.msk.bf16.mxu0 %vm7595_vm0, %v7594_v1 }
0x183b   :  { %v3514_v58 = vpop.f32.mrb[76].mxu1 }
0x183c   :  { %v6886_v59 = vpop.f32.mrb[77].mxu1  ;;  %v3515_v61 = vadd.f32 %v5869_v57, %v3514_v58 }
0x183d   :  { %v3517_v60 = vpop.f32.mrb[78].mxu1  ;;  %v7343_v59 = vld [vmem:[%s8675_s13 + $0x88] sm:$0xff]  }
0x183e   :  { %v3518_v62 = vadd.f32 %v5869_v57, %v3517_v60  ;;  %v6887_v63 = vpop.f32.mrb[79].mxu1  ;;  %v7344_v60 = vld [vmem:[%s8675_s13 + $0x90] sm:$0xff]  }
0x183f   :  { %v7347_v63 = vld [vmem:[%s8675_s13 + $0xa8] sm:$0xff]  }
0x1840   :  { %v3597_v20 = vpack.c.bf16 %v3518_v62, %v3515_v61  ;;  %v7345_v61 = vld [vmem:[%s8675_s13 + $0x98] sm:$0xff]   ;;  %v7346_v62 = vld [vmem:[%s8675_s13 + $0xa0] sm:$0xff]  }
0x1842   :  { %6895 = vmatpush3.bf16.msra.mxu0 %v3597_v20  ;;  %v7348_v20 = vld [vmem:[%s8675_s13 + $0xb0] sm:$0xff]  }
0x1843   :  { %6900 = vmatprep.subr.bf16.mxu0 %v7594_v1 }
0x18d3   :  { %v8394_v3 = vpop.f32.mrb[80].mxu1 }
0x18d4   :  { %v6914_v4 = vpop.f32.mrb[81].mxu1 }
0x18d5   :  { %v8396_v5 = vpop.f32.mrb[82].mxu1  ;;  %v7349_v4 = vld [vmem:[%s8675_s13 + $0xb8] sm:$0xff]  }
0x18d6   :  { %v6915_v53 = vpop.f32.mrb[83].mxu1 }
0x18d7   :  { %v7350_v53 = vld [vmem:[%s8679_s29 + $0x80] sm:$0xff]  }
0x18f3   :  { %v3981_v6 = vpop.f32.mrb[84].mxu1 }
0x18f4   :  { %v6954_v40 = vpop.f32.mrb[85].mxu1  ;;  %v3982_v8 = vadd.f32 %v5933_v56, %v3981_v6  ;;  %v7352_v6 = vld [vmem:[%s8679_s29 + $0x90] sm:$0xff]  }
0x18f5   :  { %v3563_v41 = vpop.f32.mrb[56].mxu0  ;;  %v3984_v7 = vpop.f32.mrb[86].mxu1  ;;  %v7353_v40 = vld [vmem:[%s8679_s29 + $0x98] sm:$0xff]  }
0x18f6   :  { %v3570_v9 = vmul.f32 0.17677669, %v3563_v41  ;;  %v3985_v10 = vadd.f32 %v5933_v56, %v3984_v7  ;;  %v6892_v11 = vpop.f32.mrb[57].mxu0  ;;  %v6955_v12 = vpop.f32.mrb[87].mxu1  ;;  %v7351_v56 = vld [vmem:[%s8679_s29 + $0x88] sm:$0xff]   ;;  %v7354_v41 = vld [vmem:[%s8679_s29 + $0xa0] sm:$0xff]  }
0x18f7   :  { %v3566_v13 = vpop.f32.mrb[58].mxu0  ;;  %v7355_v7 = vld [vmem:[%s8679_s29 + $0xa8] sm:$0xff]   ;;  %v7360_v12 = vld [vmem:[%s8676_s17 + $0xd0] sm:$0xff]  }
0x18f8   :  { %v4103_v14 = vpack.c.bf16 %v3985_v10, %v3982_v8  ;;  %v3571_v15 = vmul.f32 0.17677669, %v3566_v13  ;;  %v6893_v16 = vpop.f32.mrb[59].mxu0  ;;  %v3572_v17 = vadd.f32 %v8310_v44, %v3570_v9  ;;  %v7356_v8 = vld [vmem:[%s8679_s29 + $0xb0] sm:$0xff]   ;;  %v7357_v9 = vld [vmem:[%s8679_s29 + $0xb8] sm:$0xff]   ;;  %v7358_v10 = vld [vmem:[%s8676_s17 + $0xc0] sm:$0xff]  }
0x18f9   :  { %v7359_v11 = vld [vmem:[%s8676_s17 + $0xc8] sm:$0xff]   ;;  %v7361_v13 = vld [vmem:[%s8676_s17 + $0xd8] sm:$0xff]   ;;  %v7364_v16 = vld [vmem:[%s8676_s17 + $0xf0] sm:$0xff]  }
0x18fa   :  { %v4108_v18 = vsel %vm495_vm1, %v4103_v14, 0  ;;  %v3574_v21 = vsel %vm547_vm2, %v3572_v17, -inf  ;;  %v3573_v22 = vadd.f32 %v8315_v49, %v3571_v15  ;;  %v7362_v14 = vld [vmem:[%s8676_s17 + $0xe0] sm:$0xff]   ;;  %v7363_v15 = vld [vmem:[%s8676_s17 + $0xe8] sm:$0xff]  }
0x18fb   :  { %6977 = vmatpush3.bf16.xpose.msra.mxu1 %v4108_v18  ;;  %3575 = vmax.xlane.f32.xlu0 %v3574_v21 }
0x18fc   :  { %v3577_v19 = vsel %vm547_vm2, %v3573_v22, -inf  ;;  %6982 = vmatprep.subr.bf16.mxu1 %v7594_v1 }
0x18fd   :  { %3578 = vmax.xlane.f32.xlu1 %v3577_v19 }
0x1988   :  { %v3576_v24 = vpop.xlane.xlu0 %3575 }
0x1989   :  { %v3580_v25 = vsub.f32 %v3572_v17, %v3576_v24  ;;  %v7365_v17 = vld [vmem:[%s8676_s17 + $0xf8] sm:$0xff]  }
0x198a   :  { %v3579_v26 = vpop.xlane.xlu1 %3578 }
0x198b   :  { %v3582_v46 = vmul.f32 1.442695, %v3580_v25  ;;  %v3581_v28 = vsub.f32 %v3573_v22, %v3579_v26  ;;  %v5907_v26 = vld [vmem:[%s8680_s3 + $0x2] ss:$0 sm:$0xff] }
0x198d   :  { %7490 = vpow2.f32 %v3582_v46  ;;  %v3584_v50 = vmul.f32 1.442695, %v3581_v28 }
0x198f   :  { %7492 = vpow2.f32 %v3584_v50 }
0x1997   :  { %v7491_v29 = vpop.eup %7490 }
0x1998   :  { %v3586_v30 = vsel %vm547_vm2, %v7491_v29, 0.0 }
0x1999   :  { %v7493_v31 = vpop.eup %7492  ;;  %3587 = vadd.xlane.f32.xlu0 %v3586_v30 }
0x199a   :  { %v3589_v32 = vsel %vm547_vm2, %v7493_v31, 0.0 }
0x199b   :  { %3590 = vadd.xlane.f32.xlu1 %v3589_v32 }
0x1a26   :  { %v3588_v33 = vpop.xlane.xlu0 %3587 }
0x1a27   :  { %7494 = vrcp.f32 %v3588_v33 }
0x1a28   :  { %v3591_v34 = vpop.xlane.xlu1 %3590 }
0x1a29   :  { %7496 = vrcp.f32 %v3591_v34 }
0x1a31   :  { %v7495_v35 = vpop.eup %7494 }
0x1a32   :  { %v3594_v37 = vmul.f32 %v7495_v35, %v7491_v29 }
0x1a33   :  { %v7497_v36 = vpop.eup %7496 }
0x1a34   :  { %v3595_v38 = vmul.f32 %v7497_v36, %v7493_v31 }
0x1a36   :  { %v3596_v47 = vpack.c.bf16 %v3595_v38, %v3594_v37 }
0x1a38   :  { %6897 = vmatmul.mubr.msk.bf16.vlgmr.msra.gmra.mrb[60].mxu0 %vm547_vm2, %v3596_v47 }
0x1a39   :  { %6901 = vmatpush3.bf16.msra.mxu0 %v7340_v39  ;;  %6904 = vmatprep.mubr.msk.bf16.mxu0 %vm7595_vm0, %v7594_v1  ;;  %v6020_v39 = vld [vmem:[%s8681_s8 + $0x3] ss:$0 sm:$0xff] }
0x1a3a   :  { %6902 = vmatprep.subr.bf16.mxu0 %v7594_v1 }
0x1a3d   :  { %6903 = vmatpush3.bf16.msra.mxu0 %v7341_v48 }
0x1a3e   :  { %6916 = vmatprep.subr.bf16.mxu0 %v7594_v1 }
0x1b0b   :  { %v3635_v51 = vpop.f32.mrb[60].mxu0 }
0x1b0c   :  { %v6898_v52 = vpop.f32.mrb[61].mxu0 }
0x1b0d   :  { %v3638_v54 = vpop.f32.mrb[62].mxu0 }
0x1b0e   :  { %v3642_v57 = vpack.c.bf16 %v3638_v54, %v3635_v51  ;;  %v6899_v58 = vpop.f32.mrb[63].mxu0 }
0x1b10   :  { %6905 = vmatmul.mubr.msk.bf16.vlgmr.msra.gmra.mrb[64].mxu0 %vm495_vm1, %v3642_v57 }
0x1b11   :  { %6917 = vmatpush3.bf16.msra.mxu0 %v7342_v55  ;;  %6932 = vmatprep.mubr.msk.bf16.mxu0 %vm7595_vm0, %v7594_v1 }
0x1b12   :  { %6918 = vmatprep.subr.bf16.mxu0 %v7594_v1 }
0x1b15   :  { %6919 = vmatpush3.bf16.msra.mxu0 %v7343_v59 }
0x1b16   :  { %6920 = vmatprep.subr.bf16.mxu0 %v7594_v1 }
0x1b19   :  { %6921 = vmatpush3.bf16.msra.mxu0 %v7344_v60 }
0x1b1a   :  { %6922 = vmatprep.subr.bf16.mxu0 %v7594_v1 }
0x1b1d   :  { %6923 = vmatpush3.bf16.msra.mxu0 %v7345_v61 }
0x1b1e   :  { %6924 = vmatprep.subr.bf16.mxu0 %v7594_v1 }
0x1b21   :  { %6925 = vmatpush3.bf16.msra.mxu0 %v7346_v62 }
0x1b22   :  { %6926 = vmatprep.subr.bf16.mxu0 %v7594_v1 }
0x1b25   :  { %6927 = vmatpush3.bf16.msra.mxu0 %v7347_v63 }
0x1b26   :  { %6928 = vmatprep.subr.bf16.mxu0 %v7594_v1 }
0x1b29   :  { %6929 = vmatpush3.bf16.msra.mxu0 %v7348_v20 }
0x1b2a   :  { %6930 = vmatprep.subr.bf16.mxu0 %v7594_v1 }
0x1b2d   :  { %6931 = vmatpush3.bf16.msra.mxu0 %v7349_v4 }
0x1b2e   :  { %6956 = vmatprep.subr.bf16.mxu0 %v7594_v1 }
0x1b30   :  { %6933 = vmatmul.mubr.bf16.vlgmr.msra.gmra.mrb[68].mxu0 %v8252_v45 }
0x1b31   :  { %6957 = vmatpush3.bf16.msra.mxu0 %v7350_v53  ;;  %6972 = vmatprep.mubr.msk.bf16.mxu0 %vm7595_vm0, %v7594_v1 }
0x1b32   :  { %6958 = vmatprep.subr.bf16.mxu0 %v7594_v1 }
0x1b35   :  { %6959 = vmatpush3.bf16.msra.mxu0 %v7351_v56 }
0x1b36   :  { %6960 = vmatprep.subr.bf16.mxu0 %v7594_v1 }
0x1b39   :  { %6961 = vmatpush3.bf16.msra.mxu0 %v7352_v6 }
0x1b3a   :  { %6962 = vmatprep.subr.bf16.mxu0 %v7594_v1 }
0x1b3d   :  { %6963 = vmatpush3.bf16.msra.mxu0 %v7353_v40 }
0x1b3e   :  { %6964 = vmatprep.subr.bf16.mxu0 %v7594_v1 }
0x1b41   :  { %6965 = vmatpush3.bf16.msra.mxu0 %v7354_v41 }
0x1b42   :  { %6966 = vmatprep.subr.bf16.mxu0 %v7594_v1 }
0x1b45   :  { %6967 = vmatpush3.bf16.msra.mxu0 %v7355_v7 }
0x1b46   :  { %6968 = vmatprep.subr.bf16.mxu0 %v7594_v1 }
0x1b49   :  { %6969 = vmatpush3.bf16.msra.mxu0 %v7356_v8 }
0x1b4a   :  { %6970 = vmatprep.subr.bf16.mxu0 %v7594_v1 }
0x1b4d   :  { %6971 = vmatpush3.bf16.msra.mxu0 %v7357_v9 }
0x1b4e   :  { %7016 = vmatprep.subr.bf16.mxu0 %v7594_v1 }
0x1b50   :  { %6973 = vmatmul.mubr.bf16.vlgmr.msra.gmra.mrb[72].mxu0 %v8252_v45 }
0x1b51   :  { %7017 = vmatpush3.bf16.msra.mxu0 %v7358_v10  ;;  %7032 = vmatprep.mubr.msk.bf16.mxu0 %vm7595_vm0, %v7594_v1 }
0x1b52   :  { %7018 = vmatprep.subr.bf16.mxu0 %v7594_v1 }
0x1b55   :  { %7019 = vmatpush3.bf16.msra.mxu0 %v7359_v11 }
0x1b56   :  { %7020 = vmatprep.subr.bf16.mxu0 %v7594_v1 }
0x1b59   :  { %7021 = vmatpush3.bf16.msra.mxu0 %v7360_v12 }
0x1b5a   :  { %7022 = vmatprep.subr.bf16.mxu0 %v7594_v1 }
0x1b5d   :  { %7023 = vmatpush3.bf16.msra.mxu0 %v7361_v13 }
0x1b5e   :  { %7024 = vmatprep.subr.bf16.mxu0 %v7594_v1 }
0x1b61   :  { %7025 = vmatpush3.bf16.msra.mxu0 %v7362_v14 }
0x1b62   :  { %7026 = vmatprep.subr.bf16.mxu0 %v7594_v1 }
0x1b65   :  { %7027 = vmatpush3.bf16.msra.mxu0 %v7363_v15 }
0x1b66   :  { %7028 = vmatprep.subr.bf16.mxu0 %v7594_v1 }
0x1b69   :  { %7029 = vmatpush3.bf16.msra.mxu0 %v7364_v16 }
0x1b6a   :  { %7030 = vmatprep.subr.bf16.mxu0 %v7594_v1 }
0x1b6d   :  { %7031 = vmatpush3.bf16.msra.mxu0 %v7365_v17 }
0x1b6e   :  { %7056 = vmatprep.subr.bf16.mxu0 %v7594_v1 }
0x1b70   :  { %7033 = vmatmul.mubr.bf16.vlgmr.msra.gmra.mrb[76].mxu0 %v8252_v45 }
0x1b71   :  { %7058 = vmatprep.mubr.msk.bf16.mxu0 %vm7595_vm0, %v7594_v1 }
0x1be3   :  { %v3697_v18 = vpop.f32.mrb[64].mxu0 }
0x1be4   :  { %v8475_v21 = vadd.f32 %v8394_v3, %v3697_v18  ;;  %v6906_v22 = vpop.f32.mrb[65].mxu0  ;;  %v5959_v3 = vld [vmem:[%s8682_s14 + $0x2] ss:$0 sm:$0xff] }
0x1be5   :  { %v3700_v19 = vpop.f32.mrb[66].mxu0 }
0x1be6   :  { %v8478_v24 = vadd.f32 %v8396_v5, %v3700_v19  ;;  %v6907_v25 = vpop.f32.mrb[67].mxu0 }
0x1be7   :  { %v7366_v25 = vld [vmem:[%s8683_s9 + $0x20] sm:$0xff]  }
0x1c03   :  { %v3867_v46 = vpop.f32.mrb[68].mxu0 }
0x1c04   :  { %v6934_v28 = vpop.f32.mrb[69].mxu0  ;;  %v3868_v29 = vadd.f32 %v5907_v26, %v3867_v46  ;;  %v7367_v46 = vld [vmem:[%s8683_s9 + $0x28] sm:$0xff]  }
0x1c05   :  { %v3870_v50 = vpop.f32.mrb[70].mxu0 }
0x1c06   :  { %v3871_v30 = vadd.f32 %v5907_v26, %v3870_v50  ;;  %v6935_v31 = vpop.f32.mrb[71].mxu0 }
0x1c08   :  { %v4102_v32 = vpack.c.bf16 %v3871_v30, %v3868_v29  ;;  %v7368_v30 = vld [vmem:[%s8675_s13 + $0xc0] sm:$0xff]  }
0x1c0a   :  { %6979 = vmatmul.mubr.msk.bf16.vlgmr.msra.gmra.mrb[88].mxu1 %vm495_vm1, %v4102_v32 }
0x1c0b   :  { %6984 = vmatprep.mubr.msk.bf16.mxu1 %vm7595_vm0, %v7594_v1 }
0x1c23   :  { %v4095_v33 = vpop.f32.mrb[72].mxu0 }
0x1c24   :  { %v6974_v34 = vpop.f32.mrb[73].mxu0  ;;  %v4096_v35 = vadd.f32 %v5959_v3, %v4095_v33  ;;  %v7370_v33 = vld [vmem:[%s8675_s13 + $0xd0] sm:$0xff]  }
0x1c25   :  { %v4098_v5 = vpop.f32.mrb[74].mxu0  ;;  %v7371_v34 = vld [vmem:[%s8675_s13 + $0xd8] sm:$0xff]  }
0x1c26   :  { %v4099_v36 = vadd.f32 %v5959_v3, %v4098_v5  ;;  %v6975_v37 = vpop.f32.mrb[75].mxu0  ;;  %v7369_v3 = vld [vmem:[%s8675_s13 + $0xc8] sm:$0xff]   ;;  %v7372_v5 = vld [vmem:[%s8675_s13 + $0xe0] sm:$0xff]  }
0x1c27   :  { %v7375_v37 = vld [vmem:[%s8675_s13 + $0xf8] sm:$0xff]  }
0x1c28   :  { %v4178_v38 = vpack.c.bf16 %v4099_v36, %v4096_v35  ;;  %v7373_v35 = vld [vmem:[%s8675_s13 + $0xe8] sm:$0xff]   ;;  %v7374_v36 = vld [vmem:[%s8675_s13 + $0xf0] sm:$0xff]  }
0x1c2a   :  { %6983 = vmatpush3.bf16.msra.mxu1 %v4178_v38  ;;  %v7376_v38 = vld [vmem:[%s8679_s29 + $0xc0] sm:$0xff]  }
0x1c2b   :  { %6988 = vmatprep.subr.bf16.mxu1 %v7594_v1 }
0x1c43   :  { %v4508_v47 = vpop.f32.mrb[76].mxu0 }
0x1c44   :  { %v7034_v48 = vpop.f32.mrb[77].mxu0  ;;  %v4509_v52 = vadd.f32 %v6020_v39, %v4508_v47  ;;  %v7378_v47 = vld [vmem:[%s8679_s29 + $0xd0] sm:$0xff]  }
0x1c45   :  { %v4511_v51 = vpop.f32.mrb[78].mxu0  ;;  %v7379_v48 = vld [vmem:[%s8679_s29 + $0xd8] sm:$0xff]  }
0x1c46   :  { %v4512_v54 = vadd.f32 %v6020_v39, %v4511_v51  ;;  %v7035_v55 = vpop.f32.mrb[79].mxu0  ;;  %v7377_v39 = vld [vmem:[%s8679_s29 + $0xc8] sm:$0xff]   ;;  %v7380_v51 = vld [vmem:[%s8679_s29 + $0xe0] sm:$0xff]  }
0x1c47   :  { %v7383_v55 = vld [vmem:[%s8679_s29 + $0xf8] sm:$0xff]  }
0x1c48   :  { %v4630_v57 = vpack.c.bf16 %v4512_v54, %v4509_v52  ;;  %v7381_v52 = vld [vmem:[%s8679_s29 + $0xe8] sm:$0xff]   ;;  %v7382_v54 = vld [vmem:[%s8679_s29 + $0xf0] sm:$0xff]  }
0x1c4a   :  { %v4635_v58 = vsel %vm495_vm1, %v4630_v57, 0 }
0x1c4b   :  { %7057 = vmatpush3.bf16.xpose.msra.mxu0 %v4635_v58 }
0x1c4c   :  { %7062 = vmatprep.subr.bf16.mxu0 %v7594_v1 }
0x1cdd   :  { %v4144_v59 = vpop.f32.mrb[88].mxu1 }
0x1cde   :  { %v4151_v60 = vmul.f32 0.17677669, %v4144_v59  ;;  %v6980_v61 = vpop.f32.mrb[89].mxu1 }
0x1cdf   :  { %v4147_v62 = vpop.f32.mrb[90].mxu1 }
0x1ce0   :  { %v4152_v63 = vmul.f32 0.17677669, %v4147_v62  ;;  %v6981_v20 = vpop.f32.mrb[91].mxu1  ;;  %v4153_v4 = vadd.f32 %v8310_v44, %v4151_v60 }
0x1ce2   :  { %v4155_v53 = vsel %vm547_vm2, %v4153_v4, -inf  ;;  %v4154_v56 = vadd.f32 %v8315_v49, %v4152_v63  ;;  %v5994_v63 = vld [vmem:[%s8680_s3 + $0x3] ss:$0 sm:$0xff] }
0x1ce3   :  { %4156 = vmax.xlane.f32.xlu0 %v4155_v53 }
0x1ce4   :  { %v4158_v6 = vsel %vm547_vm2, %v4154_v56, -inf }
0x1ce5   :  { %4159 = vmax.xlane.f32.xlu1 %v4158_v6 }
0x1d70   :  { %v4157_v40 = vpop.xlane.xlu0 %4156 }
0x1d71   :  { %v4161_v41 = vsub.f32 %v4153_v4, %v4157_v40 }
0x1d72   :  { %v4160_v7 = vpop.xlane.xlu1 %4159 }
0x1d73   :  { %v4163_v8 = vmul.f32 1.442695, %v4161_v41  ;;  %v4162_v9 = vsub.f32 %v4154_v56, %v4160_v7 }
0x1d75   :  { %7498 = vpow2.f32 %v4163_v8  ;;  %v4165_v10 = vmul.f32 1.442695, %v4162_v9 }
0x1d77   :  { %7500 = vpow2.f32 %v4165_v10 }
0x1d7f   :  { %v7499_v11 = vpop.eup %7498 }
0x1d80   :  { %v4167_v12 = vsel %vm547_vm2, %v7499_v11, 0.0 }
0x1d81   :  { %v7501_v13 = vpop.eup %7500  ;;  %4168 = vadd.xlane.f32.xlu0 %v4167_v12 }
0x1d82   :  { %v4170_v14 = vsel %vm547_vm2, %v7501_v13, 0.0 }
0x1d83   :  { %4171 = vadd.xlane.f32.xlu1 %v4170_v14 }
0x1e0e   :  { %v4169_v15 = vpop.xlane.xlu0 %4168 }
0x1e0f   :  { %7502 = vrcp.f32 %v4169_v15 }
0x1e10   :  { %v4172_v16 = vpop.xlane.xlu1 %4171 }
0x1e11   :  { %7504 = vrcp.f32 %v4172_v16 }
0x1e19   :  { %v7503_v17 = vpop.eup %7502 }
0x1e1a   :  { %v4175_v22 = vmul.f32 %v7503_v17, %v7499_v11 }
0x1e1b   :  { %v7505_v18 = vpop.eup %7504 }
0x1e1c   :  { %v4176_v19 = vmul.f32 %v7505_v18, %v7501_v13 }
0x1e1e   :  { %v4177_v26 = vpack.c.bf16 %v4176_v19, %v4175_v22 }
0x1e20   :  { %6985 = vmatmul.mubr.msk.bf16.vlgmr.msra.gmra.mrb[92].mxu1 %vm547_vm2, %v4177_v26 }
0x1e21   :  { %6989 = vmatpush3.bf16.msra.mxu1 %v7366_v25  ;;  %6992 = vmatprep.mubr.msk.bf16.mxu1 %vm7595_vm0, %v7594_v1 }
0x1e22   :  { %6990 = vmatprep.subr.bf16.mxu1 %v7594_v1 }
0x1e25   :  { %6991 = vmatpush3.bf16.msra.mxu1 %v7367_v46 }
0x1e26   :  { %6996 = vmatprep.subr.bf16.mxu1 %v7594_v1 }
0x1ef3   :  { %v4216_v28 = vpop.f32.mrb[92].mxu1 }
0x1ef4   :  { %v6986_v50 = vpop.f32.mrb[93].mxu1 }
0x1ef5   :  { %v4219_v29 = vpop.f32.mrb[94].mxu1 }
0x1ef6   :  { %v4223_v31 = vpack.c.bf16 %v4219_v29, %v4216_v28  ;;  %v6987_v32 = vpop.f32.mrb[95].mxu1 }
0x1ef8   :  { %6993 = vmatmul.mubr.msk.bf16.vlgmr.msra.gmra.mrb[96].mxu1 %vm495_vm1, %v4223_v31 }
0x1ef9   :  { %6997 = vmatpush3.bf16.msra.mxu1 %v7368_v30  ;;  %7012 = vmatprep.mubr.msk.bf16.mxu1 %vm7595_vm0, %v7594_v1 }
0x1efa   :  { %6998 = vmatprep.subr.bf16.mxu1 %v7594_v1 }
0x1efd   :  { %6999 = vmatpush3.bf16.msra.mxu1 %v7369_v3 }
0x1efe   :  { %7000 = vmatprep.subr.bf16.mxu1 %v7594_v1 }
0x1f01   :  { %7001 = vmatpush3.bf16.msra.mxu1 %v7370_v33 }
0x1f02   :  { %7002 = vmatprep.subr.bf16.mxu1 %v7594_v1 }
0x1f05   :  { %7003 = vmatpush3.bf16.msra.mxu1 %v7371_v34 }
0x1f06   :  { %7004 = vmatprep.subr.bf16.mxu1 %v7594_v1 }
0x1f09   :  { %7005 = vmatpush3.bf16.msra.mxu1 %v7372_v5 }
0x1f0a   :  { %7006 = vmatprep.subr.bf16.mxu1 %v7594_v1 }
0x1f0d   :  { %7007 = vmatpush3.bf16.msra.mxu1 %v7373_v35 }
0x1f0e   :  { %7008 = vmatprep.subr.bf16.mxu1 %v7594_v1 }
0x1f11   :  { %7009 = vmatpush3.bf16.msra.mxu1 %v7374_v36 }
0x1f12   :  { %7010 = vmatprep.subr.bf16.mxu1 %v7594_v1 }
0x1f15   :  { %7011 = vmatpush3.bf16.msra.mxu1 %v7375_v37  ;;  %v7384_v37 = vld [vmem:[%s8683_s9 + $0x30] sm:$0xff]  }
0x1f16   :  { %7036 = vmatprep.subr.bf16.mxu1 %v7594_v1 }
0x1f18   :  { %7013 = vmatmul.mubr.bf16.vlgmr.msra.gmra.mrb[100].mxu1 %v8252_v45 }
0x1f19   :  { %7037 = vmatpush3.bf16.msra.mxu1 %v7376_v38  ;;  %7052 = vmatprep.mubr.msk.bf16.mxu1 %vm7595_vm0, %v7594_v1 }
0x1f1a   :  { %7038 = vmatprep.subr.bf16.mxu1 %v7594_v1 }
0x1f1d   :  { %7039 = vmatpush3.bf16.msra.mxu1 %v7377_v39  ;;  %v7385_v39 = vld [vmem:[%s8683_s9 + $0x38] sm:$0xff]  }
0x1f1e   :  { %7040 = vmatprep.subr.bf16.mxu1 %v7594_v1 }
0x1f21   :  { %7041 = vmatpush3.bf16.msra.mxu1 %v7378_v47 }
0x1f22   :  { %7042 = vmatprep.subr.bf16.mxu1 %v7594_v1 }
0x1f25   :  { %7043 = vmatpush3.bf16.msra.mxu1 %v7379_v48 }
0x1f26   :  { %7044 = vmatprep.subr.bf16.mxu1 %v7594_v1 }
0x1f29   :  { %7045 = vmatpush3.bf16.msra.mxu1 %v7380_v51 }
0x1f2a   :  { %7046 = vmatprep.subr.bf16.mxu1 %v7594_v1 }
0x1f2d   :  { %7047 = vmatpush3.bf16.msra.mxu1 %v7381_v52 }
0x1f2e   :  { %7048 = vmatprep.subr.bf16.mxu1 %v7594_v1 }
0x1f31   :  { %7049 = vmatpush3.bf16.msra.mxu1 %v7382_v54 }
0x1f32   :  { %7050 = vmatprep.subr.bf16.mxu1 %v7594_v1 }
0x1f35   :  { %7051 = vmatpush3.bf16.msra.mxu1 %v7383_v55 }
0x1f38   :  { %7053 = vmatmul.mubr.bf16.vlgmr.msra.gmra.mrb[104].mxu1 %v8252_v45  ;;  %v6046_v45 = vld [vmem:[%s8682_s14 + $0x3] ss:$0 sm:$0xff] }
0x1fcb   :  { %v4278_v57 = vpop.f32.mrb[96].mxu1 }
0x1fcc   :  { %v8541_v58 = vadd.f32 %v4278_v57, %v8475_v21  ;;  %v6994_v59 = vpop.f32.mrb[97].mxu1  ;;  %v6064_v57 = vld [vmem:[%s8684_s19] ss:$0 sm:$0xff] }
0x1fcd   :  { %v4281_v60 = vpop.f32.mrb[98].mxu1 }
0x1fce   :  { %v8544_v61 = vadd.f32 %v4281_v60, %v8478_v24  ;;  %v6995_v62 = vpop.f32.mrb[99].mxu1 }
0x1feb   :  { %v4394_v20 = vpop.f32.mrb[100].mxu1 }
0x1fec   :  { %v7014_v4 = vpop.f32.mrb[101].mxu1  ;;  %v4395_v56 = vadd.f32 %v5994_v63, %v4394_v20 }
0x1fed   :  { %v4397_v53 = vpop.f32.mrb[102].mxu1 }
0x1fee   :  { %v4398_v6 = vadd.f32 %v5994_v63, %v4397_v53  ;;  %v7015_v40 = vpop.f32.mrb[103].mxu1 }
0x1fef   :  { %v7388_v40 = vld [vmem:[%s8685_s24 + $0x4] ss:$8 sps:$4 sm:$0xff]  }
0x1ff0   :  { %v4629_v41 = vpack.c.bf16 %v4398_v6, %v4395_v56 }
0x1ff2   :  { %7059 = vmatmul.mubr.msk.bf16.vlgmr.msra.gmra.mrb[80].mxu0 %vm495_vm1, %v4629_v41  ;;  %v7391_v41 = vld [vmem:[%s8685_s24 + $0x14] ss:$8 sps:$4 sm:$0xff]  }
0x1ff3   :  { %7064 = vmatprep.mubr.msk.bf16.mxu0 %vm7595_vm0, %v7594_v1 }
0x200b   :  { %v4622_v21 = vpop.f32.mrb[104].mxu1 }
0x200c   :  { %v7054_v7 = vpop.f32.mrb[105].mxu1  ;;  %v4623_v24 = vadd.f32 %v6046_v45, %v4622_v21 }
0x200d   :  { %v4625_v8 = vpop.f32.mrb[106].mxu1 }
0x200e   :  { %v4626_v9 = vadd.f32 %v6046_v45, %v4625_v8  ;;  %v7055_v10 = vpop.f32.mrb[107].mxu1 }
0x200f   :  { %v7392_v10 = vld [vmem:[%s8685_s24 + $0x20] ss:$8 sps:$4 sm:$0xff]  }
0x2010   :  { %v4705_v11 = vpack.c.bf16 %v4626_v9, %v4623_v24  ;;  %v7394_v9 = vld [vmem:[%s8685_s24 + $0x24] ss:$8 sps:$4 sm:$0xff]  }
0x2012   :  { %7063 = vmatpush3.bf16.msra.mxu0 %v4705_v11  ;;  %v7397_v11 = vld [vmem:[%s8685_s24 + $0x34] ss:$8 sps:$4 sm:$0xff]  }
0x2013   :  { %7068 = vmatprep.subr.bf16.mxu0 %v7594_v1 }
0x20c5   :  { %v4671_v12 = vpop.f32.mrb[80].mxu0 }
0x20c6   :  { %v4678_v13 = vmul.f32 0.17677669, %v4671_v12  ;;  %v7060_v14 = vpop.f32.mrb[81].mxu0  ;;  %v7395_v12 = vld [vmem:[%s8685_s24 + $0x30] ss:$8 sps:$4 sm:$0xff]  }
0x20c7   :  { %v4674_v15 = vpop.f32.mrb[82].mxu0  ;;  %v7398_v14 = vld [vmem:[%s8685_s24 + $0x40] ss:$8 sps:$4 sm:$0xff]  }
0x20c8   :  { %v4679_v16 = vmul.f32 0.17677669, %v4674_v15  ;;  %v7061_v17 = vpop.f32.mrb[83].mxu0  ;;  %v4680_v18 = vadd.f32 %v8310_v44, %v4678_v13  ;;  %v7400_v13 = vld [vmem:[%s8685_s24 + $0x44] ss:$8 sps:$4 sm:$0xff]  }
0x20c9   :  { %v7403_v15 = vld [vmem:[%s8685_s24 + $0x54] ss:$8 sps:$4 sm:$0xff]   ;;  %v7406_v17 = vld [vmem:[%s8685_s24 + $0x64] ss:$8 sps:$4 sm:$0xff]  }
0x20ca   :  { %v4682_v22 = vsel %vm547_vm2, %v4680_v18, -inf  ;;  %v4681_v19 = vadd.f32 %v8315_v49, %v4679_v16  ;;  %v7401_v16 = vld [vmem:[%s8685_s24 + $0x50] ss:$8 sps:$4 sm:$0xff]  }
0x20cb   :  { %4683 = vmax.xlane.f32.xlu0 %v4682_v22  ;;  %v7409_v22 = vld [vmem:[%s8685_s24 + $0x74] ss:$8 sps:$4 sm:$0xff]  }
0x20cc   :  { %v4685_v25 = vsel %vm547_vm2, %v4681_v19, -inf }
0x20cd   :  { %4686 = vmax.xlane.f32.xlu1 %v4685_v25 }
0x2158   :  { %v4684_v26 = vpop.xlane.xlu0 %4683 }
0x2159   :  { %v4688_v46 = vsub.f32 %v4680_v18, %v4684_v26  ;;  %v7404_v18 = vld [vmem:[%s8685_s24 + $0x60] ss:$8 sps:$4 sm:$0xff]  }
0x215a   :  { %v4687_v28 = vpop.xlane.xlu1 %4686 }
0x215b   :  { %v4690_v50 = vmul.f32 1.442695, %v4688_v46  ;;  %v4689_v29 = vsub.f32 %v4681_v19, %v4687_v28  ;;  %v7407_v19 = vld [vmem:[%s8685_s24 + $0x70] ss:$8 sps:$4 sm:$0xff]  }
0x215d   :  { %7506 = vpow2.f32 %v4690_v50  ;;  %v4692_v30 = vmul.f32 1.442695, %v4689_v29 }
0x215f   :  { %7508 = vpow2.f32 %v4692_v30 }
0x2167   :  { %v7507_v31 = vpop.eup %7506 }
0x2168   :  { %v4694_v44 = vsel %vm547_vm2, %v7507_v31, 0.0 }
0x2169   :  { %v7509_v32 = vpop.eup %7508  ;;  %4695 = vadd.xlane.f32.xlu0 %v4694_v44 }
0x216a   :  { %v4697_v49 = vsel %vm547_vm2, %v7509_v32, 0.0 }
0x216b   :  { %4698 = vadd.xlane.f32.xlu1 %v4697_v49 }
0x21f6   :  { %v4696_v3 = vpop.xlane.xlu0 %4695 }
0x21f7   :  { %7510 = vrcp.f32 %v4696_v3 }
0x21f8   :  { %v4699_v33 = vpop.xlane.xlu1 %4698 }
0x21f9   :  { %7512 = vrcp.f32 %v4699_v33  ;;  %v6066_v33 = vld [vmem:[%s8687_s12] ss:$0 sm:$0xff] }
0x2201   :  { %v7511_v34 = vpop.eup %7510 }
0x2202   :  { %v4702_v35 = vmul.f32 %v7511_v34, %v7507_v31  ;;  %v6065_v31 = vld [vmem:[%s8686_s30] ss:$0 sm:$0xff] }
0x2203   :  { %v7513_v5 = vpop.eup %7512 }
0x2204   :  { %v4703_v36 = vmul.f32 %v7513_v5, %v7509_v32 }
0x2206   :  { %v4704_v38 = vpack.c.bf16 %v4703_v36, %v4702_v35 }
0x2208   :  { %7065 = vmatmul.mubr.msk.bf16.vlgmr.msra.gmra.mrb[84].mxu0 %vm547_vm2, %v4704_v38  ;;  %v7411_v38 = vld [vmem:[%s8688_s28] sm:$0xff]  }
0x2209   :  { %7069 = vmatpush3.bf16.msra.mxu0 %v7384_v37  ;;  %7072 = vmatprep.mubr.msk.bf16.mxu0 %vm7595_vm0, %v7594_v1  ;;  %v7410_v37 = vld [vmem:[%s8688_s28 + $0x40] sm:$0xff]  }
0x220a   :  { %7070 = vmatprep.subr.bf16.mxu0 %v7594_v1  ;;  %6405 = vmatprep.subr.bf16.mxu1 %v7410_v37 }
0x220b   :  { %6406 = vmatpush3.bf16.msra.mxu1 %v7411_v38 }
0x220d   :  { %7071 = vmatpush3.bf16.msra.mxu0 %v7385_v39  ;;  %v7412_v39 = vld [vmem:[%s8688_s28 + $0x48] sm:$0xff]  }
0x220e   :  { %4974 = vmatprep.subr.bf16.mxu0 %v7388_v40  ;;  %6407 = vmatprep.subr.bf16.mxu1 %v7412_v39 }
0x22db   :  { %v4743_v47 = vpop.f32.mrb[84].mxu0 }
0x22dc   :  { %v7066_v48 = vpop.f32.mrb[85].mxu0 }
0x22dd   :  { %v4746_v51 = vpop.f32.mrb[86].mxu0  ;;  %v7414_v48 = vld [vmem:[%s8688_s28 + $0x50] sm:$0xff]  }
0x22de   :  { %v4750_v52 = vpack.c.bf16 %v4746_v51, %v4743_v47  ;;  %v7067_v54 = vpop.f32.mrb[87].mxu0  ;;  %v7413_v47 = vld [vmem:[%s8688_s28 + $0x8] sm:$0xff]   ;;  %v7415_v51 = vld [vmem:[%s8688_s28 + $0x10] sm:$0xff]  }
0x22df   :  { %6408 = vmatpush3.bf16.msra.mxu1 %v7413_v47  ;;  %v7417_v54 = vld [vmem:[%s8688_s28 + $0x18] sm:$0xff]  }
0x22e0   :  { %7073 = vmatmul.mubr.msk.bf16.vlgmr.msra.gmra.mrb[88].mxu0 %vm495_vm1, %v4750_v52  ;;  %6409 = vmatprep.subr.bf16.mxu1 %v7414_v48  ;;  %v7416_v52 = vld [vmem:[%s8688_s28 + $0x58] sm:$0xff]  }
0x22e1   :  { %5006 = vmatprep.mubr.bf16.mxu0 %v7596_v27  ;;  %v7386_v27 = vld [vmem:[%s8685_s24] ss:$8 sps:$4 sm:$0xff]  }
0x22e2   :  { %4975 = vmatpush1.bf16.msra.mxu0 %v7386_v27 }
0x22e3   :  { %4976 = vmatprep.subr.bf16.mxu0 %v7391_v41  ;;  %6410 = vmatpush3.bf16.msra.mxu1 %v7415_v51  ;;  %v6083_v51 = vld [vmem:[%s8690_s2] ss:$0 sm:$0xff] }
0x22e4   :  { %6411 = vmatprep.subr.bf16.mxu1 %v7416_v52 }
0x22e7   :  { %6412 = vmatpush3.bf16.msra.mxu1 %v7417_v54 }
0x23b3   :  { %v4805_v55 = vpop.f32.mrb[88].mxu0 }
0x23b4   :  { %v4812_v59 = vadd.f32 %v4805_v55, %v8541_v58  ;;  %v7074_v60 = vpop.f32.mrb[89].mxu0  ;;  %v7389_v58 = vld [vmem:[%s8685_s24 + $0x10] ss:$8 sps:$4 sm:$0xff]   ;;  %v7418_v55 = vld [vmem:[%s8688_s28 + $0x60] sm:$0xff]  }
0x23b5   :  { %v4808_v62 = vpop.f32.mrb[90].mxu0  ;;  %4977 = vmatpush1.bf16.msra.mxu0 %v7389_v58  ;;  %6413 = vmatprep.subr.bf16.mxu1 %v7418_v55  ;;  %v7421_v60 = vld [vmem:[%s8688_s28 + $0x28] sm:$0xff]  }
0x23b6   :  { %v4821_v63 = vadd.f32 %v6064_v57, %v4812_v59  ;;  %v4813_v20 = vadd.f32 %v4808_v62, %v8544_v61  ;;  %v7075_v4 = vpop.f32.mrb[91].mxu0  ;;  %4978 = vmatprep.subr.bf16.mxu0 %v7394_v9  ;;  %v7420_v59 = vld [vmem:[%s8688_s28 + $0x68] sm:$0xff]   ;;  %v7422_v62 = vld [vmem:[%s8688_s28 + $0x70] sm:$0xff]  }
0x23b7   :  { %v7425_v4 = vld [vmem:[%s8688_s28 + $0x38] sm:$0xff]  }
0x23b8   :  { %v4822_v53 = vadd.f32 %v6064_v57, %v4813_v20  ;;  %v4823_v56 = vadd.f32 %v4821_v63, %v8245_v42  ;;  %v7419_v57 = vld [vmem:[%s8688_s28 + $0x20] sm:$0xff]   ;;  %v7423_v63 = vld [vmem:[%s8688_s28 + $0x30] sm:$0xff]   ;;  %v7424_v20 = vld [vmem:[%s8688_s28 + $0x78] sm:$0xff]  }
0x23b9   :  { %4979 = vmatpush1.bf16.msra.mxu0 %v7392_v10  ;;  %6414 = vmatpush3.bf16.msra.mxu1 %v7419_v57 }
0x23ba   :  { %4827 = vadd.xlane.f32.xlu0 %v4823_v56  ;;  %v4824_v6 = vadd.f32 %v4822_v53, %v8247_v43  ;;  %4980 = vmatprep.subr.bf16.mxu0 %v7397_v11  ;;  %v4882_v53 = vld [vmem:[%s8689_s1] sm:$0x3] }
0x23bb   :  { %6415 = vmatprep.subr.bf16.mxu1 %v7420_v59 }
0x23bc   :  { %4829 = vadd.xlane.f32.xlu1 %v4824_v6 }
0x23bd   :  { %4981 = vmatpush1.bf16.msra.mxu0 %v7395_v12  ;;  %6416 = vmatpush3.bf16.msra.mxu1 %v7421_v60 }
0x23be   :  { %4982 = vmatprep.subr.bf16.mxu0 %v7400_v13  ;;  %6417 = vmatprep.subr.bf16.mxu1 %v7422_v62 }
0x23c1   :  { %4983 = vmatpush1.bf16.msra.mxu0 %v7398_v14  ;;  %6418 = vmatpush3.bf16.msra.mxu1 %v7423_v63 }
0x23c2   :  { %4984 = vmatprep.subr.bf16.mxu0 %v7403_v15  ;;  %6419 = vmatprep.subr.bf16.mxu1 %v7424_v20 }
0x23c5   :  { %4985 = vmatpush1.bf16.msra.mxu0 %v7401_v16  ;;  %6420 = vmatpush3.bf16.msra.mxu1 %v7425_v4  ;;  %v7426_v4 = vld [vmem:[%s7778_s6] sm:$0xff]  }
0x23c6   :  { %4986 = vmatprep.subr.bf16.mxu0 %v7406_v17 }
0x23c9   :  { %4987 = vmatpush1.bf16.msra.mxu0 %v7404_v18 }
0x23ca   :  { %4988 = vmatprep.subr.bf16.mxu0 %v7409_v22 }
0x23cd   :  { %4989 = vmatpush1.bf16.msra.mxu0 %v7407_v19 }
0x23ce   :  { %7076 = vmatprep.subr.bf16.mxu0 %v7594_v1 }
0x2447   :  { %v4828_v61 = vpop.xlane.xlu0 %4827 }
0x2448   :  { %v4831_v45 = vmul.f32 0.0078125, %v4828_v61 }
0x2449   :  { %v4830_v21 = vpop.xlane.xlu1 %4829 }
0x244a   :  { %v4833_v42 = vsub.f32 %v4823_v56, %v4831_v45  ;;  %v4832_v43 = vmul.f32 0.0078125, %v4830_v21  ;;  %v4887_v56 = vrot.slane %v4882_v53, %v2329_v2 }
0x244c   :  { %v4834_v7 = vsub.f32 %v4824_v6, %v4832_v43  ;;  %v4835_v8 = vmul.f32 %v4833_v42, %v4833_v42  ;;  %v4891_v6 = vrot.slane %v4882_v53, %v2333_v23  ;;  %v7427_v53 = vld [vmem:[%s7778_s6 + $0x8] sm:$0xff]  }
0x244e   :  { %4837 = vadd.xlane.f32.xlu0 %v4835_v8  ;;  %v4836_v24 = vmul.f32 %v4834_v7, %v4834_v7 }
0x2450   :  { %4839 = vadd.xlane.f32.xlu1 %v4836_v24 }
0x24db   :  { %v4838_v25 = vpop.xlane.xlu0 %4837 }
0x24dc   :  { %v4841_v26 = vmul.f32 0.0078125, %v4838_v25 }
0x24dd   :  { %v4840_v46 = vpop.xlane.xlu1 %4839 }
0x24de   :  { %v4843_v28 = vadd.f32 1e-12, %v4841_v26  ;;  %v4842_v50 = vmul.f32 0.0078125, %v4840_v46 }
0x24e0   :  { %7514 = vrsqrt.f32 %v4843_v28  ;;  %v4844_v29 = vadd.f32 1e-12, %v4842_v50 }
0x24e2   :  { %7516 = vrsqrt.f32 %v4844_v29 }
0x24ea   :  { %v7515_v30 = vpop.eup %7514 }
0x24eb   :  { %v4847_v44 = vmul.f32 %v7515_v30, %v4833_v42 }
0x24ec   :  { %v7517_v32 = vpop.eup %7516 }
0x24ed   :  { %v4848_v49 = vmul.f32 %v7517_v32, %v4834_v7  ;;  %v4855_v3 = vmul.f32 %v6065_v31, %v4847_v44 }
0x24ef   :  { %v4856_v34 = vmul.f32 %v6065_v31, %v4848_v49  ;;  %v8590_v5 = vadd.f32 %v6066_v33, %v4855_v3 }
0x24f1   :  { %v8592_v35 = vadd.f32 %v6066_v33, %v4856_v34 }
0x24f3   :  { %v4865_v36 = vpack.c.bf16 %v8592_v35, %v8590_v5 }
0x24f5   :  { %5007 = vmatmul.mubr.bf16.vlgmr.msra.gmra.mrb[92].mxu0 %v4865_v36 }
0x24f6   :  { %7092 = vmatprep.mubr.msk.bf16.mxu0 %vm7595_vm0, %v7594_v1  ;;  %7077 = vmatpush3.bf16.msra.mxu0 %v7426_v4 }
0x24f7   :  { %7078 = vmatprep.subr.bf16.mxu0 %v7594_v1 }
0x24fa   :  { %7079 = vmatpush3.bf16.msra.mxu0 %v7427_v53 }
0x24fb   :  { %7080 = vmatprep.subr.bf16.mxu0 %v7594_v1 }
0x25c8   :  { %v5008_v27 = vpop.f32.mrb[92].mxu0 }
0x25c9   :  { %v5009_v40 = vadd.f32 %v5008_v27, %v4887_v56  ;;  %v5010_v41 = vpop.f32.mrb[93].mxu0 }
0x25ca   :  { %v5011_v58 = vadd.f32 %v5010_v41, %v4891_v6  ;;  %v5012_v61 = vpop.f32.mrb[94].mxu0 }
0x25cb   :  { %v5021_v45 = vmul.f32 0.044715, %v5009_v40  ;;  %v5013_v21 = vadd.f32 %v5012_v61, %v4887_v56  ;;  %v5014_v42 = vpop.f32.mrb[95].mxu0  ;;  %v5017_v31 = vmul.f32 0.5, %v5009_v40  ;;  %v7428_v61 = vld [vmem:[%s7778_s6 + $0x10] sm:$0xff]  }
0x25cc   :  { %v5022_v43 = vmul.f32 0.044715, %v5011_v58  ;;  %v5015_v7 = vadd.f32 %v5014_v42, %v4891_v6  ;;  %v5018_v49 = vmul.f32 0.5, %v5011_v58  ;;  %7081 = vmatpush3.bf16.msra.mxu0 %v7428_v61  ;;  %v7431_v42 = vld [vmem:[%s7778_s6 + $0x28] sm:$0xff]  }
0x25cd   :  { %v5025_v8 = vmul.f32 %v5021_v45, %v5009_v40  ;;  %v5023_v24 = vmul.f32 0.044715, %v5013_v21  ;;  %v5019_v44 = vmul.f32 0.5, %v5013_v21  ;;  %7082 = vmatprep.subr.bf16.mxu0 %v7594_v1  ;;  %v7429_v45 = vld [vmem:[%s7778_s6 + $0x18] sm:$0xff]  }
0x25ce   :  { %v5026_v9 = vmul.f32 %v5022_v43, %v5011_v58  ;;  %v5024_v10 = vmul.f32 0.044715, %v5015_v7  ;;  %v5020_v3 = vmul.f32 0.5, %v5015_v7  ;;  %v7432_v43 = vld [vmem:[%s7778_s6 + $0x30] sm:$0xff]  }
0x25cf   :  { %v5029_v11 = vmul.f32 %v5025_v8, %v5009_v40  ;;  %v5027_v12 = vmul.f32 %v5023_v24, %v5013_v21 }
0x25d0   :  { %v5030_v2 = vmul.f32 %v5026_v9, %v5011_v58  ;;  %v5028_v13 = vmul.f32 %v5024_v10, %v5015_v7  ;;  %7083 = vmatpush3.bf16.msra.mxu0 %v7429_v45 }
0x25d1   :  { %v5033_v0 = vadd.f32 %v5029_v11, %v5009_v40  ;;  %v5031_v23 = vmul.f32 %v5027_v12, %v5013_v21  ;;  %7084 = vmatprep.subr.bf16.mxu0 %v7594_v1 }
0x25d2   :  { %v5032_v14 = vmul.f32 %v5028_v13, %v5015_v7  ;;  %v5034_v15 = vadd.f32 %v5030_v2, %v5011_v58  ;;  %v6100_v13 = vld [vmem:[%s8691_s7] ss:$0 sm:$0xff] }
0x25d3   :  { %v5037_v16 = vmul.f32 0.7978846, %v5033_v0  ;;  %v5035_v17 = vadd.f32 %v5031_v23, %v5013_v21  ;;  %v7430_v21 = vld [vmem:[%s7778_s6 + $0x20] sm:$0xff]  }
0x25d4   :  { %v5036_v18 = vadd.f32 %v5032_v14, %v5015_v7  ;;  %v5038_v22 = vmul.f32 0.7978846, %v5034_v15  ;;  %7085 = vmatpush3.bf16.msra.mxu0 %v7430_v21  ;;  %v7433_v7 = vld [vmem:[%s7778_s6 + $0x38] sm:$0xff]   ;;  %s7597_s6 = smov [#allocation2]  }
0x25d5   :  { %7518 = vtanh.f32 %v5037_v16  ;;  %v5039_v19 = vmul.f32 0.7978846, %v5035_v17  ;;  %7086 = vmatprep.subr.bf16.mxu0 %v7594_v1  ;;  %v6101_v16 = vld [vmem:[%s7773_s4] ss:$0 sm:$0xff]  ;;  %s5393_s10 = sshll.u32 %s7597_s6, 4  ;;  %s5394_s10 = int_to_ptr.vmem [resolvable:$true] %s5393_s10 }
0x25d6   :  { %v5040_v25 = vmul.f32 0.7978846, %v5036_v18  ;;  %7520 = vtanh.f32 %v5038_v22  ;;  %s7534_s11 = scalar_lea.vmem %s5394_s10, 256  ;;  %p7539_p1 = scmp.lt.s32.totalorder %s5394_s10, %s5394_s10 }
0x25d7   :  { %7522 = vtanh.f32 %v5039_v19  ;;  %v6102_v19 = vld [vmem:[%s7783_s20] ss:$0 sm:$0xff]  ;;  %p7535_p0 = scmp.ne.s32.totalorder %s5394_s10, %s7534_s11  ;;  %p7540_p2 = scmp.lt.s32.totalorder %s7534_s11, %s7534_s11 }
0x25d8   :  { %7524 = vtanh.f32 %v5040_v25  ;;  %7087 = vmatpush3.bf16.msra.mxu0 %v7431_v42 }
0x25d9   :  { %7088 = vmatprep.subr.bf16.mxu0 %v7594_v1  ;;  %p7541_p3 = por %p7540_p2, %p7539_p1 }
0x25db   :  { %p7542_p4 = pnand %p7541_p3, %p7535_p0 }
0x25dc   :  { %7089 = vmatpush3.bf16.msra.mxu0 %v7432_v43 }
0x25dd   :  { %7090 = vmatprep.subr.bf16.mxu0 %v7594_v1 }
0x25df   :  { %v7519_v26 = vpop.eup %7518 }
0x25e0   :  { %v7521_v46 = vpop.eup %7520  ;;  %v5045_v28 = vadd.f32 1.0, %v7519_v26  ;;  %7091 = vmatpush3.bf16.msra.mxu0 %v7433_v7 }
0x25e1   :  { %v7523_v50 = vpop.eup %7522  ;;  %v5046_v29 = vadd.f32 1.0, %v7521_v46 }
0x25e2   :  { %v7525_v30 = vpop.eup %7524  ;;  %v5047_v32 = vadd.f32 1.0, %v7523_v50  ;;  %v5049_v34 = vmul.f32 %v5045_v28, %v5017_v31 }
0x25e3   :  { %v5048_v33 = vadd.f32 1.0, %v7525_v30  ;;  %v5050_v37 = vmul.f32 %v5046_v29, %v5018_v49 }
0x25e4   :  { %v5051_v36 = vmul.f32 %v5047_v32, %v5019_v44 }
0x25e5   :  { %v5052_v38 = vmul.f32 %v5048_v33, %v5020_v3 }
0x25e6   :  { %v5053_v39 = vpack.c.bf16 %v5051_v36, %v5049_v34 }
0x25e7   :  { %v5054_v47 = vpack.c.bf16 %v5052_v38, %v5050_v37 }
0x25e9   :  { %5222 = vmatprep.mubr.bf16.mxu1 %v5054_v47 }
0x25ea   :  { %5223 = vmatmul.mubr.bf16.vlgmr.msra.gmra.mrb[108].mxu1 %v5053_v39 }
0x26bd   :  { %v6421_v48 = vpop.f32.mrb[108].mxu1 }
0x26be   :  { %v6422_v52 = vpop.f32.mrb[109].mxu1 }
0x26bf   :  { %v6423_v54 = vadd.f32 %v6422_v52, %v6421_v48  ;;  %v6424_v55 = vpop.f32.mrb[110].mxu1 }
0x26c0   :  { %v6425_v57 = vpop.f32.mrb[111].mxu1 }
0x26c1   :  { %v5225_v59 = vadd.f32 %v6423_v54, %v6083_v51  ;;  %v6426_v60 = vadd.f32 %v6425_v57, %v6424_v55 }
0x26c3   :  { %v5228_v62 = vadd.f32 %v6426_v60, %v6083_v51  ;;  %v5231_v63 = vadd.f32 %v5225_v59, %v8590_v5 }
0x26c5   :  { %5235 = vadd.xlane.f32.xlu0 %v5231_v63  ;;  %v5232_v20 = vadd.f32 %v5228_v62, %v8592_v35 }
0x26c7   :  { %5237 = vadd.xlane.f32.xlu1 %v5232_v20 }
0x2752   :  { %v5236_v56 = vpop.xlane.xlu0 %5235 }
0x2753   :  { %v5239_v6 = vmul.f32 0.0078125, %v5236_v56 }
0x2754   :  { %v5238_v27 = vpop.xlane.xlu1 %5237 }
0x2755   :  { %v5241_v40 = vsub.f32 %v5231_v63, %v5239_v6  ;;  %v5240_v5 = vmul.f32 0.0078125, %v5238_v27 }
0x2757   :  { %v5242_v41 = vsub.f32 %v5232_v20, %v5240_v5  ;;  %v5243_v35 = vmul.f32 %v5241_v40, %v5241_v40 }
0x2759   :  { %5245 = vadd.xlane.f32.xlu0 %v5243_v35  ;;  %v5244_v58 = vmul.f32 %v5242_v41, %v5242_v41 }
0x275b   :  { %5247 = vadd.xlane.f32.xlu1 %v5244_v58 }
0x27e6   :  { %v5246_v8 = vpop.xlane.xlu0 %5245 }
0x27e7   :  { %v5249_v24 = vmul.f32 0.0078125, %v5246_v8 }
0x27e8   :  { %v5248_v9 = vpop.xlane.xlu1 %5247 }
0x27e9   :  { %v5251_v10 = vadd.f32 1e-12, %v5249_v24  ;;  %v5250_v11 = vmul.f32 0.0078125, %v5248_v9 }
0x27eb   :  { %7526 = vrsqrt.f32 %v5251_v10  ;;  %v5252_v12 = vadd.f32 1e-12, %v5250_v11 }
0x27ed   :  { %7528 = vrsqrt.f32 %v5252_v12 }
0x27f5   :  { %v7527_v2 = vpop.eup %7526 }
0x27f6   :  { %v5255_v0 = vmul.f32 %v7527_v2, %v5241_v40 }
0x27f7   :  { %v7529_v23 = vpop.eup %7528 }
0x27f8   :  { %v5256_v14 = vmul.f32 %v7529_v23, %v5242_v41  ;;  %v5263_v15 = vmul.f32 %v6100_v13, %v5255_v0 }
0x27fa   :  { %v5264_v17 = vmul.f32 %v6100_v13, %v5256_v14  ;;  %v5271_v1 = vadd.f32 %v6101_v16, %v5263_v15 }
0x27fc   :  { %v5272_v18 = vadd.f32 %v6101_v16, %v5264_v17 }
0x27fe   :  { %v5273_v22 = vpack.c.bf16 %v5272_v18, %v5271_v1 }
0x2800   :  { %7093 = vmatmul.mubr.bf16.vlgmr.msra.gmra.mrb[96].mxu0 %v5273_v22 }
0x28d3   :  { %v5379_v25 = vpop.f32.mrb[96].mxu0 }
0x28d4   :  { %v5380_v26 = vadd.f32 %v6102_v19, %v5379_v25  ;;  %v7094_v46 = vpop.f32.mrb[97].mxu0 }
0x28d5   :  { %v5382_v28 = vpop.f32.mrb[98].mxu0 }
0x28d6   :  { %5386 = vst [vmem:[#allocation2] sm:$0xff] %v5380_v26  ;;  %v5383_v50 = vadd.f32 %v6102_v19, %v5382_v28  ;;  %v7095_v29 = vpop.f32.mrb[99].mxu0 }
0x28d8   :  { %5387 = vst [vmem:[#allocation2 + $0x8] sm:$0xff] %v5383_v50 }
0x28d9   :  { %7545 = shalt.err (!%p7542_p4)
}
0x28da   :  { %s7546_s20 = scalar_lea.hbm %s7788_s27, 256 }
0x28db   :  { %p7547_p5 = scmp.ne.s32.totalorder %s7788_s27, %s7546_s20  ;;  %p7550_p6 = scmp.lt.u32.totalorder %s7546_s20, %s7788_s27 }
0x28dd   :  { %p7552_p7 = pnand %p7550_p6, %p7547_p5 }
0x28df   :  { %7555 = shalt.err (!%p7552_p7)
}
0x28e0   :  { %s7598_s4 = smov 128   ;;  %s7599_s15 = smov 8  }
0x28e1   :  { %5399 = dma.vmem_to_hbm [thread:$0]  %s5394_s10, 256, %s7788_s27, [#allocation3], %s7598_s4, %s7598_s4, %s7599_s15  }
0x28e2   :  { %7556 = dma.done.wait [#allocation3], 256  }
0x28e3   :  { %7557 = vsyncadd [#allocation3], 4294967040 }
0x28e4   :  { %5403 = vsyncpa [#allocation3], 1 }

</bundles_post_ra>
